<compile_context>
chip_gen: v7x
topology: tpu7x:2x2x1
jax: 0.10.0
libtpu: 0.0.40
codegen_flags: <defaults>
</compile_context>

<pallas_src>
import jax
import jax.numpy as jnp
from jax.experimental import pallas as pl
from jax.experimental.pallas import tpu as pltpu

EPS = 1e-5


def _fused_kernel(x_ref, w1_ref, gb_ref, w2_ref, s_ref, o_ref):
    # ---- Stage 1: ReLU -> 1x1 conv (bf16 MXU, f32 acc) -> BN -> ReLU ----
    x = jnp.maximum(x_ref[...], 0)                                        # (Cin, P) bf16
    y = jnp.dot(w1_ref[...], x, preferred_element_type=jnp.float32)       # (Cmid, P) f32

    mean = jnp.mean(y, axis=1, keepdims=True)                             # (Cmid, 1)
    var = jnp.mean(jnp.square(y - mean), axis=1, keepdims=True)           # biased var
    scale = gb_ref[:, 0:1] * jax.lax.rsqrt(var + EPS)                     # gamma / std
    shift = gb_ref[:, 1:2] - mean * scale                                 # beta - mean*scale
    z = jnp.maximum(y * scale + shift, 0.0)                               # (Cmid, P) f32
    zb = z.astype(jnp.bfloat16)

    # ---- Stage 2: 3x3 conv (pad=1) ----
    # One big MXU op applies all 9 taps' weights at once: rows are (tap, cout).
    c_all = jnp.dot(w2_ref[...], zb, preferred_element_type=jnp.float32)  # (9*Cout, P)
    cb = c_all.astype(jnp.bfloat16)

    cout = o_ref.shape[0]
    ntaps = s_ref.shape[0]
    acc = jnp.zeros(o_ref.shape, jnp.float32)
    for k in range(ntaps):
        # Constant 0/1 shift+halo matrix realizes the spatial offset of tap k.
        acc = acc + jnp.dot(cb[k * cout:(k + 1) * cout, :], s_ref[k],
                            preferred_element_type=jnp.float32)
    o_ref[...] = acc


def _shift_matrices(N, H, W):
    """S[k, s, r] = 1 iff pixel s is the (kh,kw)-neighbour of pixel r (in-image)."""
    P = N * H * W
    r = jnp.arange(P)
    h = (r // W) % H
    w = r % W
    s_idx = jnp.arange(P)[:, None]                                        # (P, 1)
    mats = []
    for di in range(3):
        for dj in range(3):
            off = (di - 1) * W + (dj - 1)
            hh, ww = h + (di - 1), w + (dj - 1)
            valid = (hh >= 0) & (hh < H) & (ww >= 0) & (ww < W)
            mats.append(((s_idx == (r + off)[None, :]) & valid[None, :])
                        .astype(jnp.float32))
    return jnp.stack(mats)                                                # (9, P, P)


def fused_forward(x_nchw, w1_t, gamma, beta, w2_taps):
    N, Cin, H, W = x_nchw.shape
    Cmid = w1_t.shape[0]
    Cout = w2_taps.shape[1]
    P = N * H * W

    # Channels-first flat view (Cin, P); for N == 1 this is a pure reshape.
    if N == 1:
        x_cp = x_nchw.reshape(Cin, P)
    else:
        x_cp = jnp.transpose(x_nchw, (1, 0, 2, 3)).reshape(Cin, P)

    # bf16 matmul operands (halves HBM traffic, native bf16 MXU).
    x_bf = x_cp.astype(jnp.bfloat16)
    w1_bf = w1_t.astype(jnp.bfloat16)
    w2_rows = w2_taps.reshape(9 * Cout, Cmid).astype(jnp.bfloat16)   # row = k*Cout + o
    gb = jnp.stack([gamma, beta], axis=1).astype(jnp.float32)        # (Cmid, 2) packed
    # Constant 0/1 shift matrices (input-independent -> folded under jit).
    s_mats = _shift_matrices(N, H, W).astype(jnp.bfloat16)           # (9, P, P)

    out_cp = pl.pallas_call(
        _fused_kernel,
        out_shape=jax.ShapeDtypeStruct((Cout, P), jnp.float32),
        in_specs=[pl.BlockSpec(memory_space=pltpu.MemorySpace.VMEM)] * 5,
        out_specs=pl.BlockSpec(memory_space=pltpu.MemorySpace.VMEM),
    )(x_bf, w1_bf, gb, w2_rows, s_mats)

    out = out_cp.reshape(Cout, N, H, W)
    if N == 1:
        return out.reshape(N, Cout, H, W)          # free for N == 1
    return jnp.transpose(out, (1, 0, 2, 3))


def reference_forward(x_nchw, w1_t, gamma, beta, w2_taps):
    # Pure-JAX f32 reference mirroring torch semantics (training-mode BN).
    x = jnp.maximum(x_nchw, 0.0)
    xh = jnp.transpose(x, (0, 2, 3, 1))                                   # NHWC
    y = jnp.einsum("nhwc,dc->nhwd", xh, w1_t,
                   precision=jax.lax.Precision.HIGHEST)
    mean = jnp.mean(y, axis=(0, 1, 2), keepdims=True)
    var = jnp.mean(jnp.square(y - mean), axis=(0, 1, 2), keepdims=True)
    z = jnp.maximum((y - mean) * jax.lax.rsqrt(var + EPS) * gamma + beta, 0.0)
    cout = w2_taps.shape[1]
    w2_hwio = jnp.transpose(w2_taps.reshape(3, 3, cout, -1), (0, 1, 3, 2))
    out = jax.lax.conv_general_dilated(
        z, w2_hwio, window_strides=(1, 1), padding=((1, 1), (1, 1)),
        dimension_numbers=("NHWC", "HWIO", "NHWC"),
        precision=jax.lax.Precision.HIGHEST)
    return jnp.transpose(out, (0, 3, 1, 2))


if __name__ == "__main__":
    key = jax.random.PRNGKey(0)
    kx, k1, k2, kg, kb = jax.random.split(key, 5)

    # Shapes implied by the module (channel sizes fixed by the conv weights).
    N, Cin, H, W = 1, 1856, 7, 7
    Cmid, Cout = 128, 32

    x = jax.random.normal(kx, (N, Cin, H, W), dtype=jnp.float32)
    w1_t = jax.random.normal(k1, (Cmid, Cin), dtype=jnp.float32) * (1.0 / jnp.sqrt(Cin))
    w2_taps = jax.random.normal(k2, (9, Cout, Cmid), dtype=jnp.float32) * (1.0 / jnp.sqrt(9 * Cmid))
    gamma = 1.0 + 0.1 * jax.random.normal(kg, (Cmid,), dtype=jnp.float32)
    beta = 0.1 * jax.random.normal(kb, (Cmid,), dtype=jnp.float32)

    out = jax.jit(fused_forward)(x, w1_t, gamma, beta, w2_taps)
    out = jax.block_until_ready(out)
    assert out.shape == (N, Cout, H, W), out.shape

    # Tolerance accounts for bf16 matmul operands vs the f32 HIGHEST reference.
    ref = reference_forward(x, w1_t, gamma, beta, w2_taps)
    assert bool(jnp.allclose(out, ref, rtol=2e-2, atol=2e-2)), "mismatch vs reference"

    print("KERNEL_OK")
</pallas_src>

<mosaic_0001>
module attributes {stable_mosaic.version = 11 : i64} {
  func.func @_fused_kernel(%arg0: memref<1856x49xbf16, #tpu.memory_space<vmem>>, %arg1: memref<128x1856xbf16, #tpu.memory_space<vmem>>, %arg2: memref<128x2xf32, #tpu.memory_space<vmem>>, %arg3: memref<288x128xbf16, #tpu.memory_space<vmem>>, %arg4: memref<9x49x49xbf16, #tpu.memory_space<vmem>>, %arg5: memref<32x49xf32, #tpu.memory_space<vmem>>) attributes {dimension_semantics = [], scalar_prefetch = 0 : i64, scratch_operands = 0 : i64, tpu.core_type = #tpu.core_type<tc>} {
    %c0 = arith.constant 0 : index
    %c0_0 = arith.constant 0 : index
    %0 = vector.load %arg0[%c0, %c0_0] : memref<1856x49xbf16, #tpu.memory_space<vmem>>, vector<1856x49xbf16>
    %cst = arith.constant 0.000000e+00 : bf16
    %1 = vector.broadcast %cst : bf16 to vector<1856x49xbf16>
    %2 = arith.maximumf %0, %1 : vector<1856x49xbf16>
    %c0_1 = arith.constant 0 : index
    %c0_2 = arith.constant 0 : index
    %3 = vector.load %arg1[%c0_1, %c0_2] : memref<128x1856xbf16, #tpu.memory_space<vmem>>, vector<128x1856xbf16>
    %cst_3 = arith.constant dense<0.000000e+00> : vector<128x49xf32>
    %4 = tpu.matmul %3, %2, %cst_3 {dimension_numbers = #tpu.dot_dimension_numbers<[1], [0], [0], [1], [0, 0, 1, 1], [], []>} : vector<128x1856xbf16>, vector<1856x49xbf16>, vector<128x49xf32> -> vector<128x49xf32>
    %cst_4 = arith.constant dense<0.000000e+00> : vector<128xf32>
    %5 = vector.multi_reduction <add>, %4, %cst_4 [1] : vector<128x49xf32> to vector<128xf32>
    %6 = vector.shape_cast %5 : vector<128xf32> to vector<128x1xf32>
    %cst_5 = arith.constant 4.900000e+01 : f32
    %7 = vector.broadcast %cst_5 : f32 to vector<128x1xf32>
    %8 = arith.divf %6, %7 : vector<128x1xf32>
    %9 = vector.broadcast %8 : vector<128x1xf32> to vector<128x49xf32>
    %10 = arith.subf %4, %9 : vector<128x49xf32>
    %11 = arith.mulf %10, %10 : vector<128x49xf32>
    %cst_6 = arith.constant dense<0.000000e+00> : vector<128xf32>
    %12 = vector.multi_reduction <add>, %11, %cst_6 [1] : vector<128x49xf32> to vector<128xf32>
    %13 = vector.shape_cast %12 : vector<128xf32> to vector<128x1xf32>
    %cst_7 = arith.constant 4.900000e+01 : f32
    %14 = vector.broadcast %cst_7 : f32 to vector<128x1xf32>
    %15 = arith.divf %13, %14 : vector<128x1xf32>
    %c0_8 = arith.constant 0 : index
    %c0_9 = arith.constant 0 : index
    %16 = vector.load %arg2[%c0_8, %c0_9] : memref<128x2xf32, #tpu.memory_space<vmem>>, vector<128x1xf32>
    %cst_10 = arith.constant 9.99999974E-6 : f32
    %17 = vector.broadcast %cst_10 : f32 to vector<128x1xf32>
    %18 = arith.addf %15, %17 : vector<128x1xf32>
    %19 = math.rsqrt %18 : vector<128x1xf32>
    %20 = arith.mulf %16, %19 : vector<128x1xf32>
    %c0_11 = arith.constant 0 : index
    %c1 = arith.constant 1 : index
    %21 = vector.load %arg2[%c0_11, %c1] : memref<128x2xf32, #tpu.memory_space<vmem>>, vector<128x1xf32>
    %22 = arith.mulf %8, %20 : vector<128x1xf32>
    %23 = arith.subf %21, %22 : vector<128x1xf32>
    %24 = vector.broadcast %20 : vector<128x1xf32> to vector<128x49xf32>
    %25 = arith.mulf %4, %24 : vector<128x49xf32>
    %26 = vector.broadcast %23 : vector<128x1xf32> to vector<128x49xf32>
    %27 = arith.addf %25, %26 : vector<128x49xf32>
    %cst_12 = arith.constant 0.000000e+00 : f32
    %28 = vector.broadcast %cst_12 : f32 to vector<128x49xf32>
    %29 = arith.maximumf %27, %28 : vector<128x49xf32>
    %30 = arith.truncf %29 : vector<128x49xf32> to vector<128x49xbf16>
    %c0_13 = arith.constant 0 : index
    %c0_14 = arith.constant 0 : index
    %31 = vector.load %arg3[%c0_13, %c0_14] : memref<288x128xbf16, #tpu.memory_space<vmem>>, vector<288x128xbf16>
    %cst_15 = arith.constant dense<0.000000e+00> : vector<288x49xf32>
    %32 = tpu.matmul %31, %30, %cst_15 {dimension_numbers = #tpu.dot_dimension_numbers<[1], [0], [0], [1], [0, 0, 1, 1], [], []>} : vector<288x128xbf16>, vector<128x49xbf16>, vector<288x49xf32> -> vector<288x49xf32>
    %33 = arith.truncf %32 : vector<288x49xf32> to vector<288x49xbf16>
    %cst_16 = arith.constant 0.000000e+00 : f32
    %34 = vector.broadcast %cst_16 : f32 to vector<32x49xf32>
    %35 = vector.extract_strided_slice %33 {offsets = [0, 0], sizes = [32, 49], strides = [1, 1]} : vector<288x49xbf16> to vector<32x49xbf16>
    %c0_17 = arith.constant 0 : index
    %c0_18 = arith.constant 0 : index
    %c0_19 = arith.constant 0 : index
    %36 = vector.load %arg4[%c0_17, %c0_18, %c0_19] : memref<9x49x49xbf16, #tpu.memory_space<vmem>>, vector<1x49x49xbf16>
    %37 = vector.shape_cast %36 : vector<1x49x49xbf16> to vector<49x49xbf16>
    %cst_20 = arith.constant dense<0.000000e+00> : vector<32x49xf32>
    %38 = tpu.matmul %35, %37, %cst_20 {dimension_numbers = #tpu.dot_dimension_numbers<[1], [0], [0], [1], [0, 0, 1, 1], [], []>} : vector<32x49xbf16>, vector<49x49xbf16>, vector<32x49xf32> -> vector<32x49xf32>
    %39 = arith.addf %34, %38 : vector<32x49xf32>
    %40 = vector.extract_strided_slice %33 {offsets = [32, 0], sizes = [32, 49], strides = [1, 1]} : vector<288x49xbf16> to vector<32x49xbf16>
    %c1_21 = arith.constant 1 : index
    %c0_22 = arith.constant 0 : index
    %c0_23 = arith.constant 0 : index
    %41 = vector.load %arg4[%c1_21, %c0_22, %c0_23] : memref<9x49x49xbf16, #tpu.memory_space<vmem>>, vector<1x49x49xbf16>
    %42 = vector.shape_cast %41 : vector<1x49x49xbf16> to vector<49x49xbf16>
    %cst_24 = arith.constant dense<0.000000e+00> : vector<32x49xf32>
    %43 = tpu.matmul %40, %42, %cst_24 {dimension_numbers = #tpu.dot_dimension_numbers<[1], [0], [0], [1], [0, 0, 1, 1], [], []>} : vector<32x49xbf16>, vector<49x49xbf16>, vector<32x49xf32> -> vector<32x49xf32>
    %44 = arith.addf %39, %43 : vector<32x49xf32>
    %45 = vector.extract_strided_slice %33 {offsets = [64, 0], sizes = [32, 49], strides = [1, 1]} : vector<288x49xbf16> to vector<32x49xbf16>
    %c2 = arith.constant 2 : index
    %c0_25 = arith.constant 0 : index
    %c0_26 = arith.constant 0 : index
    %46 = vector.load %arg4[%c2, %c0_25, %c0_26] : memref<9x49x49xbf16, #tpu.memory_space<vmem>>, vector<1x49x49xbf16>
    %47 = vector.shape_cast %46 : vector<1x49x49xbf16> to vector<49x49xbf16>
    %cst_27 = arith.constant dense<0.000000e+00> : vector<32x49xf32>
    %48 = tpu.matmul %45, %47, %cst_27 {dimension_numbers = #tpu.dot_dimension_numbers<[1], [0], [0], [1], [0, 0, 1, 1], [], []>} : vector<32x49xbf16>, vector<49x49xbf16>, vector<32x49xf32> -> vector<32x49xf32>
    %49 = arith.addf %44, %48 : vector<32x49xf32>
    %50 = vector.extract_strided_slice %33 {offsets = [96, 0], sizes = [32, 49], strides = [1, 1]} : vector<288x49xbf16> to vector<32x49xbf16>
    %c3 = arith.constant 3 : index
    %c0_28 = arith.constant 0 : index
    %c0_29 = arith.constant 0 : index
    %51 = vector.load %arg4[%c3, %c0_28, %c0_29] : memref<9x49x49xbf16, #tpu.memory_space<vmem>>, vector<1x49x49xbf16>
    %52 = vector.shape_cast %51 : vector<1x49x49xbf16> to vector<49x49xbf16>
    %cst_30 = arith.constant dense<0.000000e+00> : vector<32x49xf32>
    %53 = tpu.matmul %50, %52, %cst_30 {dimension_numbers = #tpu.dot_dimension_numbers<[1], [0], [0], [1], [0, 0, 1, 1], [], []>} : vector<32x49xbf16>, vector<49x49xbf16>, vector<32x49xf32> -> vector<32x49xf32>
    %54 = arith.addf %49, %53 : vector<32x49xf32>
    %55 = vector.extract_strided_slice %33 {offsets = [128, 0], sizes = [32, 49], strides = [1, 1]} : vector<288x49xbf16> to vector<32x49xbf16>
    %c4 = arith.constant 4 : index
    %c0_31 = arith.constant 0 : index
    %c0_32 = arith.constant 0 : index
    %56 = vector.load %arg4[%c4, %c0_31, %c0_32] : memref<9x49x49xbf16, #tpu.memory_space<vmem>>, vector<1x49x49xbf16>
    %57 = vector.shape_cast %56 : vector<1x49x49xbf16> to vector<49x49xbf16>
    %cst_33 = arith.constant dense<0.000000e+00> : vector<32x49xf32>
    %58 = tpu.matmul %55, %57, %cst_33 {dimension_numbers = #tpu.dot_dimension_numbers<[1], [0], [0], [1], [0, 0, 1, 1], [], []>} : vector<32x49xbf16>, vector<49x49xbf16>, vector<32x49xf32> -> vector<32x49xf32>
    %59 = arith.addf %54, %58 : vector<32x49xf32>
    %60 = vector.extract_strided_slice %33 {offsets = [160, 0], sizes = [32, 49], strides = [1, 1]} : vector<288x49xbf16> to vector<32x49xbf16>
    %c5 = arith.constant 5 : index
    %c0_34 = arith.constant 0 : index
    %c0_35 = arith.constant 0 : index
    %61 = vector.load %arg4[%c5, %c0_34, %c0_35] : memref<9x49x49xbf16, #tpu.memory_space<vmem>>, vector<1x49x49xbf16>
    %62 = vector.shape_cast %61 : vector<1x49x49xbf16> to vector<49x49xbf16>
    %cst_36 = arith.constant dense<0.000000e+00> : vector<32x49xf32>
    %63 = tpu.matmul %60, %62, %cst_36 {dimension_numbers = #tpu.dot_dimension_numbers<[1], [0], [0], [1], [0, 0, 1, 1], [], []>} : vector<32x49xbf16>, vector<49x49xbf16>, vector<32x49xf32> -> vector<32x49xf32>
    %64 = arith.addf %59, %63 : vector<32x49xf32>
    %65 = vector.extract_strided_slice %33 {offsets = [192, 0], sizes = [32, 49], strides = [1, 1]} : vector<288x49xbf16> to vector<32x49xbf16>
    %c6 = arith.constant 6 : index
    %c0_37 = arith.constant 0 : index
    %c0_38 = arith.constant 0 : index
    %66 = vector.load %arg4[%c6, %c0_37, %c0_38] : memref<9x49x49xbf16, #tpu.memory_space<vmem>>, vector<1x49x49xbf16>
    %67 = vector.shape_cast %66 : vector<1x49x49xbf16> to vector<49x49xbf16>
    %cst_39 = arith.constant dense<0.000000e+00> : vector<32x49xf32>
    %68 = tpu.matmul %65, %67, %cst_39 {dimension_numbers = #tpu.dot_dimension_numbers<[1], [0], [0], [1], [0, 0, 1, 1], [], []>} : vector<32x49xbf16>, vector<49x49xbf16>, vector<32x49xf32> -> vector<32x49xf32>
    %69 = arith.addf %64, %68 : vector<32x49xf32>
    %70 = vector.extract_strided_slice %33 {offsets = [224, 0], sizes = [32, 49], strides = [1, 1]} : vector<288x49xbf16> to vector<32x49xbf16>
    %c7 = arith.constant 7 : index
    %c0_40 = arith.constant 0 : index
    %c0_41 = arith.constant 0 : index
    %71 = vector.load %arg4[%c7, %c0_40, %c0_41] : memref<9x49x49xbf16, #tpu.memory_space<vmem>>, vector<1x49x49xbf16>
    %72 = vector.shape_cast %71 : vector<1x49x49xbf16> to vector<49x49xbf16>
    %cst_42 = arith.constant dense<0.000000e+00> : vector<32x49xf32>
    %73 = tpu.matmul %70, %72, %cst_42 {dimension_numbers = #tpu.dot_dimension_numbers<[1], [0], [0], [1], [0, 0, 1, 1], [], []>} : vector<32x49xbf16>, vector<49x49xbf16>, vector<32x49xf32> -> vector<32x49xf32>
    %74 = arith.addf %69, %73 : vector<32x49xf32>
    %75 = vector.extract_strided_slice %33 {offsets = [256, 0], sizes = [32, 49], strides = [1, 1]} : vector<288x49xbf16> to vector<32x49xbf16>
    %c8 = arith.constant 8 : index
    %c0_43 = arith.constant 0 : index
    %c0_44 = arith.constant 0 : index
    %76 = vector.load %arg4[%c8, %c0_43, %c0_44] : memref<9x49x49xbf16, #tpu.memory_space<vmem>>, vector<1x49x49xbf16>
    %77 = vector.shape_cast %76 : vector<1x49x49xbf16> to vector<49x49xbf16>
    %cst_45 = arith.constant dense<0.000000e+00> : vector<32x49xf32>
    %78 = tpu.matmul %75, %77, %cst_45 {dimension_numbers = #tpu.dot_dimension_numbers<[1], [0], [0], [1], [0, 0, 1, 1], [], []>} : vector<32x49xbf16>, vector<49x49xbf16>, vector<32x49xf32> -> vector<32x49xf32>
    %79 = arith.addf %74, %78 : vector<32x49xf32>
    %c0_46 = arith.constant 0 : index
    %c0_47 = arith.constant 0 : index
    %80 = vector.load %arg5[%c0_46, %c0_47] : memref<32x49xf32, #tpu.memory_space<vmem>>, vector<32x49xf32>
    tpu.vector_store %arg5[%c0_46, %c0_47], %79 {strides = array<i32>} : memref<32x49xf32, #tpu.memory_space<vmem>>, vector<32x49xf32>,
    return
  }
}

</mosaic_0001>

<bundles_post_ra>
// kernel: fused_forward.1
= control target key start
LH: loop header
LB: loop body
LE: loop exit
PB: predicated region body
PF: predicated region fallthrough
CT: control target
= control target key end

     0   :  { %v5823_v3 = vmov 0   ;;  %vm1909_vm0 = vcmask 523264   ;;  %vm2710_vm1 = vcmask 400384   ;;  %s5824_s23 = smov 1   ;;  %vm3629_vm2 = vcmask 1040384   ;;  %s7950_s0 = inlined_call_operand.vmem [shape: bf16[1856,49], index: 0, kind: input, shape index: {}]   ;;  %s7951_s1 = inlined_call_operand.vmem [shape: bf16[128,1856], index: 1, kind: input, shape index: {}]   ;;  %s7952_s2 = inlined_call_operand.vmem [shape: f32[128,2], index: 2, kind: input, shape index: {}]   ;;  %s7953_s3 = inlined_call_operand.vmem [shape: bf16[288,128], index: 3, kind: input, shape index: {}]   ;;  %s7954_s4 = inlined_call_operand.vmem [shape: bf16[9,49,49], index: 4, kind: input, shape index: {}]   ;;  %s7955_s5 = inlined_call_operand.vmem [shape: f32[32,49], index: 5, kind: output, shape index: {}]  }
   0x1   :  { %v37_v0 = vld [vmem:[%s7950_s0 + $0x40] sm:$0xf]  ;;  %v38_v1 = vld [vmem:[%s7950_s0 + $0x44] sm:$0xf]  ;;  %5556 = vset.pattern.permute.xlu1 %v5823_v3  ;;  %5555 = vset.pattern.permute.xlu0 %v5823_v3  ;;  %v39_v15 = vld [vmem:[%s7950_s0 + $0x48] sm:$0xf] }
   0x2   :  { %v69_v2 = vld [vmem:[%s7950_s0 + $0xc0] sm:$0xf]  ;;  %v269_v4 = vmax.bf16 %v5823_v3, %v37_v0  ;;  %v270_v5 = vmax.bf16 %v5823_v3, %v38_v1  ;;  %v70_v6 = vld [vmem:[%s7950_s0 + $0xc4] sm:$0xf]  ;;  %v40_v19 = vld [vmem:[%s7950_s0 + $0x4c] sm:$0xf]  ;;  %v271_v20 = vmax.bf16 %v5823_v3, %v39_v15 }
   0x3   :  { %v301_v7 = vmax.bf16 %v5823_v3, %v69_v2  ;;  %v21_v8 = vld [vmem:[%s7950_s0] sm:$0xf]  ;;  %v22_v9 = vld [vmem:[%s7950_s0 + $0x4] sm:$0xf]  ;;  %v302_v10 = vmax.bf16 %v5823_v3, %v70_v6  ;;  %v71_v21 = vld [vmem:[%s7950_s0 + $0xc8] sm:$0xf]  ;;  %v272_v25 = vmax.bf16 %v5823_v3, %v40_v19 }
   0x4   :  { %v253_v11 = vmax.bf16 %v5823_v3, %v21_v8  ;;  %v254_v12 = vmax.bf16 %v5823_v3, %v22_v9  ;;  %v53_v13 = vld [vmem:[%s7950_s0 + $0x80] sm:$0xf]  ;;  %v54_v14 = vld [vmem:[%s7950_s0 + $0x84] sm:$0xf]  ;;  %v4536_v16 = vcombine.low %v269_v4, %v270_v5  ;;  %v72_v22 = vld [vmem:[%s7950_s0 + $0xcc] sm:$0xf]  ;;  %v303_v26 = vmax.bf16 %v5823_v3, %v71_v21 }
   0x5   :  { %v285_v17 = vmax.bf16 %v5823_v3, %v53_v13  ;;  %v286_v18 = vmax.bf16 %v5823_v3, %v54_v14  ;;  %v4552_v23 = vcombine.low %v301_v7, %v302_v10  ;;  %v23_v27 = vld [vmem:[%s7950_s0 + $0x8] sm:$0xf]  ;;  %v24_v28 = vld [vmem:[%s7950_s0 + $0xc] sm:$0xf]  ;;  %v304_v31 = vmax.bf16 %v5823_v3, %v72_v22  ;;  %v41_v35 = vld [vmem:[%s7950_s0 + $0x50] sm:$0xf] }
   0x6   :  { %v4528_v24 = vcombine.low %v253_v11, %v254_v12  ;;  %v55_v29 = vld [vmem:[%s7950_s0 + $0x88] sm:$0xf]  ;;  %4780 = vmatprep.subr.bf16.mxu0 %v4536_v16  ;;  %v255_v32 = vmax.bf16 %v5823_v3, %v23_v27  ;;  %v256_v33 = vmax.bf16 %v5823_v3, %v24_v28  ;;  %v56_v34 = vld [vmem:[%s7950_s0 + $0x8c] sm:$0xf]  ;;  %v42_v36 = vld [vmem:[%s7950_s0 + $0x54] sm:$0xf]  ;;  %v4537_v37 = vcombine.low %v271_v20, %v272_v25 }
   0x7   :  { %v4544_v30 = vcombine.low %v285_v17, %v286_v18  ;;  %4844 = vmatprep.subr.bf16.mxu1 %v4552_v23  ;;  %v287_v38 = vmax.bf16 %v5823_v3, %v55_v29  ;;  %v288_v39 = vmax.bf16 %v5823_v3, %v56_v34  ;;  %v73_v40 = vld [vmem:[%s7950_s0 + $0xd0] sm:$0xf]  ;;  %v74_v41 = vld [vmem:[%s7950_s0 + $0xd4] sm:$0xf]  ;;  %v4553_v43 = vcombine.low %v303_v26, %v304_v31  ;;  %v43_v54 = vld [vmem:[%s7950_s0 + $0x58] sm:$0xf] }
   0x8   :  { %4781 = vmatpush3.bf16.msra.mxu0 %v4528_v24  ;;  %v25_v42 = vld [vmem:[%s7950_s0 + $0x10] sm:$0xf]  ;;  %v4529_v44 = vcombine.low %v255_v32, %v256_v33  ;;  %v273_v45 = vmax.bf16 %v5823_v3, %v41_v35  ;;  %v274_v46 = vmax.bf16 %v5823_v3, %v42_v36  ;;  %v26_v47 = vld [vmem:[%s7950_s0 + $0x14] sm:$0xf]  ;;  %v305_v51 = vmax.bf16 %v5823_v3, %v73_v40  ;;  %v44_v55 = vld [vmem:[%s7950_s0 + $0x5c] sm:$0xf] }
   0x9   :  { %4845 = vmatpush3.bf16.msra.mxu1 %v4544_v30  ;;  %v57_v48 = vld [vmem:[%s7950_s0 + $0x90] sm:$0xf]  ;;  %v58_v49 = vld [vmem:[%s7950_s0 + $0x94] sm:$0xf]  ;;  %4782 = vmatprep.subr.bf16.mxu0 %v4537_v37  ;;  %v4545_v50 = vcombine.low %v287_v38, %v288_v39  ;;  %v306_v52 = vmax.bf16 %v5823_v3, %v74_v41  ;;  %v257_v53 = vmax.bf16 %v5823_v3, %v25_v42  ;;  %v75_v56 = vld [vmem:[%s7950_s0 + $0xd8] sm:$0xf] }
   0xa   :  { %4846 = vmatprep.subr.bf16.mxu1 %v4553_v43  ;;  %v4538_v57 = vcombine.low %v273_v45, %v274_v46  ;;  %v258_v58 = vmax.bf16 %v5823_v3, %v26_v47  ;;  %v289_v59 = vmax.bf16 %v5823_v3, %v57_v48  ;;  %v290_v60 = vmax.bf16 %v5823_v3, %v58_v49  ;;  %v76_v61 = vld [vmem:[%s7950_s0 + $0xdc] sm:$0xf]  ;;  %v27_v62 = vld [vmem:[%s7950_s0 + $0x18] sm:$0xf]  ;;  %v45_v7 = vld [vmem:[%s7950_s0 + $0x60] sm:$0xf] }
   0xb   :  { %v28_v63 = vld [vmem:[%s7950_s0 + $0x1c] sm:$0xf]  ;;  %v4554_v0 = vcombine.low %v305_v51, %v306_v52  ;;  %v275_v1 = vmax.bf16 %v5823_v3, %v43_v54  ;;  %v276_v2 = vmax.bf16 %v5823_v3, %v44_v55  ;;  %v307_v4 = vmax.bf16 %v5823_v3, %v75_v56  ;;  %v59_v5 = vld [vmem:[%s7950_s0 + $0x98] sm:$0xf]  ;;  %v46_v11 = vld [vmem:[%s7950_s0 + $0x64] sm:$0xf] }
   0xc   :  { %4783 = vmatpush3.bf16.msra.mxu0 %v4529_v44  ;;  %v60_v6 = vld [vmem:[%s7950_s0 + $0x9c] sm:$0xf]  ;;  %v4530_v8 = vcombine.low %v257_v53, %v258_v58  ;;  %v4546_v9 = vcombine.low %v289_v59, %v290_v60  ;;  %v308_v10 = vmax.bf16 %v5823_v3, %v76_v61  ;;  %v77_v12 = vld [vmem:[%s7950_s0 + $0xe0] sm:$0xf]  ;;  %v78_v13 = vld [vmem:[%s7950_s0 + $0xe4] sm:$0xf]  ;;  %v259_v15 = vmax.bf16 %v5823_v3, %v27_v62 }
   0xd   :  { %4847 = vmatpush3.bf16.msra.mxu1 %v4545_v50  ;;  %4784 = vmatprep.subr.bf16.mxu0 %v4538_v57  ;;  %v4539_v14 = vcombine.low %v275_v1, %v276_v2  ;;  %v260_v16 = vmax.bf16 %v5823_v3, %v28_v63  ;;  %v291_v17 = vmax.bf16 %v5823_v3, %v59_v5  ;;  %v29_v18 = vld [vmem:[%s7950_s0 + $0x20] sm:$0xf]  ;;  %v30_v19 = vld [vmem:[%s7950_s0 + $0x24] sm:$0xf]  ;;  %v47_v26 = vld [vmem:[%s7950_s0 + $0x68] sm:$0xf] }
   0xe   :  { %4848 = vmatprep.subr.bf16.mxu1 %v4554_v0  ;;  %v4555_v20 = vcombine.low %v307_v4, %v308_v10  ;;  %v292_v21 = vmax.bf16 %v5823_v3, %v60_v6  ;;  %v277_v22 = vmax.bf16 %v5823_v3, %v45_v7  ;;  %v278_v23 = vmax.bf16 %v5823_v3, %v46_v11  ;;  %v61_v24 = vld [vmem:[%s7950_s0 + $0xa0] sm:$0xf]  ;;  %v62_v25 = vld [vmem:[%s7950_s0 + $0xa4] sm:$0xf]  ;;  %v48_v31 = vld [vmem:[%s7950_s0 + $0x6c] sm:$0xf] }
   0xf   :  { %v4531_v27 = vcombine.low %v259_v15, %v260_v16  ;;  %v309_v28 = vmax.bf16 %v5823_v3, %v77_v12  ;;  %v310_v29 = vmax.bf16 %v5823_v3, %v78_v13  ;;  %v261_v30 = vmax.bf16 %v5823_v3, %v29_v18  ;;  %v79_v32 = vld [vmem:[%s7950_s0 + $0xe8] sm:$0xf]  ;;  %v80_v33 = vld [vmem:[%s7950_s0 + $0xec] sm:$0xf]  ;;  %v49_v48 = vld [vmem:[%s7950_s0 + $0x70] sm:$0xf] }
  0x10   :  { %4785 = vmatpush3.bf16.msra.mxu0 %v4530_v8  ;;  %v4547_v34 = vcombine.low %v291_v17, %v292_v21  ;;  %v4540_v35 = vcombine.low %v277_v22, %v278_v23  ;;  %v262_v36 = vmax.bf16 %v5823_v3, %v30_v19  ;;  %v31_v37 = vld [vmem:[%s7950_s0 + $0x28] sm:$0xf]  ;;  %v32_v38 = vld [vmem:[%s7950_s0 + $0x2c] sm:$0xf]  ;;  %v293_v41 = vmax.bf16 %v5823_v3, %v61_v24  ;;  %v50_v49 = vld [vmem:[%s7950_s0 + $0x74] sm:$0xf] }
  0x11   :  { %4849 = vmatpush3.bf16.msra.mxu1 %v4546_v9  ;;  %4786 = vmatprep.subr.bf16.mxu0 %v4539_v14  ;;  %v63_v39 = vld [vmem:[%s7950_s0 + $0xa8] sm:$0xf]  ;;  %v4556_v40 = vcombine.low %v309_v28, %v310_v29  ;;  %v294_v42 = vmax.bf16 %v5823_v3, %v62_v25  ;;  %v279_v43 = vmax.bf16 %v5823_v3, %v47_v26  ;;  %v64_v44 = vld [vmem:[%s7950_s0 + $0xac] sm:$0xf]  ;;  %v81_v50 = vld [vmem:[%s7950_s0 + $0xf0] sm:$0xf] }
  0x12   :  { %4850 = vmatprep.subr.bf16.mxu1 %v4555_v20  ;;  %v280_v45 = vmax.bf16 %v5823_v3, %v48_v31  ;;  %v311_v46 = vmax.bf16 %v5823_v3, %v79_v32  ;;  %v312_v47 = vmax.bf16 %v5823_v3, %v80_v33  ;;  %v4532_v51 = vcombine.low %v261_v30, %v262_v36  ;;  %v82_v55 = vld [vmem:[%s7950_s0 + $0xf4] sm:$0xf]  ;;  %v33_v56 = vld [vmem:[%s7950_s0 + $0x30] sm:$0xf]  ;;  %v51_v4 = vld [vmem:[%s7950_s0 + $0x78] sm:$0xf] }
  0x13   :  { %v263_v52 = vmax.bf16 %v5823_v3, %v31_v37  ;;  %v264_v53 = vmax.bf16 %v5823_v3, %v32_v38  ;;  %v295_v54 = vmax.bf16 %v5823_v3, %v63_v39  ;;  %v34_v57 = vld [vmem:[%s7950_s0 + $0x34] sm:$0xf]  ;;  %v4548_v58 = vcombine.low %v293_v41, %v294_v42  ;;  %v65_v61 = vld [vmem:[%s7950_s0 + $0xb0] sm:$0xf]  ;;  %v52_v5 = vld [vmem:[%s7950_s0 + $0x7c] sm:$0xf] }
  0x14   :  { %4787 = vmatpush3.bf16.msra.mxu0 %v4531_v27  ;;  %v4541_v59 = vcombine.low %v279_v43, %v280_v45  ;;  %v296_v60 = vmax.bf16 %v5823_v3, %v64_v44  ;;  %v66_v62 = vld [vmem:[%s7950_s0 + $0xb4] sm:$0xf]  ;;  %v4557_v63 = vcombine.low %v311_v46, %v312_v47  ;;  %v281_v0 = vmax.bf16 %v5823_v3, %v49_v48  ;;  %v83_v6 = vld [vmem:[%s7950_s0 + $0xf8] sm:$0xf]  ;;  %v84_v10 = vld [vmem:[%s7950_s0 + $0xfc] sm:$0xf] }
  0x15   :  { %4851 = vmatpush3.bf16.msra.mxu1 %v4547_v34  ;;  %4788 = vmatprep.subr.bf16.mxu0 %v4540_v35  ;;  %v282_v1 = vmax.bf16 %v5823_v3, %v50_v49  ;;  %v313_v2 = vmax.bf16 %v5823_v3, %v81_v50  ;;  %v314_v7 = vmax.bf16 %v5823_v3, %v82_v55  ;;  %v35_v15 = vld [vmem:[%s7950_s0 + $0x38] sm:$0xf]  ;;  %v5563_v16 = vld [vmem:[%s7951_s1 + $0x4] ss:$60 sps:$4 sm:$0xff]   ;;  %v36_v20 = vld [vmem:[%s7950_s0 + $0x3c] sm:$0xf] }
  0x16   :  { %4852 = vmatprep.subr.bf16.mxu1 %v4556_v40  ;;  %v265_v8 = vmax.bf16 %v5823_v3, %v33_v56  ;;  %v266_v9 = vmax.bf16 %v5823_v3, %v34_v57  ;;  %v4533_v11 = vcombine.low %v263_v52, %v264_v53  ;;  %v4549_v12 = vcombine.low %v295_v54, %v296_v60  ;;  %v5566_v21 = vld [vmem:[%s7951_s1 + $0xc] ss:$60 sps:$4 sm:$0xff]   ;;  %v67_v25 = vld [vmem:[%s7950_s0 + $0xb8] sm:$0xf]  ;;  %v68_v26 = vld [vmem:[%s7950_s0 + $0xbc] sm:$0xf] }
  0x17   :  { %v297_v13 = vmax.bf16 %v5823_v3, %v65_v61  ;;  %v298_v14 = vmax.bf16 %v5823_v3, %v66_v62  ;;  %v4542_v17 = vcombine.low %v281_v0, %v282_v1  ;;  %v283_v18 = vmax.bf16 %v5823_v3, %v51_v4  ;;  %v133_v27 = vld [vmem:[%s7950_s0 + $0x1c0] sm:$0xf]  ;;  %1966 = vmatprep.mubr.bf16.mxu0 %v5563_v16  ;;  %v134_v29 = vld [vmem:[%s7950_s0 + $0x1c4] sm:$0xf]  ;;  %v135_v41 = vld [vmem:[%s7950_s0 + $0x1c8] sm:$0xf] }
  0x18   :  { %4789 = vmatpush3.bf16.msra.mxu0 %v4532_v51  ;;  %v284_v19 = vmax.bf16 %v5823_v3, %v52_v5  ;;  %v4558_v22 = vcombine.low %v313_v2, %v314_v7  ;;  %v315_v23 = vmax.bf16 %v5823_v3, %v83_v6  ;;  %v316_v24 = vmax.bf16 %v5823_v3, %v84_v10  ;;  %v117_v39 = vld [vmem:[%s7950_s0 + $0x180] sm:$0xf]  ;;  %v118_v40 = vld [vmem:[%s7950_s0 + $0x184] sm:$0xf]  ;;  %v136_v42 = vld [vmem:[%s7950_s0 + $0x1cc] sm:$0xf] }
  0x19   :  { %4853 = vmatpush3.bf16.msra.mxu1 %v4548_v58  ;;  %4790 = vmatprep.subr.bf16.mxu0 %v4541_v59  ;;  %v4534_v28 = vcombine.low %v265_v8, %v266_v9  ;;  %v4550_v30 = vcombine.low %v297_v13, %v298_v14  ;;  %v267_v31 = vmax.bf16 %v5823_v3, %v35_v15  ;;  %v5561_v45 = vld [vmem:[%s7951_s1] ss:$60 sps:$4 sm:$0xff]   ;;  %v5564_v48 = vld [vmem:[%s7951_s1 + $0x8] ss:$60 sps:$4 sm:$0xff]   ;;  %v120_v53 = vld [vmem:[%s7950_s0 + $0x18c] sm:$0xf] }
  0x1a   :  { %4854 = vmatprep.subr.bf16.mxu1 %v4557_v63  ;;  %v268_v32 = vmax.bf16 %v5823_v3, %v36_v20  ;;  %2063 = vmatprep.mubr.bf16.mxu1 %v5566_v21  ;;  %v4543_v33 = vcombine.low %v283_v18, %v284_v19  ;;  %v299_v34 = vmax.bf16 %v5823_v3, %v67_v25  ;;  %v119_v52 = vld [vmem:[%s7950_s0 + $0x188] sm:$0xf]  ;;  %v137_v54 = vld [vmem:[%s7950_s0 + $0x1d0] sm:$0xf]  ;;  %v138_v55 = vld [vmem:[%s7950_s0 + $0x1d4] sm:$0xf] }
  0x1b   :  { %v300_v35 = vmax.bf16 %v5823_v3, %v68_v26  ;;  %v4559_v36 = vcombine.low %v315_v23, %v316_v24  ;;  %v365_v37 = vmax.bf16 %v5823_v3, %v133_v27  ;;  %v366_v38 = vmax.bf16 %v5823_v3, %v134_v29  ;;  %v5567_v56 = vld [vmem:[%s7951_s1 + $0x7c] ss:$60 sps:$4 sm:$0xff]   ;;  %v5569_v58 = vld [vmem:[%s7951_s1 + $0x84] ss:$60 sps:$4 sm:$0xff]   ;;  %v121_v61 = vld [vmem:[%s7950_s0 + $0x190] sm:$0xf] }
  0x1c   :  { %4791 = vmatpush3.bf16.msra.mxu0 %v4533_v11  ;;  %v4535_v43 = vcombine.low %v267_v31, %v268_v32  ;;  %v349_v46 = vmax.bf16 %v5823_v3, %v117_v39  ;;  %v350_v47 = vmax.bf16 %v5823_v3, %v118_v40  ;;  %v367_v50 = vmax.bf16 %v5823_v3, %v135_v41  ;;  %v122_v62 = vld [vmem:[%s7950_s0 + $0x194] sm:$0xf]  ;;  %v139_v2 = vld [vmem:[%s7950_s0 + $0x1d8] sm:$0xf]  ;;  %v140_v4 = vld [vmem:[%s7950_s0 + $0x1dc] sm:$0xf] }
  0x1d   :  { %4855 = vmatpush3.bf16.msra.mxu1 %v4549_v12  ;;  %4792 = vmatprep.subr.bf16.mxu0 %v4542_v17  ;;  %v4551_v44 = vcombine.low %v299_v34, %v300_v35  ;;  %v4584_v49 = vcombine.low %v365_v37, %v366_v38  ;;  %v368_v51 = vmax.bf16 %v5823_v3, %v136_v42  ;;  %v123_v5 = vld [vmem:[%s7950_s0 + $0x198] sm:$0xf]  ;;  %v124_v8 = vld [vmem:[%s7950_s0 + $0x19c] sm:$0xf]  ;;  %v5573_v12 = vld [vmem:[%s7951_s1 + $0xf4] ss:$60 sps:$4 sm:$0xff]  }
  0x1e   :  { %4856 = vmatprep.subr.bf16.mxu1 %v4558_v22  ;;  %v4576_v57 = vcombine.low %v349_v46, %v350_v47  ;;  %v351_v59 = vmax.bf16 %v5823_v3, %v119_v52  ;;  %v352_v60 = vmax.bf16 %v5823_v3, %v120_v53  ;;  %v369_v0 = vmax.bf16 %v5823_v3, %v137_v54  ;;  %v5571_v9 = vld [vmem:[%s7951_s1 + $0x78] ss:$60 sps:$4 sm:$0xff]   ;;  %v5572_v11 = vld [vmem:[%s7951_s1 + $0x80] ss:$60 sps:$4 sm:$0xff]   ;;  %v102_v17 = vld [vmem:[%s7950_s0 + $0x144] sm:$0xf] }
  0x1f   :  { %v4585_v63 = vcombine.low %v367_v50, %v368_v51  ;;  %v370_v1 = vmax.bf16 %v5823_v3, %v138_v55  ;;  %v353_v6 = vmax.bf16 %v5823_v3, %v121_v61  ;;  %v354_v7 = vmax.bf16 %v5823_v3, %v122_v62  ;;  %v101_v16 = vld [vmem:[%s7950_s0 + $0x140] sm:$0xf]  ;;  %v5575_v19 = vld [vmem:[%s7951_s1 + $0xfc] ss:$60 sps:$4 sm:$0xff]   ;;  %v142_v24 = vld [vmem:[%s7950_s0 + $0x1e4] sm:$0xf] }
  0x20   :  { %4793 = vmatpush3.bf16.msra.mxu0 %v4534_v28  ;;  %v4577_v10 = vcombine.low %v351_v59, %v352_v60  ;;  %v371_v14 = vmax.bf16 %v5823_v3, %v139_v2  ;;  %v372_v15 = vmax.bf16 %v5823_v3, %v140_v4  ;;  %v141_v18 = vld [vmem:[%s7950_s0 + $0x1e0] sm:$0xf]  ;;  %v6216_v20 = vmax.bf16 %v5823_v3, %v123_v5  ;;  %v86_v26 = vld [vmem:[%s7950_s0 + $0x104] sm:$0xf]  ;;  %v103_v32 = vld [vmem:[%s7950_s0 + $0x148] sm:$0xf] }
  0x21   :  { %4857 = vmatpush3.bf16.msra.mxu1 %v4550_v30  ;;  %4794 = vmatprep.subr.bf16.mxu0 %v4543_v33  ;;  %v4586_v13 = vcombine.low %v369_v0, %v370_v1  ;;  %v6219_v21 = vmax.bf16 %v5823_v3, %v124_v8  ;;  %v333_v22 = vmax.bf16 %v5823_v3, %v101_v16  ;;  %v85_v25 = vld [vmem:[%s7950_s0 + $0x100] sm:$0xf]  ;;  %v126_v31 = vld [vmem:[%s7950_s0 + $0x1a4] sm:$0xf]  ;;  %v87_v38 = vld [vmem:[%s7950_s0 + $0x108] sm:$0xf] }
  0x22   :  { %4858 = vmatprep.subr.bf16.mxu1 %v4559_v36  ;;  %v334_v23 = vmax.bf16 %v5823_v3, %v102_v17  ;;  %v4578_v27 = vcombine.low %v353_v6, %v354_v7  ;;  %v317_v28 = vmax.bf16 %v5823_v3, %v85_v25  ;;  %v318_v29 = vmax.bf16 %v5823_v3, %v86_v26  ;;  %v125_v30 = vld [vmem:[%s7950_s0 + $0x1a0] sm:$0xf]  ;;  %v104_v36 = vld [vmem:[%s7950_s0 + $0x14c] sm:$0xf]  ;;  %v106_v53 = vld [vmem:[%s7950_s0 + $0x154] sm:$0xf] }
  0x23   :  { %v373_v34 = vmax.bf16 %v5823_v3, %v141_v18  ;;  %v374_v35 = vmax.bf16 %v5823_v3, %v142_v24  ;;  %v335_v37 = vmax.bf16 %v5823_v3, %v103_v32  ;;  %v88_v39 = vld [vmem:[%s7950_s0 + $0x10c] sm:$0xf]  ;;  %v4587_v40 = vcombine.low %v371_v14, %v372_v15  ;;  %v143_v55 = vld [vmem:[%s7950_s0 + $0x1e8] sm:$0xf]  ;;  %v89_v62 = vld [vmem:[%s7950_s0 + $0x110] sm:$0xf] }
  0x24   :  { %4795 = vmatpush3.bf16.msra.mxu0 %v4535_v43  ;;  %v4568_v33 = vcombine.low %v333_v22, %v334_v23  ;;  %v4560_v41 = vcombine.low %v317_v28, %v318_v29  ;;  %v336_v42 = vmax.bf16 %v5823_v3, %v104_v36  ;;  %v319_v43 = vmax.bf16 %v5823_v3, %v87_v38  ;;  %v5577_v50 = vld [vmem:[%s7951_s1 + $0xf0] ss:$60 sps:$4 sm:$0xff]   ;;  %v127_v0 = vld [vmem:[%s7950_s0 + $0x1a8] sm:$0xf]  ;;  %v107_v6 = vld [vmem:[%s7950_s0 + $0x158] sm:$0xf] }
  0x25   :  { %4859 = vmatpush3.bf16.msra.mxu1 %v4551_v44  ;;  %v4579_v44 = vcombine.low %v6216_v20, %v6219_v21  ;;  %v357_v46 = vmax.bf16 %v5823_v3, %v125_v30  ;;  %v358_v47 = vmax.bf16 %v5823_v3, %v126_v31  ;;  %v4588_v51 = vcombine.low %v373_v34, %v374_v35  ;;  %v128_v4 = vld [vmem:[%s7950_s0 + $0x1ac] sm:$0xf]  ;;  %v108_v7 = vld [vmem:[%s7950_s0 + $0x15c] sm:$0xf]  ;;  %v109_v22 = vld [vmem:[%s7950_s0 + $0x160] sm:$0xf] }
  0x26   :  { %4972 = vmatprep.subr.bf16.mxu1 %v4584_v49  ;;  %4908 = vmatprep.subr.bf16.mxu0 %v4568_v33  ;;  %v105_v49 = vld [vmem:[%s7950_s0 + $0x150] sm:$0xf]  ;;  %v338_v59 = vmax.bf16 %v5823_v3, %v106_v53  ;;  %v375_v60 = vmax.bf16 %v5823_v3, %v143_v55  ;;  %v321_v1 = vmax.bf16 %v5823_v3, %v89_v62  ;;  %v110_v23 = vld [vmem:[%s7950_s0 + $0x164] sm:$0xf]  ;;  %v146_v28 = vld [vmem:[%s7950_s0 + $0x1f4] sm:$0xf] }
  0x27   :  { %1967 = vmatmul.mubr.bf16.vlgmr.msra.gmra.mrb[0].mxu0 %v5561_v45  ;;  %v320_v45 = vmax.bf16 %v5823_v3, %v88_v39  ;;  %v337_v54 = vmax.bf16 %v5823_v3, %v105_v49  ;;  %v359_v5 = vmax.bf16 %v5823_v3, %v127_v0  ;;  %v4580_v14 = vcombine.low %v357_v46, %v358_v47  ;;  %v93_v29 = vld [vmem:[%s7950_s0 + $0x120] sm:$0xf]  ;;  %v5583_v30 = vld [vmem:[%s7951_s1 + $0x168] ss:$60 sps:$4 sm:$0xff]   ;;  %v129_v35 = vld [vmem:[%s7950_s0 + $0x1b0] sm:$0xf] }
  0x28   :  { %2064 = vmatmul.mubr.bf16.vlgmr.msra.gmra.mrb[0].mxu1 %v5564_v48  ;;  %1974 = vmatprep.mubr.bf16.mxu0 %v5567_v56  ;;  %v4569_v48 = vcombine.low %v335_v37, %v336_v42  ;;  %v144_v56 = vld [vmem:[%s7950_s0 + $0x1ec] sm:$0xf]  ;;  %v340_v15 = vmax.bf16 %v5823_v3, %v108_v7  ;;  %v341_v25 = vmax.bf16 %v5823_v3, %v109_v22  ;;  %v94_v33 = vld [vmem:[%s7950_s0 + $0x124] sm:$0xf]  ;;  %v130_v36 = vld [vmem:[%s7950_s0 + $0x1b4] sm:$0xf] }
  0x29   :  { %4973 = vmatpush3.bf16.msra.mxu1 %v4576_v57  ;;  %2071 = vmatprep.mubr.bf16.mxu1 %v5569_v58  ;;  %v4561_v52 = vcombine.low %v319_v43, %v320_v45  ;;  %v5578_v57 = vld [vmem:[%s7951_s1 + $0xf8] ss:$60 sps:$4 sm:$0xff]   ;;  %v5579_v58 = vld [vmem:[%s7951_s1 + $0x16c] ss:$60 sps:$4 sm:$0xff]   ;;  %v376_v61 = vmax.bf16 %v5823_v3, %v144_v56  ;;  %v4570_v8 = vcombine.low %v337_v54, %v338_v59  ;;  %v5585_v49 = vld [vmem:[%s7951_s1 + $0x1e4] ss:$60 sps:$4 sm:$0xff]  }
  0x2a   :  { %4974 = vmatprep.subr.bf16.mxu1 %v4585_v63  ;;  %4909 = vmatpush3.bf16.msra.mxu0 %v4560_v41  ;;  %v90_v63 = vld [vmem:[%s7950_s0 + $0x114] sm:$0xf]  ;;  %v342_v26 = vmax.bf16 %v5823_v3, %v110_v23  ;;  %v378_v32 = vmax.bf16 %v5823_v3, %v146_v28  ;;  %v325_v34 = vmax.bf16 %v5823_v3, %v93_v29  ;;  %v5584_v37 = vld [vmem:[%s7951_s1 + $0x170] ss:$60 sps:$4 sm:$0xff]   ;;  %v111_v41 = vld [vmem:[%s7950_s0 + $0x168] sm:$0xf] }
  0x2b   :  { %4910 = vmatprep.subr.bf16.mxu0 %v4569_v48  ;;  %v322_v2 = vmax.bf16 %v5823_v3, %v90_v63  ;;  %v4589_v18 = vcombine.low %v375_v60, %v376_v61  ;;  %v326_v39 = vmax.bf16 %v5823_v3, %v94_v33  ;;  %v112_v42 = vld [vmem:[%s7950_s0 + $0x16c] sm:$0xf]  ;;  %v95_v43 = vld [vmem:[%s7950_s0 + $0x128] sm:$0xf]  ;;  %v362_v45 = vmax.bf16 %v5823_v3, %v130_v36  ;;  %v113_v56 = vld [vmem:[%s7950_s0 + $0x170] sm:$0xf] }
  0x2c   :  { %v4572_v38 = vcombine.low %v341_v25, %v342_v26  ;;  %v343_v46 = vmax.bf16 %v5823_v3, %v111_v41  ;;  %v344_v47 = vmax.bf16 %v5823_v3, %v112_v42  ;;  %v96_v48 = vld [vmem:[%s7950_s0 + $0x12c] sm:$0xf]  ;;  %v327_v54 = vmax.bf16 %v5823_v3, %v95_v43  ;;  %v148_v61 = vld [vmem:[%s7950_s0 + $0x1fc] sm:$0xf]  ;;  %v97_v63 = vld [vmem:[%s7950_s0 + $0x130] sm:$0xf] }
  0x2d   :  { %4975 = vmatpush3.bf16.msra.mxu1 %v4577_v10  ;;  %v339_v10 = vmax.bf16 %v5823_v3, %v107_v6  ;;  %v328_v55 = vmax.bf16 %v5823_v3, %v96_v48  ;;  %v345_v59 = vmax.bf16 %v5823_v3, %v113_v56  ;;  %v98_v0 = vld [vmem:[%s7950_s0 + $0x134] sm:$0xf]  ;;  %v5589_v6 = vld [vmem:[%s7951_s1 + $0x1e0] ss:$60 sps:$4 sm:$0xff]   ;;  %v166_v42 = vld [vmem:[%s7950_s0 + $0x244] sm:$0xf] }
  0x2e   :  { %4976 = vmatprep.subr.bf16.mxu1 %v4586_v13  ;;  %v5581_v13 = vld [vmem:[%s7951_s1 + $0x174] ss:$60 sps:$4 sm:$0xff]   ;;  %4911 = vmatpush3.bf16.msra.mxu0 %v4561_v52  ;;  %v4573_v53 = vcombine.low %v343_v46, %v344_v47  ;;  %v197_v22 = vld [vmem:[%s7950_s0 + $0x2c0] sm:$0xf]  ;;  %v5599_v36 = vld [vmem:[%s7951_s1 + $0x2dc] ss:$60 sps:$4 sm:$0xff]  }
  0x2f   :  { %1975 = vmatmul.mubr.bf16.gmra.mrb[4].mxu0 %v5571_v9  ;;  %v360_v9 = vmax.bf16 %v5823_v3, %v128_v4  ;;  %4912 = vmatprep.subr.bf16.mxu0 %v4570_v8  ;;  %v4571_v21 = vcombine.low %v339_v10, %v340_v15  ;;  %v132_v4 = vld [vmem:[%s7950_s0 + $0x1bc] sm:$0xf]  ;;  %v4565_v10 = vcombine.low %v327_v54, %v328_v55  ;;  %v5593_v23 = vld [vmem:[%s7951_s1 + $0x264] ss:$60 sps:$4 sm:$0xff]   ;;  %v5595_v33 = vld [vmem:[%s7951_s1 + $0x258] ss:$60 sps:$4 sm:$0xff]  }
  0x30   :  { %2072 = vmatmul.mubr.bf16.gmra.mrb[4].mxu1 %v5572_v11  ;;  %1982 = vmatprep.mubr.bf16.mxu0 %v5573_v12  ;;  %v91_v11 = vld [vmem:[%s7950_s0 + $0x118] sm:$0xf]  ;;  %v92_v12 = vld [vmem:[%s7950_s0 + $0x11c] sm:$0xf]  ;;  %v364_v8 = vmax.bf16 %v5823_v3, %v132_v4  ;;  %v429_v25 = vmax.bf16 %v5823_v3, %v197_v22  ;;  %v5605_v41 = vld [vmem:[%s7951_s1 + $0x354] ss:$60 sps:$4 sm:$0xff]  }
  0x31   :  { %2079 = vmatprep.mubr.bf16.mxu1 %v5575_v19  ;;  %4977 = vmatpush3.bf16.msra.mxu1 %v4578_v27  ;;  %v323_v16 = vmax.bf16 %v5823_v3, %v91_v11  ;;  %v324_v17 = vmax.bf16 %v5823_v3, %v92_v12  ;;  %v4562_v19 = vcombine.low %v321_v1, %v322_v2  ;;  %v145_v27 = vld [vmem:[%s7950_s0 + $0x1f0] sm:$0xf]  ;;  %v131_v2 = vld [vmem:[%s7950_s0 + $0x1b8] sm:$0xf]  ;;  %v5607_v46 = vld [vmem:[%s7951_s1 + $0x348] ss:$60 sps:$4 sm:$0xff]  }
  0x32   :  { %4978 = vmatprep.subr.bf16.mxu1 %v4587_v40  ;;  %v4581_v20 = vcombine.low %v359_v5, %v360_v9  ;;  %v377_v31 = vmax.bf16 %v5823_v3, %v145_v27  ;;  %v361_v40 = vmax.bf16 %v5823_v3, %v129_v35  ;;  %v380_v1 = vmax.bf16 %v5823_v3, %v148_v61  ;;  %v115_v5 = vld [vmem:[%s7950_s0 + $0x178] sm:$0xf]  ;;  %v116_v9 = vld [vmem:[%s7950_s0 + $0x17c] sm:$0xf]  ;;  %v5597_v35 = vld [vmem:[%s7951_s1 + $0x2d4] ss:$60 sps:$4 sm:$0xff]  }
  0x33   :  { %v4563_v24 = vcombine.low %v323_v16, %v324_v17  ;;  %4913 = vmatpush3.bf16.msra.mxu0 %v4562_v19  ;;  %v363_v7 = vmax.bf16 %v5823_v3, %v131_v2  ;;  %v329_v12 = vmax.bf16 %v5823_v3, %v97_v63  ;;  %v347_v17 = vmax.bf16 %v5823_v3, %v115_v5  ;;  %v100_v19 = vld [vmem:[%s7950_s0 + $0x13c] sm:$0xf]  ;;  %v5608_v47 = vld [vmem:[%s7951_s1 + $0x350] ss:$60 sps:$4 sm:$0xff]   ;;  %v183_v54 = vld [vmem:[%s7950_s0 + $0x288] sm:$0xf] }
  0x34   :  { %4914 = vmatprep.subr.bf16.mxu0 %v4571_v21  ;;  %v4582_v52 = vcombine.low %v361_v40, %v362_v45  ;;  %v5591_v21 = vld [vmem:[%s7951_s1 + $0x25c] ss:$60 sps:$4 sm:$0xff]   ;;  %v332_v28 = vmax.bf16 %v5823_v3, %v100_v19  ;;  %v165_v40 = vld [vmem:[%s7950_s0 + $0x240] sm:$0xf]  ;;  %v5611_v48 = vld [vmem:[%s7951_s1 + $0x14] ss:$60 sps:$4 sm:$0xff]  }
  0x35   :  { %4979 = vmatpush3.bf16.msra.mxu1 %v4579_v44  ;;  %v4590_v44 = vcombine.low %v377_v31, %v378_v32  ;;  %v4583_v16 = vcombine.low %v363_v7, %v364_v8  ;;  %v397_v43 = vmax.bf16 %v5823_v3, %v165_v40  ;;  %v184_v55 = vld [vmem:[%s7950_s0 + $0x28c] sm:$0xf]  ;;  %v149_v56 = vld [vmem:[%s7950_s0 + $0x200] sm:$0xf]  ;;  %v202_v2 = vld [vmem:[%s7950_s0 + $0x2d4] sm:$0xf] }
  0x36   :  { %4980 = vmatprep.subr.bf16.mxu1 %v4588_v51  ;;  %v4564_v51 = vcombine.low %v325_v34, %v326_v39  ;;  %v5596_v34 = vld [vmem:[%s7951_s1 + $0x260] ss:$60 sps:$4 sm:$0xff]   ;;  %v5603_v39 = vld [vmem:[%s7951_s1 + $0x34c] ss:$60 sps:$4 sm:$0xff]   ;;  %v5612_v4 = vld [vmem:[%s7951_s1 + $0x18] ss:$60 sps:$4 sm:$0xff]   ;;  %v6547_v7 = vmax.bf16 %v5823_v3, %v184_v55 }
  0x37   :  { %1983 = vmatmul.mubr.bf16.gmra.mrb[8].mxu0 %v5577_v50  ;;  %v5587_v50 = vld [vmem:[%s7951_s1 + $0x1ec] ss:$60 sps:$4 sm:$0xff]   ;;  %v185_v8 = vld [vmem:[%s7950_s0 + $0x290] sm:$0xf]  ;;  %v203_v19 = vld [vmem:[%s7950_s0 + $0x2d8] sm:$0xf] }
  0x38   :  { %2080 = vmatmul.mubr.bf16.gmra.mrb[8].mxu1 %v5578_v57  ;;  %1990 = vmatprep.mubr.bf16.mxu0 %v5579_v58  ;;  %v114_v57 = vld [vmem:[%s7950_s0 + $0x174] sm:$0xf]  ;;  %v147_v58 = vld [vmem:[%s7950_s0 + $0x1f8] sm:$0xf]  ;;  %v5615_v5 = vld [vmem:[%s7951_s1 + $0x8c] ss:$60 sps:$4 sm:$0xff]  }
  0x39   :  { %2087 = vmatprep.mubr.bf16.mxu1 %v5581_v13  ;;  %4981 = vmatpush3.bf16.msra.mxu1 %v4580_v14  ;;  %v346_v60 = vmax.bf16 %v5823_v3, %v114_v57  ;;  %v379_v62 = vmax.bf16 %v5823_v3, %v147_v58  ;;  %v330_v13 = vmax.bf16 %v5823_v3, %v98_v0  ;;  %v99_v14 = vld [vmem:[%s7950_s0 + $0x138] sm:$0xf]  ;;  %v150_v57 = vld [vmem:[%s7950_s0 + $0x204] sm:$0xf]  ;;  %v167_v58 = vld [vmem:[%s7950_s0 + $0x248] sm:$0xf] }
  0x3a   :  { %4982 = vmatprep.subr.bf16.mxu1 %v4589_v18  ;;  %4915 = vmatpush3.bf16.msra.mxu0 %v4563_v24  ;;  %v348_v18 = vmax.bf16 %v5823_v3, %v116_v9  ;;  %v198_v24 = vld [vmem:[%s7950_s0 + $0x2c4] sm:$0xf]  ;;  %v331_v27 = vmax.bf16 %v5823_v3, %v99_v14  ;;  %v381_v9 = vmax.bf16 %v5823_v3, %v149_v56  ;;  %v171_v40 = vld [vmem:[%s7950_s0 + $0x258] sm:$0xf] }
  0x3b   :  { %4916 = vmatprep.subr.bf16.mxu0 %v4572_v38  ;;  %v4591_v11 = vcombine.low %v379_v62, %v380_v1  ;;  %v4574_v15 = vcombine.low %v345_v59, %v346_v60  ;;  %v4566_v26 = vcombine.low %v329_v12, %v330_v13  ;;  %v430_v29 = vmax.bf16 %v5823_v3, %v198_v24  ;;  %v5602_v38 = vld [vmem:[%s7951_s1 + $0x2d8] ss:$60 sps:$4 sm:$0xff]   ;;  %v168_v59 = vld [vmem:[%s7950_s0 + $0x24c] sm:$0xf]  ;;  %v201_v1 = vld [vmem:[%s7950_s0 + $0x2d0] sm:$0xf] }
  0x3c   :  { %v4567_v32 = vcombine.low %v331_v27, %v332_v28  ;;  %v5609_v60 = vld [vmem:[%s7951_s1 + $0x10] ss:$60 sps:$4 sm:$0xff]   ;;  %v186_v12 = vld [vmem:[%s7950_s0 + $0x294] sm:$0xf]  ;;  %v399_v13 = vmax.bf16 %v5823_v3, %v167_v58  ;;  %v400_v14 = vmax.bf16 %v5823_v3, %v168_v59  ;;  %v204_v24 = vld [vmem:[%s7950_s0 + $0x2dc] sm:$0xf]  ;;  %v403_v58 = vmax.bf16 %v5823_v3, %v171_v40 }
  0x3d   :  { %4983 = vmatpush3.bf16.msra.mxu1 %v4581_v20  ;;  %v5590_v20 = vld [vmem:[%s7951_s1 + $0x1e8] ss:$60 sps:$4 sm:$0xff]   ;;  %v4616_v31 = vcombine.low %v429_v25, %v430_v29  ;;  %v187_v25 = vld [vmem:[%s7950_s0 + $0x298] sm:$0xf] }
  0x3e   :  { %4984 = vmatprep.subr.bf16.mxu1 %v4590_v44  ;;  %4917 = vmatpush3.bf16.msra.mxu0 %v4564_v51  ;;  %v398_v44 = vmax.bf16 %v5823_v3, %v166_v42  ;;  %v182_v51 = vld [vmem:[%s7950_s0 + $0x284] sm:$0xf]  ;;  %v159_v40 = vld [vmem:[%s7950_s0 + $0x228] sm:$0xf] }
  0x3f   :  { %1991 = vmatmul.mubr.bf16.gmra.mrb[12].mxu0 %v5583_v30  ;;  %4918 = vmatprep.subr.bf16.mxu0 %v4573_v53  ;;  %v4575_v30 = vcombine.low %v347_v17, %v348_v18  ;;  %v200_v53 = vld [vmem:[%s7950_s0 + $0x2cc] sm:$0xf]  ;;  %v414_v62 = vmax.bf16 %v5823_v3, %v182_v51  ;;  %v6569_v17 = vmax.bf16 %v5823_v3, %v201_v1  ;;  %v5619_v42 = vld [vmem:[%s7951_s1 + $0x88] ss:$60 sps:$4 sm:$0xff]  }
  0x40   :  { %2088 = vmatmul.mubr.bf16.gmra.mrb[12].mxu1 %v5584_v37  ;;  %1998 = vmatprep.mubr.bf16.mxu0 %v5585_v49  ;;  %v5601_v37 = vld [vmem:[%s7951_s1 + $0x2d0] ss:$60 sps:$4 sm:$0xff]   ;;  %v4600_v45 = vcombine.low %v397_v43, %v398_v44  ;;  %v5614_v49 = vld [vmem:[%s7951_s1 + $0x1c] ss:$60 sps:$4 sm:$0xff]   ;;  %v432_v0 = vmax.bf16 %v5823_v3, %v200_v53  ;;  %v6572_v18 = vmax.bf16 %v5823_v3, %v202_v2  ;;  %v190_v55 = vld [vmem:[%s7950_s0 + $0x2a4] sm:$0xf] }
  0x41   :  { %2095 = vmatprep.mubr.bf16.mxu1 %v5587_v50  ;;  %4985 = vmatpush3.bf16.msra.mxu1 %v4582_v52  ;;  %v181_v50 = vld [vmem:[%s7950_s0 + $0x280] sm:$0xf]  ;;  %v199_v52 = vld [vmem:[%s7950_s0 + $0x2c8] sm:$0xf]  ;;  %v436_v43 = vmax.bf16 %v5823_v3, %v204_v24  ;;  %v6624_v44 = vmax.bf16 %v5823_v3, %v187_v25  ;;  %v174_v1 = vld [vmem:[%s7950_s0 + $0x264] sm:$0xf] }
  0x42   :  { %4986 = vmatprep.subr.bf16.mxu1 %v4591_v11  ;;  %4919 = vmatpush3.bf16.msra.mxu0 %v4565_v10  ;;  %v413_v61 = vmax.bf16 %v5823_v3, %v181_v50  ;;  %v431_v63 = vmax.bf16 %v5823_v3, %v199_v52  ;;  %v382_v10 = vmax.bf16 %v5823_v3, %v150_v57  ;;  %v5617_v11 = vld [vmem:[%s7951_s1 + $0x94] ss:$60 sps:$4 sm:$0xff]   ;;  %v189_v50 = vld [vmem:[%s7950_s0 + $0x2a0] sm:$0xf]  ;;  %v207_v57 = vld [vmem:[%s7950_s0 + $0x2e8] sm:$0xf] }
  0x43   :  { %4920 = vmatprep.subr.bf16.mxu0 %v4574_v15  ;;  %v151_v15 = vld [vmem:[%s7950_s0 + $0x208] sm:$0xf] }
  0x44   :  { %v4608_v22 = vcombine.low %v413_v61, %v414_v62  ;;  %v4592_v28 = vcombine.low %v381_v9, %v382_v10  ;;  %v383_v29 = vmax.bf16 %v5823_v3, %v151_v15  ;;  %v156_v61 = vld [vmem:[%s7950_s0 + $0x21c] sm:$0xf]  ;;  %v192_v10 = vld [vmem:[%s7950_s0 + $0x2ac] sm:$0xf]  ;;  %v406_v15 = vmax.bf16 %v5823_v3, %v174_v1 }
  0x45   :  { %4987 = vmatpush3.bf16.msra.mxu1 %v4583_v16  ;;  %v152_v16 = vld [vmem:[%s7950_s0 + $0x20c] sm:$0xf] }
  0x46   :  { %4921 = vmatpush3.bf16.msra.mxu0 %v4566_v26  ;;  %5100 = vmatprep.subr.bf16.mxu1 %v4616_v31  ;;  %v188_v26 = vld [vmem:[%s7950_s0 + $0x29c] sm:$0xf]  ;;  %v153_v31 = vld [vmem:[%s7950_s0 + $0x210] sm:$0xf] }
  0x47   :  { %1999 = vmatmul.mubr.bf16.gmra.mrb[16].mxu0 %v5589_v6  ;;  %4922 = vmatprep.subr.bf16.mxu0 %v4575_v30  ;;  %v6544_v6 = vmax.bf16 %v5823_v3, %v183_v54  ;;  %v384_v30 = vmax.bf16 %v5823_v3, %v152_v16  ;;  %v385_v52 = vmax.bf16 %v5823_v3, %v153_v31  ;;  %v5623_v54 = vld [vmem:[%s7951_s1 + $0x10c] ss:$60 sps:$4 sm:$0xff]   ;;  %v157_v16 = vld [vmem:[%s7950_s0 + $0x220] sm:$0xf]  ;;  %v210_v31 = vld [vmem:[%s7950_s0 + $0x2f4] sm:$0xf] }
  0x48   :  { %2096 = vmatmul.mubr.bf16.gmra.mrb[16].mxu1 %v5590_v20  ;;  %2006 = vmatprep.mubr.bf16.mxu0 %v5591_v21  ;;  %v169_v20 = vld [vmem:[%s7950_s0 + $0x250] sm:$0xf]  ;;  %v170_v21 = vld [vmem:[%s7950_s0 + $0x254] sm:$0xf] }
  0x49   :  { %2103 = vmatprep.mubr.bf16.mxu1 %v5593_v23  ;;  %v4617_v23 = vcombine.low %v431_v63, %v432_v0  ;;  %v4609_v27 = vcombine.low %v6544_v6, %v6547_v7  ;;  %v4593_v51 = vcombine.low %v383_v29, %v384_v30  ;;  %v173_v0 = vld [vmem:[%s7950_s0 + $0x260] sm:$0xf]  ;;  %v6680_v6 = vmax.bf16 %v5823_v3, %v189_v50  ;;  %v208_v7 = vld [vmem:[%s7950_s0 + $0x2ec] sm:$0xf]  ;;  %v209_v30 = vld [vmem:[%s7950_s0 + $0x2f0] sm:$0xf] }
  0x4a   :  { %4923 = vmatpush3.bf16.msra.mxu0 %v4567_v32  ;;  %v6600_v32 = vmax.bf16 %v5823_v3, %v185_v8  ;;  %v191_v8 = vld [vmem:[%s7950_s0 + $0x2a8] sm:$0xf]  ;;  %v440_v24 = vmax.bf16 %v5823_v3, %v208_v7  ;;  %v212_v50 = vld [vmem:[%s7950_s0 + $0x2fc] sm:$0xf] }
  0x4b   :  { %5036 = vmatprep.subr.bf16.mxu0 %v4600_v45  ;;  %v6627_v45 = vmax.bf16 %v5823_v3, %v188_v26  ;;  %v6718_v25 = vmax.bf16 %v5823_v3, %v191_v8  ;;  %v6721_v26 = vmax.bf16 %v5823_v3, %v192_v10  ;;  %v444_v1 = vmax.bf16 %v5823_v3, %v212_v50  ;;  %v196_v8 = vld [vmem:[%s7950_s0 + $0x2bc] sm:$0xf]  ;;  %v231_v50 = vld [vmem:[%s7950_s0 + $0x348] sm:$0xf] }
  0x4f   :  { %2007 = vmatmul.mubr.bf16.gmra.mrb[20].mxu0 %v5595_v33  ;;  %v4601_v33 = vcombine.low %v399_v13, %v400_v14  ;;  %v405_v14 = vmax.bf16 %v5823_v3, %v173_v0  ;;  %v5631_v0 = vld [vmem:[%s7951_s1 + $0x178] ss:$60 sps:$4 sm:$0xff]  }
  0x50   :  { %2104 = vmatmul.mubr.bf16.gmra.mrb[20].mxu1 %v5596_v34  ;;  %2014 = vmatprep.mubr.bf16.mxu0 %v5597_v35  ;;  %v401_v34 = vmax.bf16 %v5823_v3, %v169_v20  ;;  %v402_v35 = vmax.bf16 %v5823_v3, %v170_v21  ;;  %v6705_v20 = vmax.bf16 %v5823_v3, %v207_v57  ;;  %v175_v21 = vld [vmem:[%s7950_s0 + $0x268] sm:$0xf] }
  0x51   :  { %2111 = vmatprep.mubr.bf16.mxu1 %v5599_v36  ;;  %v154_v36 = vld [vmem:[%s7950_s0 + $0x214] sm:$0xf] }
  0x52   :  { %v386_v53 = vmax.bf16 %v5823_v3, %v154_v36  ;;  %v4602_v56 = vcombine.low %v401_v34, %v402_v35  ;;  %v5629_v34 = vld [vmem:[%s7951_s1 + $0x184] ss:$60 sps:$4 sm:$0xff]   ;;  %v4604_v35 = vcombine.low %v405_v14, %v406_v15  ;;  %v193_v36 = vld [vmem:[%s7950_s0 + $0x2b0] sm:$0xf] }
  0x53   :  { %v229_v14 = vld [vmem:[%s7950_s0 + $0x340] sm:$0xf]  ;;  %v230_v15 = vld [vmem:[%s7950_s0 + $0x344] sm:$0xf] }
  0x54   :  { %v4594_v9 = vcombine.low %v385_v52, %v386_v53  ;;  %v391_v52 = vmax.bf16 %v5823_v3, %v159_v40  ;;  %v5649_v40 = vld [vmem:[%s7951_s1 + $0x2e0] ss:$60 sps:$4 sm:$0xff]  }
  0x57   :  { %2015 = vmatmul.mubr.bf16.gmra.mrb[24].mxu0 %v5601_v37  ;;  %v4618_v37 = vcombine.low %v6569_v17, %v6572_v18  ;;  %v158_v17 = vld [vmem:[%s7950_s0 + $0x224] sm:$0xf] }
  0x58   :  { %2112 = vmatmul.mubr.bf16.gmra.mrb[24].mxu1 %v5602_v38  ;;  %2022 = vmatprep.mubr.bf16.mxu0 %v5603_v39  ;;  %v418_v38 = vmax.bf16 %v5823_v3, %v186_v12  ;;  %v6611_v39 = vmax.bf16 %v5823_v3, %v203_v19  ;;  %v388_v12 = vmax.bf16 %v5823_v3, %v156_v61 }
  0x59   :  { %2119 = vmatprep.mubr.bf16.mxu1 %v5605_v41  ;;  %v172_v41 = vld [vmem:[%s7950_s0 + $0x25c] sm:$0xf]  ;;  %v422_v19 = vmax.bf16 %v5823_v3, %v190_v55  ;;  %v162_v55 = vld [vmem:[%s7950_s0 + $0x234] sm:$0xf] }
  0x5a   :  { %v404_v59 = vmax.bf16 %v5823_v3, %v172_v41  ;;  %v4610_v2 = vcombine.low %v6600_v32, %v418_v38  ;;  %v389_v32 = vmax.bf16 %v5823_v3, %v157_v16  ;;  %v407_v38 = vmax.bf16 %v5823_v3, %v175_v21  ;;  %v160_v41 = vld [vmem:[%s7950_s0 + $0x22c] sm:$0xf]  ;;  %v5632_v16 = vld [vmem:[%s7951_s1 + $0x180] ss:$60 sps:$4 sm:$0xff]  }
  0x5b   :  { %v392_v53 = vmax.bf16 %v5823_v3, %v160_v41  ;;  %v5650_v41 = vld [vmem:[%s7951_s1 + $0x2e8] ss:$60 sps:$4 sm:$0xff]  }
  0x5c   :  { %v4603_v13 = vcombine.low %v403_v58, %v404_v59  ;;  %v425_v59 = vmax.bf16 %v5823_v3, %v193_v36  ;;  %v5643_v36 = vld [vmem:[%s7951_s1 + $0x268] ss:$60 sps:$4 sm:$0xff]  }
  0x5d   :  { %v4597_v7 = vcombine.low %v391_v52, %v392_v53 }
  0x5f   :  { %2023 = vmatmul.mubr.bf16.gmra.mrb[28].mxu0 %v5607_v46  ;;  %v205_v46 = vld [vmem:[%s7950_s0 + $0x2e0] sm:$0xf] }
  0x60   :  { %2120 = vmatmul.mubr.bf16.gmra.mrb[28].mxu1 %v5608_v47  ;;  %2160 = vmatprep.mubr.bf16.mxu0 %v5611_v48  ;;  %v206_v47 = vld [vmem:[%s7950_s0 + $0x2e4] sm:$0xf]  ;;  %v5620_v48 = vld [vmem:[%s7951_s1 + $0x90] ss:$60 sps:$4 sm:$0xff]   ;;  %v6664_v62 = vmax.bf16 %v5823_v3, %v205_v46  ;;  %v4621_v46 = vcombine.low %v6705_v20, %v440_v24  ;;  %v5635_v20 = vld [vmem:[%s7951_s1 + $0x1fc] ss:$60 sps:$4 sm:$0xff]  }
  0x61   :  { %2257 = vmatprep.mubr.bf16.mxu1 %v5614_v49  ;;  %v5621_v49 = vld [vmem:[%s7951_s1 + $0x104] ss:$60 sps:$4 sm:$0xff]   ;;  %v6667_v63 = vmax.bf16 %v5823_v3, %v206_v47  ;;  %v4613_v47 = vcombine.low %v6718_v25, %v6721_v26  ;;  %v461_v26 = vmax.bf16 %v5823_v3, %v229_v14 }
  0x63   :  { %v4620_v18 = vcombine.low %v6664_v62, %v6667_v63  ;;  %v179_v62 = vld [vmem:[%s7950_s0 + $0x278] sm:$0xf]  ;;  %v180_v63 = vld [vmem:[%s7950_s0 + $0x27c] sm:$0xf] }
  0x67   :  { %2161 = vmatmul.mubr.bf16.vlgmr.msra.gmra.mrb[32].mxu0 %v5609_v60  ;;  %v155_v60 = vld [vmem:[%s7950_s0 + $0x218] sm:$0xf] }
  0x68   :  { %2258 = vmatmul.mubr.bf16.vlgmr.msra.gmra.mrb[32].mxu1 %v5612_v4  ;;  %2168 = vmatprep.mubr.bf16.mxu0 %v5615_v5  ;;  %v4619_v4 = vcombine.low %v6611_v39, %v436_v43  ;;  %v4611_v5 = vcombine.low %v6624_v44, %v6627_v45  ;;  %v4612_v43 = vcombine.low %v6680_v6, %v422_v19  ;;  %v178_v44 = vld [vmem:[%s7950_s0 + $0x274] sm:$0xf]  ;;  %v211_v45 = vld [vmem:[%s7950_s0 + $0x2f8] sm:$0xf] }
  0x69   :  { %5101 = vmatpush3.bf16.msra.mxu1 %v4608_v22  ;;  %2265 = vmatprep.mubr.bf16.mxu1 %v5617_v11  ;;  %v387_v11 = vmax.bf16 %v5823_v3, %v155_v60  ;;  %v176_v22 = vld [vmem:[%s7950_s0 + $0x26c] sm:$0xf]  ;;  %v410_v58 = vmax.bf16 %v5823_v3, %v178_v44  ;;  %v443_v61 = vmax.bf16 %v5823_v3, %v211_v45  ;;  %v5655_v44 = vld [vmem:[%s7951_s1 + $0x358] ss:$60 sps:$4 sm:$0xff]   ;;  %v5656_v45 = vld [vmem:[%s7951_s1 + $0x360] ss:$60 sps:$4 sm:$0xff]  }
  0x6a   :  { %5102 = vmatprep.subr.bf16.mxu1 %v4617_v23  ;;  %5037 = vmatpush3.bf16.msra.mxu0 %v4592_v28  ;;  %v5625_v23 = vld [vmem:[%s7951_s1 + $0x100] ss:$60 sps:$4 sm:$0xff]   ;;  %v408_v39 = vmax.bf16 %v5823_v3, %v176_v22 }
  0x6b   :  { %5038 = vmatprep.subr.bf16.mxu0 %v4601_v33  ;;  %v5627_v28 = vld [vmem:[%s7951_s1 + $0x17c] ss:$60 sps:$4 sm:$0xff]   ;;  %v4595_v29 = vcombine.low %v387_v11, %v388_v12  ;;  %v390_v33 = vmax.bf16 %v5823_v3, %v158_v17  ;;  %v411_v11 = vmax.bf16 %v5823_v3, %v179_v62  ;;  %v412_v12 = vmax.bf16 %v5823_v3, %v180_v63  ;;  %v5633_v17 = vld [vmem:[%s7951_s1 + $0x1f4] ss:$60 sps:$4 sm:$0xff]  }
  0x6c   :  { %v4623_v21 = vcombine.low %v443_v61, %v444_v1  ;;  %v5660_v61 = vld [vmem:[%s7951_s1 + $0x28] ss:$60 sps:$4 sm:$0xff]   ;;  %v5663_v62 = vld [vmem:[%s7951_s1 + $0x9c] ss:$60 sps:$4 sm:$0xff]  }
  0x6d   :  { %5103 = vmatpush3.bf16.msra.mxu1 %v4609_v27  ;;  %v5626_v27 = vld [vmem:[%s7951_s1 + $0x108] ss:$60 sps:$4 sm:$0xff]  }
  0x6e   :  { %5104 = vmatprep.subr.bf16.mxu1 %v4618_v37  ;;  %5039 = vmatpush3.bf16.msra.mxu0 %v4593_v51  ;;  %v194_v37 = vld [vmem:[%s7950_s0 + $0x2b4] sm:$0xf]  ;;  %v4596_v51 = vcombine.low %v389_v32, %v390_v33  ;;  %v5637_v32 = vld [vmem:[%s7951_s1 + $0x1f0] ss:$60 sps:$4 sm:$0xff]  }
  0x6f   :  { %2169 = vmatmul.mubr.bf16.gmra.mrb[36].mxu0 %v5619_v42  ;;  %5040 = vmatprep.subr.bf16.mxu0 %v4602_v56  ;;  %v177_v42 = vld [vmem:[%s7950_s0 + $0x270] sm:$0xf]  ;;  %v4605_v56 = vcombine.low %v407_v38, %v408_v39  ;;  %v426_v60 = vmax.bf16 %v5823_v3, %v194_v37  ;;  %v5638_v33 = vld [vmem:[%s7951_s1 + $0x1f8] ss:$60 sps:$4 sm:$0xff]   ;;  %v5645_v38 = vld [vmem:[%s7951_s1 + $0x2e4] ss:$60 sps:$4 sm:$0xff]  }
  0x70   :  { %2266 = vmatmul.mubr.bf16.gmra.mrb[36].mxu1 %v5620_v48  ;;  %2176 = vmatprep.mubr.bf16.mxu0 %v5621_v49  ;;  %v441_v48 = vmax.bf16 %v5823_v3, %v209_v30  ;;  %v442_v49 = vmax.bf16 %v5823_v3, %v210_v31  ;;  %v409_v57 = vmax.bf16 %v5823_v3, %v177_v42  ;;  %v5644_v37 = vld [vmem:[%s7951_s1 + $0x270] ss:$60 sps:$4 sm:$0xff]   ;;  %v5651_v42 = vld [vmem:[%s7951_s1 + $0x35c] ss:$60 sps:$4 sm:$0xff]  }
  0x71   :  { %2273 = vmatprep.mubr.bf16.mxu1 %v5623_v54  ;;  %5105 = vmatpush3.bf16.msra.mxu1 %v4610_v2  ;;  %v161_v54 = vld [vmem:[%s7950_s0 + $0x230] sm:$0xf]  ;;  %v5647_v39 = vld [vmem:[%s7951_s1 + $0x2ec] ss:$60 sps:$4 sm:$0xff]  }
  0x72   :  { %5106 = vmatprep.subr.bf16.mxu1 %v4619_v4  ;;  %5041 = vmatpush3.bf16.msra.mxu0 %v4594_v9  ;;  %v393_v2 = vmax.bf16 %v5823_v3, %v161_v54  ;;  %v394_v4 = vmax.bf16 %v5823_v3, %v162_v55  ;;  %v4622_v6 = vcombine.low %v441_v48, %v442_v49  ;;  %v163_v9 = vld [vmem:[%s7950_s0 + $0x238] sm:$0xf]  ;;  %v213_v48 = vld [vmem:[%s7950_s0 + $0x300] sm:$0xf]  ;;  %v214_v49 = vld [vmem:[%s7950_s0 + $0x304] sm:$0xf] }
  0x73   :  { %5042 = vmatprep.subr.bf16.mxu0 %v4603_v13  ;;  %v4606_v10 = vcombine.low %v409_v57, %v410_v58  ;;  %v164_v13 = vld [vmem:[%s7950_s0 + $0x23c] sm:$0xf]  ;;  %v395_v24 = vmax.bf16 %v5823_v3, %v163_v9  ;;  %v445_v52 = vmax.bf16 %v5823_v3, %v213_v48  ;;  %v446_v53 = vmax.bf16 %v5823_v3, %v214_v49  ;;  %v216_v57 = vld [vmem:[%s7950_s0 + $0x30c] sm:$0xf]  ;;  %v235_v9 = vld [vmem:[%s7950_s0 + $0x358] sm:$0xf] }
  0x74   :  { %v4598_v22 = vcombine.low %v393_v2, %v394_v4  ;;  %v396_v25 = vmax.bf16 %v5823_v3, %v164_v13  ;;  %v463_v54 = vmax.bf16 %v5823_v3, %v231_v50  ;;  %v5657_v58 = vld [vmem:[%s7951_s1 + $0x20] ss:$60 sps:$4 sm:$0xff]   ;;  %v448_v2 = vmax.bf16 %v5823_v3, %v216_v57  ;;  %v5677_v48 = vld [vmem:[%s7951_s1 + $0x194] ss:$60 sps:$4 sm:$0xff]   ;;  %v243_v57 = vld [vmem:[%s7950_s0 + $0x378] sm:$0xf] }
  0x75   :  { %5107 = vmatpush3.bf16.msra.mxu1 %v4611_v5  ;;  %v195_v5 = vld [vmem:[%s7950_s0 + $0x2b8] sm:$0xf]  ;;  %v4624_v63 = vcombine.low %v445_v52, %v446_v53 }
  0x76   :  { %5108 = vmatprep.subr.bf16.mxu1 %v4620_v18  ;;  %5043 = vmatpush3.bf16.msra.mxu0 %v4595_v29  ;;  %v4614_v18 = vcombine.low %v425_v59, %v426_v60  ;;  %v427_v19 = vmax.bf16 %v5823_v3, %v195_v5  ;;  %v4599_v30 = vcombine.low %v395_v24, %v396_v25  ;;  %v233_v59 = vld [vmem:[%s7950_s0 + $0x350] sm:$0xf]  ;;  %v234_v60 = vld [vmem:[%s7950_s0 + $0x354] sm:$0xf]  ;;  %v5671_v24 = vld [vmem:[%s7951_s1 + $0x11c] ss:$60 sps:$4 sm:$0xff]  }
  0x77   :  { %2177 = vmatmul.mubr.bf16.gmra.mrb[40].mxu0 %v5625_v23  ;;  %5044 = vmatprep.subr.bf16.mxu0 %v4604_v35  ;;  %v428_v23 = vmax.bf16 %v5823_v3, %v196_v8  ;;  %v5641_v35 = vld [vmem:[%s7951_s1 + $0x274] ss:$60 sps:$4 sm:$0xff]   ;;  %v465_v5 = vmax.bf16 %v5823_v3, %v233_v59 }
  0x78   :  { %2274 = vmatmul.mubr.bf16.gmra.mrb[40].mxu1 %v5626_v27  ;;  %2184 = vmatprep.mubr.bf16.mxu0 %v5627_v28  ;;  %v462_v27 = vmax.bf16 %v5823_v3, %v230_v15  ;;  %v4607_v28 = vcombine.low %v411_v11, %v412_v12  ;;  %v218_v8 = vld [vmem:[%s7950_s0 + $0x314] sm:$0xf]  ;;  %v467_v15 = vmax.bf16 %v5823_v3, %v235_v9  ;;  %v5683_v9 = vld [vmem:[%s7951_s1 + $0x20c] ss:$60 sps:$4 sm:$0xff]  }
  0x79   :  { %2281 = vmatprep.mubr.bf16.mxu1 %v5629_v34  ;;  %5109 = vmatpush3.bf16.msra.mxu1 %v4612_v43  ;;  %v4615_v29 = vcombine.low %v427_v19, %v428_v23  ;;  %v5639_v34 = vld [vmem:[%s7951_s1 + $0x26c] ss:$60 sps:$4 sm:$0xff]   ;;  %v5653_v43 = vld [vmem:[%s7951_s1 + $0x364] ss:$60 sps:$4 sm:$0xff]   ;;  %v450_v13 = vmax.bf16 %v5823_v3, %v218_v8  ;;  %v5667_v19 = vld [vmem:[%s7951_s1 + $0x98] ss:$60 sps:$4 sm:$0xff]  }
  0x7a   :  { %5110 = vmatprep.subr.bf16.mxu1 %v4621_v46  ;;  %5045 = vmatpush3.bf16.msra.mxu0 %v4596_v51  ;;  %v4632_v31 = vcombine.low %v461_v26, %v462_v27  ;;  %v5659_v46 = vld [vmem:[%s7951_s1 + $0x24] ss:$60 sps:$4 sm:$0xff]   ;;  %v232_v51 = vld [vmem:[%s7950_s0 + $0x34c] sm:$0xf]  ;;  %v5669_v23 = vld [vmem:[%s7951_s1 + $0x114] ss:$60 sps:$4 sm:$0xff]  }
  0x7b   :  { %5046 = vmatprep.subr.bf16.mxu0 %v4605_v56  ;;  %v464_v55 = vmax.bf16 %v5823_v3, %v232_v51  ;;  %v215_v56 = vld [vmem:[%s7950_s0 + $0x308] sm:$0xf]  ;;  %v5681_v8 = vld [vmem:[%s7951_s1 + $0x204] ss:$60 sps:$4 sm:$0xff]  }
  0x7c   :  { %v447_v1 = vmax.bf16 %v5823_v3, %v215_v56  ;;  %v226_v56 = vld [vmem:[%s7950_s0 + $0x334] sm:$0xf] }
  0x7d   :  { %5111 = vmatpush3.bf16.msra.mxu1 %v4613_v47  ;;  %v5662_v47 = vld [vmem:[%s7951_s1 + $0x2c] ss:$60 sps:$4 sm:$0xff]   ;;  %v4633_v4 = vcombine.low %v463_v54, %v464_v55  ;;  %v225_v55 = vld [vmem:[%s7950_s0 + $0x330] sm:$0xf] }
  0x7e   :  { %5112 = vmatprep.subr.bf16.mxu1 %v4622_v6  ;;  %5047 = vmatpush3.bf16.msra.mxu0 %v4597_v7  ;;  %v466_v6 = vmax.bf16 %v5823_v3, %v234_v60  ;;  %v217_v7 = vld [vmem:[%s7950_s0 + $0x310] sm:$0xf]  ;;  %v4625_v11 = vcombine.low %v447_v1, %v448_v2  ;;  %v457_v60 = vmax.bf16 %v5823_v3, %v225_v55  ;;  %v227_v1 = vld [vmem:[%s7950_s0 + $0x338] sm:$0xf]  ;;  %v228_v2 = vld [vmem:[%s7950_s0 + $0x33c] sm:$0xf] }
  0x7f   :  { %2185 = vmatmul.mubr.bf16.gmra.mrb[44].mxu0 %v5631_v0  ;;  %5048 = vmatprep.subr.bf16.mxu0 %v4606_v10  ;;  %v5665_v0 = vld [vmem:[%s7951_s1 + $0xa4] ss:$60 sps:$4 sm:$0xff]   ;;  %v236_v10 = vld [vmem:[%s7950_s0 + $0x35c] sm:$0xf]  ;;  %v449_v12 = vmax.bf16 %v5823_v3, %v217_v7  ;;  %v5680_v7 = vld [vmem:[%s7951_s1 + $0x190] ss:$60 sps:$4 sm:$0xff]  }
  0x80   :  { %2282 = vmatmul.mubr.bf16.gmra.mrb[44].mxu1 %v5632_v16  ;;  %2192 = vmatprep.mubr.bf16.mxu0 %v5633_v17  ;;  %v4634_v14 = vcombine.low %v465_v5, %v466_v6  ;;  %v468_v16 = vmax.bf16 %v5823_v3, %v236_v10  ;;  %v219_v17 = vld [vmem:[%s7950_s0 + $0x318] sm:$0xf]  ;;  %v245_v5 = vld [vmem:[%s7950_s0 + $0x380] sm:$0xf]  ;;  %v246_v6 = vld [vmem:[%s7950_s0 + $0x384] sm:$0xf] }
  0x81   :  { %2289 = vmatprep.mubr.bf16.mxu1 %v5635_v20  ;;  %5113 = vmatpush3.bf16.msra.mxu1 %v4614_v18  ;;  %v220_v18 = vld [vmem:[%s7950_s0 + $0x31c] sm:$0xf]  ;;  %v237_v20 = vld [vmem:[%s7950_s0 + $0x360] sm:$0xf]  ;;  %v4626_v25 = vcombine.low %v449_v12, %v450_v13  ;;  %v451_v26 = vmax.bf16 %v5823_v3, %v219_v17  ;;  %v460_v12 = vmax.bf16 %v5823_v3, %v228_v2 }
  0x82   :  { %5114 = vmatprep.subr.bf16.mxu1 %v4623_v21  ;;  %5049 = vmatpush3.bf16.msra.mxu0 %v4598_v22  ;;  %v238_v21 = vld [vmem:[%s7950_s0 + $0x364] sm:$0xf]  ;;  %v5668_v22 = vld [vmem:[%s7951_s1 + $0xa0] ss:$60 sps:$4 sm:$0xff]   ;;  %v452_v27 = vmax.bf16 %v5823_v3, %v220_v18 }
  0x83   :  { %5050 = vmatprep.subr.bf16.mxu0 %v4607_v28  ;;  %v4635_v28 = vcombine.low %v467_v15, %v468_v16  ;;  %v478_v15 = vmax.bf16 %v5823_v3, %v246_v6  ;;  %v5685_v18 = vld [vmem:[%s7951_s1 + $0x200] ss:$60 sps:$4 sm:$0xff]  }
  0x85   :  { %5115 = vmatpush3.bf16.msra.mxu1 %v4615_v29  ;;  %v469_v29 = vmax.bf16 %v5823_v3, %v237_v20  ;;  %v5687_v20 = vld [vmem:[%s7951_s1 + $0x27c] ss:$60 sps:$4 sm:$0xff]  }
  0x86   :  { %5051 = vmatpush3.bf16.msra.mxu0 %v4599_v30  ;;  %5504 = vmatprep.subr.bf16.mxu1 %v4632_v31  ;;  %v470_v30 = vmax.bf16 %v5823_v3, %v238_v21  ;;  %v5689_v21 = vld [vmem:[%s7951_s1 + $0x284] ss:$60 sps:$4 sm:$0xff]  }
  0x87   :  { %2193 = vmatmul.mubr.bf16.gmra.mrb[48].mxu0 %v5637_v32  ;;  %5164 = vmatprep.subr.bf16.mxu0 %v4632_v31  ;;  %v221_v31 = vld [vmem:[%s7950_s0 + $0x320] sm:$0xf]  ;;  %v222_v32 = vld [vmem:[%s7950_s0 + $0x324] sm:$0xf] }
  0x88   :  { %2290 = vmatmul.mubr.bf16.gmra.mrb[48].mxu1 %v5638_v33  ;;  %2200 = vmatprep.mubr.bf16.mxu0 %v5639_v34  ;;  %v239_v33 = vld [vmem:[%s7950_s0 + $0x368] sm:$0xf]  ;;  %v240_v34 = vld [vmem:[%s7950_s0 + $0x36c] sm:$0xf] }
  0x89   :  { %2297 = vmatprep.mubr.bf16.mxu1 %v5641_v35  ;;  %v4627_v35 = vcombine.low %v451_v26, %v452_v27  ;;  %v5697_v26 = vld [vmem:[%s7951_s1 + $0x2f0] ss:$60 sps:$4 sm:$0xff]   ;;  %v5698_v27 = vld [vmem:[%s7951_s1 + $0x2f8] ss:$60 sps:$4 sm:$0xff]  }
  0x8f   :  { %2201 = vmatmul.mubr.bf16.gmra.mrb[52].mxu0 %v5643_v36  ;;  %v453_v36 = vmax.bf16 %v5823_v3, %v221_v31  ;;  %v5704_v31 = vld [vmem:[%s7951_s1 + $0x370] ss:$60 sps:$4 sm:$0xff]  }
  0x90   :  { %2298 = vmatmul.mubr.bf16.gmra.mrb[52].mxu1 %v5644_v37  ;;  %2208 = vmatprep.mubr.bf16.mxu0 %v5645_v38  ;;  %v454_v37 = vmax.bf16 %v5823_v3, %v222_v32  ;;  %v4636_v38 = vcombine.low %v469_v29, %v470_v30  ;;  %v5701_v29 = vld [vmem:[%s7951_s1 + $0x374] ss:$60 sps:$4 sm:$0xff]   ;;  %v5703_v30 = vld [vmem:[%s7951_s1 + $0x368] ss:$60 sps:$4 sm:$0xff]  }
  0x91   :  { %2305 = vmatprep.mubr.bf16.mxu1 %v5647_v39  ;;  %v471_v39 = vmax.bf16 %v5823_v3, %v239_v33  ;;  %v5707_v32 = vld [vmem:[%s7951_s1 + $0x34] ss:$60 sps:$4 sm:$0xff]   ;;  %v5710_v33 = vld [vmem:[%s7951_s1 + $0x124] ss:$60 sps:$4 sm:$0xff]  }
  0x92   :  { %v4628_v49 = vcombine.low %v453_v36, %v454_v37 }
  0x97   :  { %2209 = vmatmul.mubr.bf16.gmra.mrb[56].mxu0 %v5649_v40  ;;  %v472_v40 = vmax.bf16 %v5823_v3, %v240_v34  ;;  %v247_v34 = vld [vmem:[%s7950_s0 + $0x388] sm:$0xf] }
  0x98   :  { %2306 = vmatmul.mubr.bf16.gmra.mrb[56].mxu1 %v5650_v41  ;;  %2216 = vmatprep.mubr.bf16.mxu0 %v5651_v42  ;;  %v223_v41 = vld [vmem:[%s7950_s0 + $0x328] sm:$0xf]  ;;  %v224_v42 = vld [vmem:[%s7950_s0 + $0x32c] sm:$0xf]  ;;  %v479_v36 = vmax.bf16 %v5823_v3, %v247_v34 }
  0x99   :  { %2313 = vmatprep.mubr.bf16.mxu1 %v5653_v43  ;;  %v5673_v43 = vld [vmem:[%s7951_s1 + $0x110] ss:$60 sps:$4 sm:$0xff]   ;;  %v455_v50 = vmax.bf16 %v5823_v3, %v223_v41  ;;  %v456_v51 = vmax.bf16 %v5823_v3, %v224_v42  ;;  %v4637_v52 = vcombine.low %v471_v39, %v472_v40  ;;  %v250_v40 = vld [vmem:[%s7950_s0 + $0x394] sm:$0xf]  ;;  %v5708_v41 = vld [vmem:[%s7951_s1 + $0x120] ss:$60 sps:$4 sm:$0xff]  }
  0x9a   :  { %v249_v39 = vld [vmem:[%s7950_s0 + $0x390] sm:$0xf]  ;;  %v5711_v42 = vld [vmem:[%s7951_s1 + $0xac] ss:$60 sps:$4 sm:$0xff]  }
  0x9b   :  { %v4629_v59 = vcombine.low %v455_v50, %v456_v51 }
  0x9f   :  { %2217 = vmatmul.mubr.bf16.gmra.mrb[60].mxu0 %v5655_v44  ;;  %v241_v44 = vld [vmem:[%s7950_s0 + $0x370] sm:$0xf] }
  0xa0   :  { %2314 = vmatmul.mubr.bf16.gmra.mrb[60].mxu1 %v5656_v45  ;;  %2354 = vmatprep.mubr.bf16.mxu0 %v5659_v46  ;;  %v242_v45 = vld [vmem:[%s7950_s0 + $0x374] sm:$0xf]  ;;  %v473_v53 = vmax.bf16 %v5823_v3, %v241_v44 }
  0xa1   :  { %2451 = vmatprep.mubr.bf16.mxu1 %v5662_v47  ;;  %v5674_v46 = vld [vmem:[%s7951_s1 + $0x118] ss:$60 sps:$4 sm:$0xff]   ;;  %v5675_v47 = vld [vmem:[%s7951_s1 + $0x18c] ss:$60 sps:$4 sm:$0xff]   ;;  %v474_v54 = vmax.bf16 %v5823_v3, %v242_v45  ;;  %v481_v45 = vmax.bf16 %v5823_v3, %v249_v39 }
  0xa7   :  { %2355 = vmatmul.mubr.bf16.vlgmr.msra.gmra.mrb[64].mxu0 %v5657_v58  ;;  %v244_v58 = vld [vmem:[%s7950_s0 + $0x37c] sm:$0xf] }
  0xa8   :  { %2452 = vmatmul.mubr.bf16.vlgmr.msra.gmra.mrb[64].mxu1 %v5660_v61  ;;  %2362 = vmatprep.mubr.bf16.mxu0 %v5663_v62  ;;  %v458_v61 = vmax.bf16 %v5823_v3, %v226_v56  ;;  %v4638_v62 = vcombine.low %v473_v53, %v474_v54  ;;  %v5716_v53 = vld [vmem:[%s7951_s1 + $0x198] ss:$60 sps:$4 sm:$0xff]   ;;  %v5719_v56 = vld [vmem:[%s7951_s1 + $0x210] ss:$60 sps:$4 sm:$0xff]  }
  0xa9   :  { %5512 = vmatpush3.bf16.msra.mxu1 %v4624_v63  ;;  %2459 = vmatprep.mubr.bf16.mxu1 %v5665_v0  ;;  %v476_v0 = vmax.bf16 %v5823_v3, %v244_v58  ;;  %v5717_v54 = vld [vmem:[%s7951_s1 + $0x214] ss:$60 sps:$4 sm:$0xff]  }
  0xaa   :  { %5505 = vmatprep.subr.bf16.mxu1 %v4633_v4  ;;  %5165 = vmatpush3.bf16.msra.mxu0 %v4624_v63  ;;  %v475_v63 = vmax.bf16 %v5823_v3, %v243_v57  ;;  %v4630_v10 = vcombine.low %v457_v60, %v458_v61  ;;  %v5720_v57 = vld [vmem:[%s7951_s1 + $0x28c] ss:$60 sps:$4 sm:$0xff]  }
  0xab   :  { %5166 = vmatprep.subr.bf16.mxu0 %v4633_v4  ;;  %v5679_v4 = vld [vmem:[%s7951_s1 + $0x188] ss:$60 sps:$4 sm:$0xff]  }
  0xac   :  { %v4639_v13 = vcombine.low %v475_v63, %v476_v0  ;;  %v5722_v0 = vld [vmem:[%s7951_s1 + $0x288] ss:$60 sps:$4 sm:$0xff]  }
  0xad   :  { %5513 = vmatpush3.bf16.msra.mxu1 %v4625_v11 }
  0xae   :  { %5506 = vmatprep.subr.bf16.mxu1 %v4634_v14  ;;  %5167 = vmatpush3.bf16.msra.mxu0 %v4625_v11  ;;  %v459_v11 = vmax.bf16 %v5823_v3, %v227_v1 }
  0xaf   :  { %2363 = vmatmul.mubr.bf16.gmra.mrb[68].mxu0 %v5667_v19  ;;  %5168 = vmatprep.subr.bf16.mxu0 %v4634_v14  ;;  %v477_v14 = vmax.bf16 %v5823_v3, %v245_v5  ;;  %v5686_v19 = vld [vmem:[%s7951_s1 + $0x208] ss:$60 sps:$4 sm:$0xff]  }
  0xb0   :  { %2460 = vmatmul.mubr.bf16.gmra.mrb[68].mxu1 %v5668_v22  ;;  %2370 = vmatprep.mubr.bf16.mxu0 %v5669_v23  ;;  %v4631_v16 = vcombine.low %v459_v11, %v460_v12  ;;  %v5691_v22 = vld [vmem:[%s7951_s1 + $0x278] ss:$60 sps:$4 sm:$0xff]   ;;  %v5692_v23 = vld [vmem:[%s7951_s1 + $0x280] ss:$60 sps:$4 sm:$0xff]  }
  0xb1   :  { %2467 = vmatprep.mubr.bf16.mxu1 %v5671_v24  ;;  %5514 = vmatpush3.bf16.msra.mxu1 %v4626_v25  ;;  %v4640_v17 = vcombine.low %v477_v14, %v478_v15  ;;  %v5693_v24 = vld [vmem:[%s7951_s1 + $0x2f4] ss:$60 sps:$4 sm:$0xff]   ;;  %v5723_v5 = vld [vmem:[%s7951_s1 + $0x304] ss:$60 sps:$4 sm:$0xff]  }
  0xb2   :  { %5507 = vmatprep.subr.bf16.mxu1 %v4635_v28  ;;  %5169 = vmatpush3.bf16.msra.mxu0 %v4626_v25  ;;  %v5695_v25 = vld [vmem:[%s7951_s1 + $0x2fc] ss:$60 sps:$4 sm:$0xff]  }
  0xb3   :  { %5170 = vmatprep.subr.bf16.mxu0 %v4635_v28  ;;  %v5699_v28 = vld [vmem:[%s7951_s1 + $0x36c] ss:$60 sps:$4 sm:$0xff]  }
  0xb5   :  { %5515 = vmatpush3.bf16.msra.mxu1 %v4627_v35 }
  0xb6   :  { %5508 = vmatprep.subr.bf16.mxu1 %v4636_v38  ;;  %5171 = vmatpush3.bf16.msra.mxu0 %v4627_v35  ;;  %v248_v35 = vld [vmem:[%s7950_s0 + $0x38c] sm:$0xf] }
  0xb7   :  { %2371 = vmatmul.mubr.bf16.gmra.mrb[72].mxu0 %v5673_v43  ;;  %5172 = vmatprep.subr.bf16.mxu0 %v4636_v38  ;;  %v480_v37 = vmax.bf16 %v5823_v3, %v248_v35  ;;  %v5705_v38 = vld [vmem:[%s7951_s1 + $0x30] ss:$60 sps:$4 sm:$0xff]   ;;  %v5713_v43 = vld [vmem:[%s7951_s1 + $0x19c] ss:$60 sps:$4 sm:$0xff]  }
  0xb8   :  { %2468 = vmatmul.mubr.bf16.gmra.mrb[72].mxu1 %v5674_v46  ;;  %2378 = vmatprep.mubr.bf16.mxu0 %v5675_v47  ;;  %v482_v46 = vmax.bf16 %v5823_v3, %v250_v40  ;;  %v251_v47 = vld [vmem:[%s7950_s0 + $0x398] sm:$0xf] }
  0xb9   :  { %2475 = vmatprep.mubr.bf16.mxu1 %v5677_v48  ;;  %5516 = vmatpush3.bf16.msra.mxu1 %v4628_v49  ;;  %v4641_v44 = vcombine.low %v479_v36, %v480_v37  ;;  %v252_v48 = vld [vmem:[%s7950_s0 + $0x39c] sm:$0xf]  ;;  %v483_v50 = vmax.bf16 %v5823_v3, %v251_v47  ;;  %v5729_v37 = vld [vmem:[%s7951_s1 + $0x38] ss:$60 sps:$4 sm:$0xff]  }
  0xba   :  { %5509 = vmatprep.subr.bf16.mxu1 %v4637_v52  ;;  %5173 = vmatpush3.bf16.msra.mxu0 %v4628_v49  ;;  %v4642_v49 = vcombine.low %v481_v45, %v482_v46  ;;  %v484_v51 = vmax.bf16 %v5823_v3, %v252_v48 }
  0xbb   :  { %5174 = vmatprep.subr.bf16.mxu0 %v4637_v52  ;;  %v5715_v52 = vld [vmem:[%s7951_s1 + $0xa8] ss:$60 sps:$4 sm:$0xff]  }
  0xbc   :  { %v4643_v55 = vcombine.low %v483_v50, %v484_v51 }
  0xbd   :  { %5517 = vmatpush3.bf16.msra.mxu1 %v4629_v59 }
  0xbe   :  { %5510 = vmatprep.subr.bf16.mxu1 %v4638_v62  ;;  %5175 = vmatpush3.bf16.msra.mxu0 %v4629_v59 }
  0xbf   :  { %2379 = vmatmul.mubr.bf16.gmra.mrb[76].mxu0 %v5679_v4  ;;  %5176 = vmatprep.subr.bf16.mxu0 %v4638_v62 }
  0xc0   :  { %2476 = vmatmul.mubr.bf16.gmra.mrb[76].mxu1 %v5680_v7  ;;  %2386 = vmatprep.mubr.bf16.mxu0 %v5681_v8 }
  0xc1   :  { %2483 = vmatprep.mubr.bf16.mxu1 %v5683_v9  ;;  %5518 = vmatpush3.bf16.msra.mxu1 %v4630_v10 }
  0xc2   :  { %5511 = vmatprep.subr.bf16.mxu1 %v4639_v13  ;;  %5177 = vmatpush3.bf16.msra.mxu0 %v4630_v10 }
  0xc3   :  { %5178 = vmatprep.subr.bf16.mxu0 %v4639_v13 }
  0xc5   :  { %5519 = vmatpush3.bf16.msra.mxu1 %v4631_v16 }
  0xc6   :  { %5179 = vmatpush3.bf16.msra.mxu0 %v4631_v16  ;;  %5320 = vmatprep.subr.bf16.mxu1 %v4640_v17 }
  0xc7   :  { %2387 = vmatmul.mubr.bf16.gmra.mrb[80].mxu0 %v5685_v18 }
  0xc8   :  { %2484 = vmatmul.mubr.bf16.gmra.mrb[80].mxu1 %v5686_v19  ;;  %2394 = vmatprep.mubr.bf16.mxu0 %v5687_v20 }
  0xc9   :  { %2491 = vmatprep.mubr.bf16.mxu1 %v5689_v21  ;;  %v5726_v21 = vld [vmem:[%s7951_s1 + $0x37c] ss:$60 sps:$4 sm:$0xff]  }
  0xcf   :  { %2395 = vmatmul.mubr.bf16.gmra.mrb[84].mxu0 %v5691_v22 }
  0xd0   :  { %2492 = vmatmul.mubr.bf16.gmra.mrb[84].mxu1 %v5692_v23  ;;  %2402 = vmatprep.mubr.bf16.mxu0 %v5693_v24 }
  0xd1   :  { %2499 = vmatprep.mubr.bf16.mxu1 %v5695_v25 }
  0xd7   :  { %2403 = vmatmul.mubr.bf16.gmra.mrb[88].mxu0 %v5697_v26 }
  0xd8   :  { %2500 = vmatmul.mubr.bf16.gmra.mrb[88].mxu1 %v5698_v27  ;;  %2410 = vmatprep.mubr.bf16.mxu0 %v5699_v28 }
  0xd9   :  { %2507 = vmatprep.mubr.bf16.mxu1 %v5701_v29 }
  0xdf   :  { %2411 = vmatmul.mubr.bf16.gmra.mrb[92].mxu0 %v5703_v30 }
  0xe0   :  { %2508 = vmatmul.mubr.bf16.gmra.mrb[92].mxu1 %v5704_v31  ;;  %2548 = vmatprep.mubr.bf16.mxu0 %v5707_v32 }
  0xe1   :  { %2564 = vmatprep.mubr.bf16.mxu1 %v5710_v33  ;;  %v5728_v33 = vld [vmem:[%s7951_s1 + $0x378] ss:$60 sps:$4 sm:$0xff]  }
  0xe7   :  { %2549 = vmatmul.mubr.bf16.vlgmr.msra.gmra.mrb[96].mxu0 %v5705_v38 }
  0xe8   :  { %2565 = vmatmul.mubr.bf16.vlgmr.msra.gmra.mrb[96].mxu1 %v5708_v41  ;;  %2556 = vmatprep.mubr.bf16.mxu0 %v5711_v42 }
  0xe9   :  { %5321 = vmatpush3.bf16.msra.mxu1 %v4640_v17  ;;  %2572 = vmatprep.mubr.bf16.mxu1 %v5713_v43  ;;  %v5725_v17 = vld [vmem:[%s7951_s1 + $0x300] ss:$60 sps:$4 sm:$0xff]  }
  0xea   :  { %5322 = vmatprep.subr.bf16.mxu1 %v4641_v44 }
  0xed   :  { %5323 = vmatpush3.bf16.msra.mxu1 %v4641_v44 }
  0xee   :  { %5324 = vmatprep.subr.bf16.mxu1 %v4642_v49 }
  0xef   :  { %2557 = vmatmul.mubr.bf16.gmra.mrb[100].mxu0 %v5715_v52 }
  0xf0   :  { %2573 = vmatmul.mubr.bf16.gmra.mrb[100].mxu1 %v5716_v53  ;;  %v5731_v53 = vld [vmem:[%s7951_s1 + $0x128] ss:$60 sps:$4 sm:$0xff]  }
  0xf1   :  { %2580 = vmatprep.mubr.bf16.mxu1 %v5717_v54  ;;  %5325 = vmatpush3.bf16.msra.mxu1 %v4642_v49  ;;  %v5730_v49 = vld [vmem:[%s7951_s1 + $0xb0] ss:$60 sps:$4 sm:$0xff]  }
  0xf2   :  { %5326 = vmatprep.subr.bf16.mxu1 %v4643_v55 }
  0xf5   :  { %5327 = vmatpush3.bf16.msra.mxu1 %v4643_v55 }
  0xf8   :  { %2581 = vmatmul.mubr.bf16.gmra.mrb[104].mxu1 %v5719_v56 }
  0xf9   :  { %2588 = vmatprep.mubr.bf16.mxu1 %v5720_v57 }
  0xfa   :  { %v4796_v58 = vpop.f32.mrb[0].mxu0 }
  0xfb   :  { %v4860_v59 = vpop.f32.mrb[0].mxu1  ;;  %v4797_v60 = vpop.f32.mrb[1].mxu0 }
  0xfc   :  { %v4798_v61 = vadd.f32 %v4797_v60, %v4796_v58  ;;  %v4861_v62 = vpop.f32.mrb[1].mxu1  ;;  %v4799_v63 = vpop.f32.mrb[2].mxu0 }
  0xfd   :  { %v4862_v1 = vadd.f32 %v4861_v62, %v4860_v59  ;;  %v4863_v2 = vpop.f32.mrb[2].mxu1  ;;  %v4800_v4 = vpop.f32.mrb[3].mxu0 }
  0xfe   :  { %v4801_v6 = vadd.f32 %v4800_v4, %v4799_v63  ;;  %v4864_v7 = vpop.f32.mrb[3].mxu1 }
  0xff   :  { %v7161_v8 = vadd.f32 %v4862_v1, %v4798_v61  ;;  %v4865_v9 = vadd.f32 %v4864_v7, %v4863_v2  ;;  %v5732_v1 = vld [vmem:[%s7951_s1 + $0x1a0] ss:$60 sps:$4 sm:$0xff]  }
 0x100   :  { %2589 = vmatmul.mubr.bf16.gmra.mrb[108].mxu1 %v5722_v0 }
 0x101   :  { %v7163_v10 = vadd.f32 %v4865_v9, %v4801_v6  ;;  %2596 = vmatprep.mubr.bf16.mxu1 %v5723_v5  ;;  %v5733_v6 = vld [vmem:[%s7951_s1 + $0x218] ss:$60 sps:$4 sm:$0xff]  }
 0x102   :  { %v4802_v11 = vpop.f32.mrb[4].mxu0 }
 0x103   :  { %v4866_v12 = vpop.f32.mrb[4].mxu1  ;;  %v4803_v13 = vpop.f32.mrb[5].mxu0 }
 0x104   :  { %v4804_v14 = vadd.f32 %v4803_v13, %v4802_v11  ;;  %v4867_v15 = vpop.f32.mrb[5].mxu1  ;;  %v4805_v16 = vpop.f32.mrb[6].mxu0 }
 0x105   :  { %v4868_v18 = vadd.f32 %v4867_v15, %v4866_v12  ;;  %v4869_v19 = vpop.f32.mrb[6].mxu1  ;;  %v4806_v20 = vpop.f32.mrb[7].mxu0 }
 0x106   :  { %v4807_v22 = vadd.f32 %v4806_v20, %v4805_v16  ;;  %v4870_v23 = vpop.f32.mrb[7].mxu1  ;;  %v5734_v20 = vld [vmem:[%s7951_s1 + $0x290] ss:$60 sps:$4 sm:$0xff]  }
 0x107   :  { %v7171_v24 = vadd.f32 %v4868_v18, %v4804_v14  ;;  %v4871_v25 = vadd.f32 %v4870_v23, %v4869_v19 }
 0x108   :  { %2597 = vmatmul.mubr.bf16.gmra.mrb[112].mxu1 %v5725_v17 }
 0x109   :  { %v7173_v26 = vadd.f32 %v4871_v25, %v4807_v22  ;;  %2604 = vmatprep.mubr.bf16.mxu1 %v5726_v21  ;;  %v5735_v25 = vld [vmem:[%s7951_s1 + $0x308] ss:$60 sps:$4 sm:$0xff]  }
 0x10a   :  { %v4808_v27 = vpop.f32.mrb[8].mxu0 }
 0x10b   :  { %v4872_v28 = vpop.f32.mrb[8].mxu1  ;;  %v4809_v29 = vpop.f32.mrb[9].mxu0 }
 0x10c   :  { %v4810_v30 = vadd.f32 %v4809_v29, %v4808_v27  ;;  %v4873_v31 = vpop.f32.mrb[9].mxu1  ;;  %v4811_v32 = vpop.f32.mrb[10].mxu0 }
 0x10d   :  { %v4874_v34 = vadd.f32 %v4873_v31, %v4872_v28  ;;  %v4875_v35 = vpop.f32.mrb[10].mxu1  ;;  %v4812_v36 = vpop.f32.mrb[11].mxu0 }
 0x10e   :  { %v4813_v38 = vadd.f32 %v4812_v36, %v4811_v32  ;;  %v4876_v39 = vpop.f32.mrb[11].mxu1 }
 0x10f   :  { %v7181_v40 = vadd.f32 %v4874_v34, %v4810_v30  ;;  %v4877_v41 = vadd.f32 %v4876_v39, %v4875_v35 }
 0x110   :  { %2605 = vmatmul.mubr.bf16.gmra.mrb[116].mxu1 %v5728_v33 }
 0x111   :  { %v7183_v42 = vadd.f32 %v4877_v41, %v4813_v38  ;;  %5328 = vmatprep.mubr.msk.bf16.mxu1 %vm1909_vm0, %v5729_v37  ;;  %v5736_v38 = vld [vmem:[%s7951_s1 + $0x380] ss:$60 sps:$4 sm:$0xff]  }
 0x112   :  { %v4814_v43 = vpop.f32.mrb[12].mxu0 }
 0x113   :  { %v4878_v44 = vpop.f32.mrb[12].mxu1  ;;  %v4815_v45 = vpop.f32.mrb[13].mxu0 }
 0x114   :  { %v4816_v46 = vadd.f32 %v4815_v45, %v4814_v43  ;;  %v4879_v47 = vpop.f32.mrb[13].mxu1  ;;  %v4817_v48 = vpop.f32.mrb[14].mxu0 }
 0x115   :  { %v4880_v50 = vadd.f32 %v4879_v47, %v4878_v44  ;;  %v4881_v51 = vpop.f32.mrb[14].mxu1  ;;  %v4818_v52 = vpop.f32.mrb[15].mxu0 }
 0x116   :  { %v4819_v54 = vadd.f32 %v4818_v52, %v4817_v48  ;;  %v4882_v55 = vpop.f32.mrb[15].mxu1 }
 0x117   :  { %v7192_v56 = vadd.f32 %v4880_v50, %v4816_v46  ;;  %v4883_v57 = vadd.f32 %v4882_v55, %v4881_v51 }
 0x118   :  { %5329 = vmatmul.mubr.msk.bf16.vlgmr.msra.gmra.mrb[120].mxu1 %vm1909_vm0, %v5730_v49 }
 0x119   :  { %v7195_v58 = vadd.f32 %v4883_v57, %v4819_v54  ;;  %5332 = vmatprep.mubr.msk.bf16.mxu1 %vm1909_vm0, %v5731_v53 }
 0x11a   :  { %v4820_v59 = vpop.f32.mrb[16].mxu0 }
 0x11b   :  { %v4884_v60 = vpop.f32.mrb[16].mxu1  ;;  %v4821_v61 = vpop.f32.mrb[17].mxu0 }
 0x11c   :  { %v4822_v62 = vadd.f32 %v4821_v61, %v4820_v59  ;;  %v4885_v63 = vpop.f32.mrb[17].mxu1  ;;  %v4823_v0 = vpop.f32.mrb[18].mxu0 }
 0x11d   :  { %v4886_v2 = vadd.f32 %v4885_v63, %v4884_v60  ;;  %v4887_v4 = vpop.f32.mrb[18].mxu1  ;;  %v4824_v5 = vpop.f32.mrb[19].mxu0 }
 0x11e   :  { %v4825_v7 = vadd.f32 %v4824_v5, %v4823_v0  ;;  %v4888_v9 = vpop.f32.mrb[19].mxu1 }
 0x11f   :  { %v7204_v11 = vadd.f32 %v4886_v2, %v4822_v62  ;;  %v4889_v12 = vadd.f32 %v4888_v9, %v4887_v4 }
 0x120   :  { %5333 = vmatmul.mubr.msk.bf16.gmra.mrb[124].mxu1 %vm1909_vm0, %v5732_v1 }
 0x121   :  { %v7207_v13 = vadd.f32 %v4889_v12, %v4825_v7  ;;  %5336 = vmatprep.mubr.msk.bf16.mxu1 %vm1909_vm0, %v5733_v6 }
 0x122   :  { %v4826_v14 = vpop.f32.mrb[20].mxu0 }
 0x123   :  { %v4890_v15 = vpop.f32.mrb[20].mxu1  ;;  %v4827_v16 = vpop.f32.mrb[21].mxu0 }
 0x124   :  { %v4828_v17 = vadd.f32 %v4827_v16, %v4826_v14  ;;  %v4891_v18 = vpop.f32.mrb[21].mxu1  ;;  %v4829_v19 = vpop.f32.mrb[22].mxu0 }
 0x125   :  { %v4892_v21 = vadd.f32 %v4891_v18, %v4890_v15  ;;  %v4893_v22 = vpop.f32.mrb[22].mxu1  ;;  %v4830_v23 = vpop.f32.mrb[23].mxu0 }
 0x126   :  { %v4831_v27 = vadd.f32 %v4830_v23, %v4829_v19  ;;  %v4894_v28 = vpop.f32.mrb[23].mxu1 }
 0x127   :  { %v7216_v29 = vadd.f32 %v4892_v21, %v4828_v17  ;;  %v4895_v30 = vadd.f32 %v4894_v28, %v4893_v22 }
 0x128   :  { %5337 = vmatmul.mubr.msk.bf16.gmra.mrb[128].mxu1 %vm1909_vm0, %v5734_v20 }
 0x129   :  { %v7219_v31 = vadd.f32 %v4895_v30, %v4831_v27  ;;  %5340 = vmatprep.mubr.msk.bf16.mxu1 %vm1909_vm0, %v5735_v25 }
 0x12a   :  { %v4832_v32 = vpop.f32.mrb[24].mxu0 }
 0x12b   :  { %v4896_v33 = vpop.f32.mrb[24].mxu1  ;;  %v4833_v34 = vpop.f32.mrb[25].mxu0 }
 0x12c   :  { %v4834_v35 = vadd.f32 %v4833_v34, %v4832_v32  ;;  %v4897_v36 = vpop.f32.mrb[25].mxu1  ;;  %v4835_v37 = vpop.f32.mrb[26].mxu0 }
 0x12d   :  { %v4898_v39 = vadd.f32 %v4897_v36, %v4896_v33  ;;  %v4899_v41 = vpop.f32.mrb[26].mxu1  ;;  %v4836_v43 = vpop.f32.mrb[27].mxu0 }
 0x12e   :  { %v4837_v44 = vadd.f32 %v4836_v43, %v4835_v37  ;;  %v4900_v45 = vpop.f32.mrb[27].mxu1 }
 0x12f   :  { %v7225_v46 = vadd.f32 %v4898_v39, %v4834_v35  ;;  %v4901_v47 = vadd.f32 %v4900_v45, %v4899_v41 }
 0x130   :  { %5341 = vmatmul.mubr.msk.bf16.gmra.mrb[132].mxu1 %vm1909_vm0, %v5736_v38 }
 0x131   :  { %v7228_v48 = vadd.f32 %v4901_v47, %v4837_v44 }
 0x132   :  { %v4838_v49 = vpop.f32.mrb[28].mxu0 }
 0x133   :  { %v4902_v50 = vpop.f32.mrb[28].mxu1  ;;  %v4839_v51 = vpop.f32.mrb[29].mxu0 }
 0x134   :  { %v4840_v52 = vadd.f32 %v4839_v51, %v4838_v49  ;;  %v4903_v53 = vpop.f32.mrb[29].mxu1  ;;  %v4841_v54 = vpop.f32.mrb[30].mxu0 }
 0x135   :  { %v4904_v55 = vadd.f32 %v4903_v53, %v4902_v50  ;;  %v4905_v57 = vpop.f32.mrb[30].mxu1  ;;  %v4842_v59 = vpop.f32.mrb[31].mxu0 }
 0x136   :  { %v4843_v60 = vadd.f32 %v4842_v59, %v4841_v54  ;;  %v4906_v61 = vpop.f32.mrb[31].mxu1 }
 0x137   :  { %v7230_v62 = vadd.f32 %v4904_v55, %v4840_v52  ;;  %v4907_v63 = vadd.f32 %v4906_v61, %v4905_v57 }
 0x139   :  { %v7232_v0 = vadd.f32 %v4907_v63, %v4843_v60 }
 0x13a   :  { %v4924_v1 = vpop.f32.mrb[32].mxu0 }
 0x13b   :  { %v4988_v2 = vpop.f32.mrb[32].mxu1  ;;  %v4925_v4 = vpop.f32.mrb[33].mxu0 }
 0x13c   :  { %v4926_v5 = vadd.f32 %v4925_v4, %v4924_v1  ;;  %v4989_v6 = vpop.f32.mrb[33].mxu1  ;;  %v4927_v7 = vpop.f32.mrb[34].mxu0 }
 0x13d   :  { %v4990_v9 = vadd.f32 %v4989_v6, %v4988_v2  ;;  %v4991_v12 = vpop.f32.mrb[34].mxu1  ;;  %v4928_v14 = vpop.f32.mrb[35].mxu0 }
 0x13e   :  { %v2163_v15 = vadd.f32 %v4926_v5, %v7161_v8  ;;  %v4929_v16 = vadd.f32 %v4928_v14, %v4927_v7  ;;  %v4992_v17 = vpop.f32.mrb[35].mxu1 }
 0x13f   :  { %v4993_v18 = vadd.f32 %v4992_v17, %v4991_v12 }
 0x140   :  { %v7235_v19 = vadd.f32 %v4990_v9, %v2163_v15  ;;  %v2166_v20 = vadd.f32 %v4929_v16, %v7163_v10 }
 0x142   :  { %v7238_v21 = vadd.f32 %v4993_v18, %v2166_v20  ;;  %v4930_v22 = vpop.f32.mrb[36].mxu0 }
 0x143   :  { %v4994_v23 = vpop.f32.mrb[36].mxu1  ;;  %v4931_v25 = vpop.f32.mrb[37].mxu0 }
 0x144   :  { %v4932_v27 = vadd.f32 %v4931_v25, %v4930_v22  ;;  %v4995_v28 = vpop.f32.mrb[37].mxu1  ;;  %v4933_v30 = vpop.f32.mrb[38].mxu0 }
 0x145   :  { %v4996_v32 = vadd.f32 %v4995_v28, %v4994_v23  ;;  %v4997_v33 = vpop.f32.mrb[38].mxu1  ;;  %v4934_v34 = vpop.f32.mrb[39].mxu0 }
 0x146   :  { %v2171_v8 = vadd.f32 %v4932_v27, %v7171_v24  ;;  %v4935_v35 = vadd.f32 %v4934_v34, %v4933_v30  ;;  %v4998_v36 = vpop.f32.mrb[39].mxu1 }
 0x147   :  { %v4999_v37 = vadd.f32 %v4998_v36, %v4997_v33 }
 0x148   :  { %v7241_v38 = vadd.f32 %v4996_v32, %v2171_v8  ;;  %v2174_v10 = vadd.f32 %v4935_v35, %v7173_v26 }
 0x14a   :  { %v7244_v39 = vadd.f32 %v4999_v37, %v2174_v10  ;;  %v4936_v41 = vpop.f32.mrb[40].mxu0 }
 0x14b   :  { %v5000_v43 = vpop.f32.mrb[40].mxu1  ;;  %v4937_v44 = vpop.f32.mrb[41].mxu0 }
 0x14c   :  { %v4938_v45 = vadd.f32 %v4937_v44, %v4936_v41  ;;  %v5001_v47 = vpop.f32.mrb[41].mxu1  ;;  %v4939_v49 = vpop.f32.mrb[42].mxu0 }
 0x14d   :  { %v5002_v50 = vadd.f32 %v5001_v47, %v5000_v43  ;;  %v5003_v51 = vpop.f32.mrb[42].mxu1  ;;  %v4940_v52 = vpop.f32.mrb[43].mxu0 }
 0x14e   :  { %v2179_v24 = vadd.f32 %v4938_v45, %v7181_v40  ;;  %v4941_v53 = vadd.f32 %v4940_v52, %v4939_v49  ;;  %v5004_v54 = vpop.f32.mrb[43].mxu1 }
 0x14f   :  { %v5005_v55 = vadd.f32 %v5004_v54, %v5003_v51 }
 0x150   :  { %v7247_v57 = vadd.f32 %v5002_v50, %v2179_v24  ;;  %v2182_v26 = vadd.f32 %v4941_v53, %v7183_v42 }
 0x152   :  { %v7250_v59 = vadd.f32 %v5005_v55, %v2182_v26  ;;  %v4942_v60 = vpop.f32.mrb[44].mxu0 }
 0x153   :  { %v5006_v61 = vpop.f32.mrb[44].mxu1  ;;  %v4943_v63 = vpop.f32.mrb[45].mxu0 }
 0x154   :  { %v4944_v1 = vadd.f32 %v4943_v63, %v4942_v60  ;;  %v5007_v2 = vpop.f32.mrb[45].mxu1  ;;  %v4945_v4 = vpop.f32.mrb[46].mxu0 }
 0x155   :  { %v5008_v5 = vadd.f32 %v5007_v2, %v5006_v61  ;;  %v5009_v6 = vpop.f32.mrb[46].mxu1  ;;  %v4946_v7 = vpop.f32.mrb[47].mxu0 }
 0x156   :  { %v2187_v40 = vadd.f32 %v4944_v1, %v7192_v56  ;;  %v4947_v9 = vadd.f32 %v4946_v7, %v4945_v4  ;;  %v5010_v12 = vpop.f32.mrb[47].mxu1 }
 0x157   :  { %v5011_v14 = vadd.f32 %v5010_v12, %v5009_v6 }
 0x158   :  { %v7253_v15 = vadd.f32 %v5008_v5, %v2187_v40  ;;  %v2190_v42 = vadd.f32 %v4947_v9, %v7195_v58 }
 0x15a   :  { %v7256_v16 = vadd.f32 %v5011_v14, %v2190_v42  ;;  %v4948_v17 = vpop.f32.mrb[48].mxu0 }
 0x15b   :  { %v5012_v18 = vpop.f32.mrb[48].mxu1  ;;  %v4949_v20 = vpop.f32.mrb[49].mxu0 }
 0x15c   :  { %v4950_v22 = vadd.f32 %v4949_v20, %v4948_v17  ;;  %v5013_v23 = vpop.f32.mrb[49].mxu1  ;;  %v4951_v25 = vpop.f32.mrb[50].mxu0 }
 0x15d   :  { %v5014_v27 = vadd.f32 %v5013_v23, %v5012_v18  ;;  %v5015_v28 = vpop.f32.mrb[50].mxu1  ;;  %v4952_v30 = vpop.f32.mrb[51].mxu0 }
 0x15e   :  { %v2195_v56 = vadd.f32 %v4950_v22, %v7204_v11  ;;  %v4953_v32 = vadd.f32 %v4952_v30, %v4951_v25  ;;  %v5016_v33 = vpop.f32.mrb[51].mxu1 }
 0x15f   :  { %v5017_v34 = vadd.f32 %v5016_v33, %v5015_v28 }
 0x160   :  { %v7259_v8 = vadd.f32 %v5014_v27, %v2195_v56  ;;  %v2198_v58 = vadd.f32 %v4953_v32, %v7207_v13 }
 0x162   :  { %v7262_v35 = vadd.f32 %v5017_v34, %v2198_v58  ;;  %v4954_v36 = vpop.f32.mrb[52].mxu0 }
 0x163   :  { %v5018_v37 = vpop.f32.mrb[52].mxu1  ;;  %v4955_v10 = vpop.f32.mrb[53].mxu0 }
 0x164   :  { %v4956_v41 = vadd.f32 %v4955_v10, %v4954_v36  ;;  %v5019_v43 = vpop.f32.mrb[53].mxu1  ;;  %v4957_v44 = vpop.f32.mrb[54].mxu0 }
 0x165   :  { %v5020_v45 = vadd.f32 %v5019_v43, %v5018_v37  ;;  %v5021_v47 = vpop.f32.mrb[54].mxu1  ;;  %v4958_v49 = vpop.f32.mrb[55].mxu0 }
 0x166   :  { %v2203_v11 = vadd.f32 %v4956_v41, %v7216_v29  ;;  %v4959_v50 = vadd.f32 %v4958_v49, %v4957_v44  ;;  %v5022_v51 = vpop.f32.mrb[55].mxu1 }
 0x167   :  { %v5023_v52 = vadd.f32 %v5022_v51, %v5021_v47 }
 0x168   :  { %v7265_v24 = vadd.f32 %v5020_v45, %v2203_v11  ;;  %v2206_v13 = vadd.f32 %v4959_v50, %v7219_v31 }
 0x16a   :  { %v7268_v53 = vadd.f32 %v5023_v52, %v2206_v13  ;;  %v4960_v54 = vpop.f32.mrb[56].mxu0 }
 0x16b   :  { %v5024_v55 = vpop.f32.mrb[56].mxu1  ;;  %v4961_v26 = vpop.f32.mrb[57].mxu0 }
 0x16c   :  { %v4962_v60 = vadd.f32 %v4961_v26, %v4960_v54  ;;  %v5025_v61 = vpop.f32.mrb[57].mxu1  ;;  %v4963_v63 = vpop.f32.mrb[58].mxu0 }
 0x16d   :  { %v5026_v1 = vadd.f32 %v5025_v61, %v5024_v55  ;;  %v5027_v2 = vpop.f32.mrb[58].mxu1  ;;  %v4964_v4 = vpop.f32.mrb[59].mxu0 }
 0x16e   :  { %v2211_v29 = vadd.f32 %v4962_v60, %v7225_v46  ;;  %v4965_v5 = vadd.f32 %v4964_v4, %v4963_v63  ;;  %v5028_v6 = vpop.f32.mrb[59].mxu1 }
 0x16f   :  { %v5029_v7 = vadd.f32 %v5028_v6, %v5027_v2 }
 0x170   :  { %v7271_v40 = vadd.f32 %v5026_v1, %v2211_v29  ;;  %v2214_v31 = vadd.f32 %v4965_v5, %v7228_v48 }
 0x172   :  { %v7274_v9 = vadd.f32 %v5029_v7, %v2214_v31  ;;  %v4966_v12 = vpop.f32.mrb[60].mxu0 }
 0x173   :  { %v5030_v14 = vpop.f32.mrb[60].mxu1  ;;  %v4967_v42 = vpop.f32.mrb[61].mxu0 }
 0x174   :  { %v4968_v17 = vadd.f32 %v4967_v42, %v4966_v12  ;;  %v5031_v18 = vpop.f32.mrb[61].mxu1  ;;  %v4969_v20 = vpop.f32.mrb[62].mxu0 }
 0x175   :  { %v5032_v22 = vadd.f32 %v5031_v18, %v5030_v14  ;;  %v5033_v23 = vpop.f32.mrb[62].mxu1  ;;  %v4970_v25 = vpop.f32.mrb[63].mxu0 }
 0x176   :  { %v2219_v46 = vadd.f32 %v4968_v17, %v7230_v62  ;;  %v4971_v27 = vadd.f32 %v4970_v25, %v4969_v20  ;;  %v5034_v28 = vpop.f32.mrb[63].mxu1 }
 0x177   :  { %v5035_v30 = vadd.f32 %v5034_v28, %v5033_v23 }
 0x178   :  { %v7277_v56 = vadd.f32 %v5032_v22, %v2219_v46  ;;  %v2222_v48 = vadd.f32 %v4971_v27, %v7232_v0 }
 0x17a   :  { %v7280_v32 = vadd.f32 %v5035_v30, %v2222_v48  ;;  %v5052_v33 = vpop.f32.mrb[64].mxu0 }
 0x17b   :  { %v5116_v34 = vpop.f32.mrb[64].mxu1  ;;  %v5053_v58 = vpop.f32.mrb[65].mxu0 }
 0x17c   :  { %v5054_v36 = vadd.f32 %v5053_v58, %v5052_v33  ;;  %v5117_v37 = vpop.f32.mrb[65].mxu1  ;;  %v5055_v10 = vpop.f32.mrb[66].mxu0 }
 0x17d   :  { %v5118_v41 = vadd.f32 %v5117_v37, %v5116_v34  ;;  %v5119_v43 = vpop.f32.mrb[66].mxu1  ;;  %v5056_v44 = vpop.f32.mrb[67].mxu0 }
 0x17e   :  { %v2357_v62 = vadd.f32 %v5054_v36, %v7235_v19  ;;  %v5057_v45 = vadd.f32 %v5056_v44, %v5055_v10  ;;  %v5120_v47 = vpop.f32.mrb[67].mxu1 }
 0x17f   :  { %v5121_v49 = vadd.f32 %v5120_v47, %v5119_v43 }
 0x180   :  { %v7283_v11 = vadd.f32 %v5118_v41, %v2357_v62  ;;  %v2360_v0 = vadd.f32 %v5057_v45, %v7238_v21 }
 0x182   :  { %v7286_v50 = vadd.f32 %v5121_v49, %v2360_v0  ;;  %v5058_v51 = vpop.f32.mrb[68].mxu0 }
 0x183   :  { %v5122_v52 = vpop.f32.mrb[68].mxu1  ;;  %v5059_v13 = vpop.f32.mrb[69].mxu0 }
 0x184   :  { %v5060_v54 = vadd.f32 %v5059_v13, %v5058_v51  ;;  %v5123_v55 = vpop.f32.mrb[69].mxu1  ;;  %v5061_v26 = vpop.f32.mrb[70].mxu0 }
 0x185   :  { %v5124_v60 = vadd.f32 %v5123_v55, %v5122_v52  ;;  %v5125_v61 = vpop.f32.mrb[70].mxu1  ;;  %v5062_v63 = vpop.f32.mrb[71].mxu0 }
 0x186   :  { %v2365_v19 = vadd.f32 %v5060_v54, %v7241_v38  ;;  %v5063_v1 = vadd.f32 %v5062_v63, %v5061_v26  ;;  %v5126_v2 = vpop.f32.mrb[71].mxu1 }
 0x187   :  { %v5127_v4 = vadd.f32 %v5126_v2, %v5125_v61 }
 0x188   :  { %v7289_v29 = vadd.f32 %v5124_v60, %v2365_v19  ;;  %v2368_v21 = vadd.f32 %v5063_v1, %v7244_v39 }
 0x18a   :  { %v7292_v5 = vadd.f32 %v5127_v4, %v2368_v21  ;;  %v5064_v6 = vpop.f32.mrb[72].mxu0 }
 0x18b   :  { %v5128_v7 = vpop.f32.mrb[72].mxu1  ;;  %v5065_v31 = vpop.f32.mrb[73].mxu0 }
 0x18c   :  { %v5066_v12 = vadd.f32 %v5065_v31, %v5064_v6  ;;  %v5129_v14 = vpop.f32.mrb[73].mxu1  ;;  %v5067_v42 = vpop.f32.mrb[74].mxu0 }
 0x18d   :  { %v5130_v17 = vadd.f32 %v5129_v14, %v5128_v7  ;;  %v5131_v18 = vpop.f32.mrb[74].mxu1  ;;  %v5068_v20 = vpop.f32.mrb[75].mxu0 }
 0x18e   :  { %v2373_v38 = vadd.f32 %v5066_v12, %v7247_v57  ;;  %v5069_v22 = vadd.f32 %v5068_v20, %v5067_v42  ;;  %v5132_v23 = vpop.f32.mrb[75].mxu1 }
 0x18f   :  { %v5133_v25 = vadd.f32 %v5132_v23, %v5131_v18 }
 0x190   :  { %v7295_v46 = vadd.f32 %v5130_v17, %v2373_v38  ;;  %v2376_v39 = vadd.f32 %v5069_v22, %v7250_v59 }
 0x192   :  { %v7298_v27 = vadd.f32 %v5133_v25, %v2376_v39  ;;  %v5070_v28 = vpop.f32.mrb[76].mxu0 }
 0x193   :  { %v5134_v30 = vpop.f32.mrb[76].mxu1  ;;  %v5071_v48 = vpop.f32.mrb[77].mxu0 }
 0x194   :  { %v5072_v33 = vadd.f32 %v5071_v48, %v5070_v28  ;;  %v5135_v34 = vpop.f32.mrb[77].mxu1  ;;  %v5073_v58 = vpop.f32.mrb[78].mxu0 }
 0x195   :  { %v5136_v36 = vadd.f32 %v5135_v34, %v5134_v30  ;;  %v5137_v37 = vpop.f32.mrb[78].mxu1  ;;  %v5074_v10 = vpop.f32.mrb[79].mxu0 }
 0x196   :  { %v2381_v57 = vadd.f32 %v5072_v33, %v7253_v15  ;;  %v5075_v41 = vadd.f32 %v5074_v10, %v5073_v58  ;;  %v5138_v43 = vpop.f32.mrb[79].mxu1 }
 0x197   :  { %v5139_v44 = vadd.f32 %v5138_v43, %v5137_v37 }
 0x198   :  { %v7301_v62 = vadd.f32 %v5136_v36, %v2381_v57  ;;  %v2384_v59 = vadd.f32 %v5075_v41, %v7256_v16 }
 0x19a   :  { %v7304_v45 = vadd.f32 %v5139_v44, %v2384_v59  ;;  %v5076_v47 = vpop.f32.mrb[80].mxu0 }
 0x19b   :  { %v5140_v49 = vpop.f32.mrb[80].mxu1  ;;  %v5077_v0 = vpop.f32.mrb[81].mxu0 }
 0x19c   :  { %v5078_v51 = vadd.f32 %v5077_v0, %v5076_v47  ;;  %v5141_v52 = vpop.f32.mrb[81].mxu1  ;;  %v5079_v13 = vpop.f32.mrb[82].mxu0 }
 0x19d   :  { %v5142_v54 = vadd.f32 %v5141_v52, %v5140_v49  ;;  %v5143_v55 = vpop.f32.mrb[82].mxu1  ;;  %v5080_v26 = vpop.f32.mrb[83].mxu0 }
 0x19e   :  { %v2389_v15 = vadd.f32 %v5078_v51, %v7259_v8  ;;  %v5081_v60 = vadd.f32 %v5080_v26, %v5079_v13  ;;  %v5144_v61 = vpop.f32.mrb[83].mxu1 }
 0x19f   :  { %v5145_v63 = vadd.f32 %v5144_v61, %v5143_v55 }
 0x1a0   :  { %v7307_v19 = vadd.f32 %v5142_v54, %v2389_v15  ;;  %v2392_v16 = vadd.f32 %v5081_v60, %v7262_v35 }
 0x1a2   :  { %v7310_v1 = vadd.f32 %v5145_v63, %v2392_v16  ;;  %v5082_v2 = vpop.f32.mrb[84].mxu0 }
 0x1a3   :  { %v5146_v4 = vpop.f32.mrb[84].mxu1  ;;  %v5083_v21 = vpop.f32.mrb[85].mxu0 }
 0x1a4   :  { %v5084_v6 = vadd.f32 %v5083_v21, %v5082_v2  ;;  %v5147_v7 = vpop.f32.mrb[85].mxu1  ;;  %v5085_v31 = vpop.f32.mrb[86].mxu0 }
 0x1a5   :  { %v5148_v12 = vadd.f32 %v5147_v7, %v5146_v4  ;;  %v5149_v14 = vpop.f32.mrb[86].mxu1  ;;  %v5086_v42 = vpop.f32.mrb[87].mxu0 }
 0x1a6   :  { %v2397_v8 = vadd.f32 %v5084_v6, %v7265_v24  ;;  %v5087_v17 = vadd.f32 %v5086_v42, %v5085_v31  ;;  %v5150_v18 = vpop.f32.mrb[87].mxu1 }
 0x1a7   :  { %v5151_v20 = vadd.f32 %v5150_v18, %v5149_v14 }
 0x1a8   :  { %v7313_v38 = vadd.f32 %v5148_v12, %v2397_v8  ;;  %v2400_v35 = vadd.f32 %v5087_v17, %v7268_v53 }
 0x1aa   :  { %v7316_v22 = vadd.f32 %v5151_v20, %v2400_v35  ;;  %v5088_v23 = vpop.f32.mrb[88].mxu0 }
 0x1ab   :  { %v5152_v25 = vpop.f32.mrb[88].mxu1  ;;  %v5089_v39 = vpop.f32.mrb[89].mxu0 }
 0x1ac   :  { %v5090_v28 = vadd.f32 %v5089_v39, %v5088_v23  ;;  %v5153_v30 = vpop.f32.mrb[89].mxu1  ;;  %v5091_v48 = vpop.f32.mrb[90].mxu0 }
 0x1ad   :  { %v5154_v33 = vadd.f32 %v5153_v30, %v5152_v25  ;;  %v5155_v34 = vpop.f32.mrb[90].mxu1  ;;  %v5092_v58 = vpop.f32.mrb[91].mxu0 }
 0x1ae   :  { %v2405_v24 = vadd.f32 %v5090_v28, %v7271_v40  ;;  %v5093_v36 = vadd.f32 %v5092_v58, %v5091_v48  ;;  %v5156_v37 = vpop.f32.mrb[91].mxu1 }
 0x1af   :  { %v5157_v10 = vadd.f32 %v5156_v37, %v5155_v34 }
 0x1b0   :  { %v7319_v57 = vadd.f32 %v5154_v33, %v2405_v24  ;;  %v2408_v53 = vadd.f32 %v5093_v36, %v7274_v9 }
 0x1b2   :  { %v7322_v41 = vadd.f32 %v5157_v10, %v2408_v53  ;;  %v5094_v43 = vpop.f32.mrb[92].mxu0 }
 0x1b3   :  { %v5158_v44 = vpop.f32.mrb[92].mxu1  ;;  %v5095_v59 = vpop.f32.mrb[93].mxu0 }
 0x1b4   :  { %v5096_v47 = vadd.f32 %v5095_v59, %v5094_v43  ;;  %v5159_v49 = vpop.f32.mrb[93].mxu1  ;;  %v5097_v0 = vpop.f32.mrb[94].mxu0 }
 0x1b5   :  { %v5160_v51 = vadd.f32 %v5159_v49, %v5158_v44  ;;  %v5161_v52 = vpop.f32.mrb[94].mxu1  ;;  %v5098_v13 = vpop.f32.mrb[95].mxu0 }
 0x1b6   :  { %v2413_v40 = vadd.f32 %v5096_v47, %v7277_v56  ;;  %v5099_v54 = vadd.f32 %v5098_v13, %v5097_v0  ;;  %v5162_v55 = vpop.f32.mrb[95].mxu1 }
 0x1b7   :  { %v5163_v26 = vadd.f32 %v5162_v55, %v5161_v52 }
 0x1b8   :  { %v7325_v15 = vadd.f32 %v5160_v51, %v2413_v40  ;;  %v2416_v9 = vadd.f32 %v5099_v54, %v7280_v32 }
 0x1ba   :  { %v7328_v60 = vadd.f32 %v5163_v26, %v2416_v9  ;;  %v5180_v61 = vpop.f32.mrb[96].mxu0 }
 0x1bb   :  { %v5192_v63 = vpop.f32.mrb[96].mxu1  ;;  %v5181_v16 = vpop.f32.mrb[97].mxu0 }
 0x1bc   :  { %v5182_v2 = vadd.f32 %v5181_v16, %v5180_v61  ;;  %v5193_v4 = vpop.f32.mrb[97].mxu1  ;;  %v5183_v21 = vpop.f32.mrb[98].mxu0 }
 0x1bd   :  { %v5194_v6 = vadd.f32 %v5193_v4, %v5192_v63  ;;  %v5195_v7 = vpop.f32.mrb[98].mxu1  ;;  %v5184_v31 = vpop.f32.mrb[99].mxu0 }
 0x1be   :  { %v5185_v12 = vadd.f32 %v5184_v31, %v5183_v21  ;;  %v5196_v56 = vpop.f32.mrb[99].mxu1  ;;  %v2551_v14 = vadd.f32 %v5182_v2, %v7283_v11 }
 0x1bf   :  { %v5197_v42 = vadd.f32 %v5196_v56, %v5195_v7  ;;  %v7332_v8 = vadd.f32 %v5194_v6, %v7295_v46 }
 0x1c0   :  { %v2554_v32 = vadd.f32 %v5185_v12, %v7286_v50 }
 0x1c1   :  { %v7336_v17 = vadd.f32 %v5197_v42, %v7298_v27 }
 0x1c2   :  { %v5186_v18 = vpop.f32.mrb[100].mxu0 }
 0x1c3   :  { %v5198_v20 = vpop.f32.mrb[100].mxu1  ;;  %v5187_v35 = vpop.f32.mrb[101].mxu0 }
 0x1c4   :  { %v5188_v23 = vadd.f32 %v5187_v35, %v5186_v18  ;;  %v5199_v25 = vpop.f32.mrb[101].mxu1  ;;  %v5189_v39 = vpop.f32.mrb[102].mxu0 }
 0x1c5   :  { %v5200_v28 = vadd.f32 %v5199_v25, %v5198_v20  ;;  %v5201_v30 = vpop.f32.mrb[102].mxu1  ;;  %v5190_v48 = vpop.f32.mrb[103].mxu0 }
 0x1c6   :  { %v5191_v33 = vadd.f32 %v5190_v48, %v5189_v39  ;;  %v5202_v11 = vpop.f32.mrb[103].mxu1  ;;  %v2559_v34 = vadd.f32 %v5188_v23, %v7289_v29 }
 0x1c7   :  { %v5203_v46 = vadd.f32 %v5202_v11, %v5201_v30  ;;  %v2575_v58 = vadd.f32 %v5200_v28, %v7301_v62 }
 0x1c8   :  { %v2562_v50 = vadd.f32 %v5191_v33, %v7292_v5 }
 0x1c9   :  { %v2578_v27 = vadd.f32 %v5203_v46, %v7304_v45 }
 0x1cb   :  { %v5204_v24 = vpop.f32.mrb[104].mxu1 }
 0x1cc   :  { %v5205_v36 = vpop.f32.mrb[105].mxu1 }
 0x1cd   :  { %v5206_v37 = vadd.f32 %v5205_v36, %v5204_v24  ;;  %v5207_v10 = vpop.f32.mrb[106].mxu1 }
 0x1ce   :  { %v5208_v53 = vpop.f32.mrb[107].mxu1 }
 0x1cf   :  { %v5209_v43 = vadd.f32 %v5208_v53, %v5207_v10  ;;  %v2583_v44 = vadd.f32 %v5206_v37, %v7307_v19 }
 0x1d1   :  { %v7344_v59 = vadd.f32 %v5209_v43, %v7310_v1 }
 0x1d3   :  { %v5210_v47 = vpop.f32.mrb[108].mxu1 }
 0x1d4   :  { %v5211_v29 = vpop.f32.mrb[109].mxu1 }
 0x1d5   :  { %v5212_v49 = vadd.f32 %v5211_v29, %v5210_v47  ;;  %v5213_v0 = vpop.f32.mrb[110].mxu1 }
 0x1d6   :  { %v5214_v62 = vpop.f32.mrb[111].mxu1 }
 0x1d7   :  { %v5215_v51 = vadd.f32 %v5214_v62, %v5213_v0  ;;  %v2591_v5 = vadd.f32 %v5212_v49, %v7313_v38 }
 0x1d9   :  { %v2594_v45 = vadd.f32 %v5215_v51, %v7316_v22 }
 0x1db   :  { %v5216_v52 = vpop.f32.mrb[112].mxu1 }
 0x1dc   :  { %v5217_v13 = vpop.f32.mrb[113].mxu1 }
 0x1dd   :  { %v5218_v40 = vadd.f32 %v5217_v13, %v5216_v52  ;;  %v5219_v54 = vpop.f32.mrb[114].mxu1 }
 0x1de   :  { %v5220_v55 = vpop.f32.mrb[115].mxu1 }
 0x1df   :  { %v5221_v26 = vadd.f32 %v5220_v55, %v5219_v54  ;;  %v2599_v19 = vadd.f32 %v5218_v40, %v7319_v57 }
 0x1e1   :  { %v7350_v1 = vadd.f32 %v5221_v26, %v7322_v41 }
 0x1e3   :  { %v5222_v9 = vpop.f32.mrb[116].mxu1 }
 0x1e4   :  { %v5223_v61 = vpop.f32.mrb[117].mxu1 }
 0x1e5   :  { %v5224_v63 = vadd.f32 %v5223_v61, %v5222_v9  ;;  %v5225_v16 = vpop.f32.mrb[118].mxu1 }
 0x1e6   :  { %v5226_v2 = vpop.f32.mrb[119].mxu1 }
 0x1e7   :  { %v5227_v4 = vadd.f32 %v5226_v2, %v5225_v16  ;;  %v2607_v38 = vadd.f32 %v5224_v63, %v7325_v15 }
 0x1e9   :  { %v2610_v22 = vadd.f32 %v5227_v4, %v7328_v60 }
 0x1eb   :  { %v5330_v21 = vpop.f32.mrb[120].mxu1 }
 0x1ec   :  { %v7354_v6 = vadd.f32 %v5330_v21, %v2559_v34  ;;  %v2647_v7 = vpop.f32.mrb[121].mxu1 }
 0x1ed   :  { %v7356_v31 = vadd.f32 %v2647_v7, %v2551_v14  ;;  %v5331_v57 = vpop.f32.mrb[122].mxu1 }
 0x1ee   :  { %v7358_v41 = vadd.f32 %v5331_v57, %v2562_v50  ;;  %v2650_v12 = vpop.f32.mrb[123].mxu1  ;;  %v2717_v56 = vsel %vm2710_vm1, %v7354_v6, 0.0 }
 0x1ef   :  { %v7362_v42 = vadd.f32 %v2650_v12, %v2554_v32  ;;  %2718 = vadd.xlane.f32.xlu1 %v2717_v56  ;;  %v2711_v15 = vsel %vm2710_vm1, %v7356_v31, 0.0 }
 0x1f0   :  { %2712 = vadd.xlane.f32.xlu0 %v2711_v15  ;;  %v2720_v60 = vsel %vm2710_vm1, %v7358_v41, 0.0 }
 0x1f1   :  { %v2714_v14 = vsel %vm2710_vm1, %v7362_v42, 0.0 }
 0x1f3   :  { %v5334_v18 = vpop.f32.mrb[124].mxu1  ;;  %2721 = vadd.xlane.f32.xlu1 %v2720_v60 }
 0x1f4   :  { %v7370_v20 = vadd.f32 %v5334_v18, %v2575_v58  ;;  %v2663_v35 = vpop.f32.mrb[125].mxu1  ;;  %2715 = vadd.xlane.f32.xlu0 %v2714_v14 }
 0x1f5   :  { %v7373_v32 = vadd.f32 %v2663_v35, %v7332_v8  ;;  %v5335_v23 = vpop.f32.mrb[126].mxu1 }
 0x1f6   :  { %v7375_v25 = vadd.f32 %v5335_v23, %v2578_v27  ;;  %v2666_v39 = vpop.f32.mrb[127].mxu1  ;;  %v2729_v8 = vsel %vm2710_vm1, %v7370_v20, 0.0 }
 0x1f7   :  { %v7378_v28 = vadd.f32 %v2666_v39, %v7336_v17  ;;  %v2723_v30 = vsel %vm2710_vm1, %v7373_v32, 0.0 }
 0x1f8   :  { %2724 = vadd.xlane.f32.xlu0 %v2723_v30  ;;  %v2732_v58 = vsel %vm2710_vm1, %v7375_v25, 0.0 }
 0x1f9   :  { %v2726_v48 = vsel %vm2710_vm1, %v7378_v28, 0.0 }
 0x1fa   :  { %2727 = vadd.xlane.f32.xlu1 %v2726_v48 }
 0x1fb   :  { %v5338_v33 = vpop.f32.mrb[128].mxu1 }
 0x1fc   :  { %v7386_v11 = vadd.f32 %v5338_v33, %v2591_v5  ;;  %v2679_v34 = vpop.f32.mrb[129].mxu1  ;;  %2730 = vadd.xlane.f32.xlu0 %v2729_v8 }
 0x1fd   :  { %v7388_v46 = vadd.f32 %v2679_v34, %v2583_v44  ;;  %v5339_v17 = vpop.f32.mrb[130].mxu1 }
 0x1fe   :  { %v7392_v50 = vadd.f32 %v5339_v17, %v2594_v45  ;;  %v2682_v27 = vpop.f32.mrb[131].mxu1  ;;  %2733 = vadd.xlane.f32.xlu1 %v2732_v58  ;;  %v2741_v53 = vsel %vm2710_vm1, %v7386_v11, 0.0 }
 0x1ff   :  { %v7395_v24 = vadd.f32 %v2682_v27, %v7344_v59  ;;  %v2735_v36 = vsel %vm2710_vm1, %v7388_v46, 0.0 }
 0x200   :  { %2736 = vadd.xlane.f32.xlu0 %v2735_v36  ;;  %v2744_v29 = vsel %vm2710_vm1, %v7392_v50, 0.0 }
 0x201   :  { %v2738_v37 = vsel %vm2710_vm1, %v7395_v24, 0.0 }
 0x202   :  { %2739 = vadd.xlane.f32.xlu1 %v2738_v37 }
 0x203   :  { %v5342_v10 = vpop.f32.mrb[132].mxu1 }
 0x204   :  { %v7403_v43 = vadd.f32 %v5342_v10, %v2607_v38  ;;  %v2695_v44 = vpop.f32.mrb[133].mxu1  ;;  %2742 = vadd.xlane.f32.xlu0 %v2741_v53 }
 0x205   :  { %v7405_v47 = vadd.f32 %v2695_v44, %v2599_v19  ;;  %v5343_v59 = vpop.f32.mrb[134].mxu1 }
 0x206   :  { %v7409_v49 = vadd.f32 %v5343_v59, %v2610_v22  ;;  %v2698_v0 = vpop.f32.mrb[135].mxu1  ;;  %2745 = vadd.xlane.f32.xlu1 %v2744_v29  ;;  %v2753_v45 = vsel %vm2710_vm1, %v7403_v43, 0.0 }
 0x207   :  { %v7412_v62 = vadd.f32 %v2698_v0, %v7350_v1  ;;  %v2747_v51 = vsel %vm2710_vm1, %v7405_v47, 0.0 }
 0x208   :  { %2748 = vadd.xlane.f32.xlu0 %v2747_v51  ;;  %v2756_v52 = vsel %vm2710_vm1, %v7409_v49, 0.0 }
 0x209   :  { %v2750_v5 = vsel %vm2710_vm1, %v7412_v62, 0.0 }
 0x20a   :  { %2751 = vadd.xlane.f32.xlu1 %v2750_v5 }
 0x20c   :  { %2754 = vadd.xlane.f32.xlu0 %v2753_v45 }
 0x20e   :  { %2757 = vadd.xlane.f32.xlu1 %v2756_v52 }
 0x27c   :  { %v2719_v13 = vpop.xlane.xlu1 %2718 }
 0x27d   :  { %v7422_v40 = vmul.f32 0.020408163, %v2719_v13  ;;  %v2713_v54 = vpop.xlane.xlu0 %2712 }
 0x27e   :  { %v7424_v55 = vmul.f32 0.020408163, %v2713_v54 }
 0x27f   :  { %v2778_v26 = vsub.f32 %v7354_v6, %v7422_v40 }
 0x280   :  { %v2776_v19 = vsub.f32 %v7356_v31, %v7424_v55  ;;  %v2722_v1 = vpop.xlane.xlu1 %2721 }
 0x281   :  { %v7430_v9 = vmul.f32 0.020408163, %v2722_v1  ;;  %v2716_v61 = vpop.xlane.xlu0 %2715  ;;  %v2794_v22 = vmul.f32 %v2778_v26, %v2778_v26 }
 0x282   :  { %v7432_v63 = vmul.f32 0.020408163, %v2716_v61  ;;  %v2792_v16 = vmul.f32 %v2776_v19, %v2776_v19 }
 0x283   :  { %v2779_v2 = vsub.f32 %v7358_v41, %v7430_v9  ;;  %v2814_v18 = vsel %vm2710_vm1, %v2794_v22, 0.0 }
 0x284   :  { %v2777_v4 = vsub.f32 %v7362_v42, %v7432_v63  ;;  %v2808_v38 = vsel %vm2710_vm1, %v2792_v16, 0.0 }
 0x285   :  { %2809 = vadd.xlane.f32.xlu0 %v2808_v38  ;;  %v2725_v21 = vpop.xlane.xlu0 %2724  ;;  %v2795_v56 = vmul.f32 %v2779_v2, %v2779_v2 }
 0x286   :  { %v7439_v7 = vmul.f32 0.020408163, %v2725_v21  ;;  %v2793_v57 = vmul.f32 %v2777_v4, %v2777_v4 }
 0x287   :  { %v2728_v12 = vpop.xlane.xlu1 %2727  ;;  %v2817_v33 = vsel %vm2710_vm1, %v2795_v56, 0.0 }
 0x288   :  { %v2780_v15 = vsub.f32 %v7373_v32, %v7439_v7  ;;  %v7443_v60 = vmul.f32 0.020408163, %v2728_v12  ;;  %v2811_v14 = vsel %vm2710_vm1, %v2793_v57, 0.0 }
 0x289   :  { %2815 = vadd.xlane.f32.xlu0 %v2814_v18  ;;  %2812 = vadd.xlane.f32.xlu1 %v2811_v14  ;;  %v2731_v35 = vpop.xlane.xlu0 %2730 }
 0x28a   :  { %v2781_v23 = vsub.f32 %v7378_v28, %v7443_v60  ;;  %v7449_v39 = vmul.f32 0.020408163, %v2731_v35  ;;  %v2796_v30 = vmul.f32 %v2780_v15, %v2780_v15 }
 0x28b   :  { %v2734_v48 = vpop.xlane.xlu1 %2733 }
 0x28c   :  { %v2782_v8 = vsub.f32 %v7370_v20, %v7449_v39  ;;  %v7454_v34 = vmul.f32 0.020408163, %v2734_v48  ;;  %v2820_v17 = vsel %vm2710_vm1, %v2796_v30, 0.0  ;;  %v2797_v58 = vmul.f32 %v2781_v23, %v2781_v23 }
 0x28d   :  { %2818 = vadd.xlane.f32.xlu1 %v2817_v33  ;;  %2821 = vadd.xlane.f32.xlu0 %v2820_v17  ;;  %v2737_v27 = vpop.xlane.xlu0 %2736 }
 0x28e   :  { %v2783_v36 = vsub.f32 %v7375_v25, %v7454_v34  ;;  %v7459_v37 = vmul.f32 0.020408163, %v2737_v27  ;;  %v2798_v10 = vmul.f32 %v2782_v8, %v2782_v8  ;;  %v2823_v44 = vsel %vm2710_vm1, %v2797_v58, 0.0 }
 0x28f   :  { %v2740_v53 = vpop.xlane.xlu1 %2739 }
 0x290   :  { %v2784_v59 = vsub.f32 %v7388_v46, %v7459_v37  ;;  %v7464_v29 = vmul.f32 0.020408163, %v2740_v53  ;;  %v2826_v0 = vsel %vm2710_vm1, %v2798_v10, 0.0  ;;  %v2799_v51 = vmul.f32 %v2783_v36, %v2783_v36 }
 0x291   :  { %2824 = vadd.xlane.f32.xlu1 %v2823_v44  ;;  %2827 = vadd.xlane.f32.xlu0 %v2826_v0  ;;  %v2743_v5 = vpop.xlane.xlu0 %2742 }
 0x292   :  { %v2785_v45 = vsub.f32 %v7395_v24, %v7464_v29  ;;  %v7469_v52 = vmul.f32 0.020408163, %v2743_v5  ;;  %v2800_v13 = vmul.f32 %v2784_v59, %v2784_v59  ;;  %v2829_v26 = vsel %vm2710_vm1, %v2799_v51, 0.0 }
 0x293   :  { %v2746_v54 = vpop.xlane.xlu1 %2745 }
 0x294   :  { %v2786_v19 = vsub.f32 %v7386_v11, %v7469_v52  ;;  %v7474_v1 = vmul.f32 0.020408163, %v2746_v54  ;;  %v2832_v61 = vsel %vm2710_vm1, %v2800_v13, 0.0  ;;  %v2801_v16 = vmul.f32 %v2785_v45, %v2785_v45 }
 0x295   :  { %2830 = vadd.xlane.f32.xlu1 %v2829_v26  ;;  %2833 = vadd.xlane.f32.xlu0 %v2832_v61  ;;  %v2749_v2 = vpop.xlane.xlu0 %2748 }
 0x296   :  { %v2787_v4 = vsub.f32 %v7392_v50, %v7474_v1  ;;  %v7479_v38 = vmul.f32 0.020408163, %v2749_v2  ;;  %v2802_v22 = vmul.f32 %v2786_v19, %v2786_v19  ;;  %v2835_v57 = vsel %vm2710_vm1, %v2801_v16, 0.0 }
 0x297   :  { %v2752_v21 = vpop.xlane.xlu1 %2751 }
 0x298   :  { %v2788_v12 = vsub.f32 %v7405_v47, %v7479_v38  ;;  %v7484_v56 = vmul.f32 0.020408163, %v2752_v21  ;;  %v2838_v15 = vsel %vm2710_vm1, %v2802_v22, 0.0  ;;  %v2803_v18 = vmul.f32 %v2787_v4, %v2787_v4 }
 0x299   :  { %2836 = vadd.xlane.f32.xlu1 %v2835_v57  ;;  %2839 = vadd.xlane.f32.xlu0 %v2838_v15  ;;  %v2755_v14 = vpop.xlane.xlu0 %2754 }
 0x29a   :  { %v2789_v35 = vsub.f32 %v7412_v62, %v7484_v56  ;;  %v7489_v23 = vmul.f32 0.020408163, %v2755_v14  ;;  %v2804_v30 = vmul.f32 %v2788_v12, %v2788_v12  ;;  %v2841_v33 = vsel %vm2710_vm1, %v2803_v18, 0.0 }
 0x29b   :  { %v2758_v48 = vpop.xlane.xlu1 %2757 }
 0x29c   :  { %v2790_v8 = vsub.f32 %v7403_v43, %v7489_v23  ;;  %v7494_v17 = vmul.f32 0.020408163, %v2758_v48  ;;  %v2844_v58 = vsel %vm2710_vm1, %v2804_v30, 0.0  ;;  %v2805_v27 = vmul.f32 %v2789_v35, %v2789_v35  ;;  %v7505_v30 = vld [vmem:[%s7952_s2] sm:$0xff] }
 0x29d   :  { %2842 = vadd.xlane.f32.xlu1 %v2841_v33  ;;  %2845 = vadd.xlane.f32.xlu0 %v2844_v58 }
 0x29e   :  { %v2791_v36 = vsub.f32 %v7409_v49, %v7494_v17  ;;  %v2806_v10 = vmul.f32 %v2790_v8, %v2790_v8  ;;  %v2847_v53 = vsel %vm2710_vm1, %v2805_v27, 0.0 }
 0x2a0   :  { %v2850_v44 = vsel %vm2710_vm1, %v2806_v10, 0.0  ;;  %v2807_v59 = vmul.f32 %v2791_v36, %v2791_v36 }
 0x2a1   :  { %2848 = vadd.xlane.f32.xlu1 %v2847_v53  ;;  %2851 = vadd.xlane.f32.xlu0 %v2850_v44 }
 0x2a2   :  { %v2853_v0 = vsel %vm2710_vm1, %v2807_v59, 0.0  ;;  %v7515_v59 = vld [vmem:[%s7952_s2 + $0x10] sm:$0xff] }
 0x2a5   :  { %2854 = vadd.xlane.f32.xlu1 %v2853_v0 }
 0x312   :  { %v2810_v51 = vpop.xlane.xlu0 %2809 }
 0x313   :  { %v2856_v5 = vmul.f32 0.020408163, %v2810_v51 }
 0x315   :  { %v2888_v45 = vadd.f32 1e-05, %v2856_v5 }
 0x316   :  { %v2813_v13 = vpop.xlane.xlu1 %2812  ;;  %v2816_v54 = vpop.xlane.xlu0 %2815 }
 0x317   :  { %5791 = vrsqrt.f32 %v2888_v45  ;;  %v2857_v26 = vmul.f32 0.020408163, %v2813_v13  ;;  %v2858_v19 = vmul.f32 0.020408163, %v2816_v54 }
 0x319   :  { %v2890_v61 = vadd.f32 1e-05, %v2858_v19  ;;  %v2889_v16 = vadd.f32 1e-05, %v2857_v26 }
 0x31a   :  { %v2819_v2 = vpop.xlane.xlu1 %2818  ;;  %v2822_v4 = vpop.xlane.xlu0 %2821 }
 0x31b   :  { %v2859_v22 = vmul.f32 0.020408163, %v2819_v2  ;;  %v2860_v21 = vmul.f32 0.020408163, %v2822_v4  ;;  %5793 = vrsqrt.f32 %v2890_v61 }
 0x31c   :  { %5795 = vrsqrt.f32 %v2889_v16  ;;  %v7529_v16 = vld [vmem:[%s7952_s2 + $0x20] sm:$0xff] }
 0x31d   :  { %v2891_v57 = vadd.f32 1e-05, %v2859_v22  ;;  %v2892_v12 = vadd.f32 1e-05, %v2860_v21 }
 0x31e   :  { %v2825_v15 = vpop.xlane.xlu1 %2824  ;;  %v2828_v18 = vpop.xlane.xlu0 %2827 }
 0x31f   :  { %5797 = vrsqrt.f32 %v2891_v57  ;;  %v2861_v14 = vmul.f32 0.020408163, %v2825_v15  ;;  %v2862_v35 = vmul.f32 0.020408163, %v2828_v18 }
 0x320   :  { %5799 = vrsqrt.f32 %v2892_v12 }
 0x321   :  { %v5792_v48 = vpop.eup %5791  ;;  %v2894_v33 = vadd.f32 1e-05, %v2862_v35  ;;  %v2893_v8 = vadd.f32 1e-05, %v2861_v14  ;;  %v7539_v14 = vld [vmem:[%s7952_s2 + $0x8] sm:$0xff] }
 0x322   :  { %v2831_v58 = vpop.xlane.xlu1 %2830  ;;  %v2834_v27 = vpop.xlane.xlu0 %2833  ;;  %v7508_v36 = vmul.f32 %v5792_v48, %v7505_v30 }
 0x323   :  { %v2863_v10 = vmul.f32 0.020408163, %v2831_v58  ;;  %v2864_v53 = vmul.f32 0.020408163, %v2834_v27  ;;  %5801 = vrsqrt.f32 %v2894_v33 }
 0x324   :  { %v2936_v44 = vmul.f32 %v7508_v36, %v7424_v55  ;;  %5803 = vrsqrt.f32 %v2893_v8  ;;  %v7524_v55 = vld [vmem:[%s7952_s2 + $0x18] sm:$0xff]  ;;  %v7550_v8 = vld [vmem:[%s7952_s2 + $0x30] sm:$0xff] }
 0x325   :  { %v2895_v0 = vadd.f32 1e-05, %v2863_v10  ;;  %v2896_v51 = vadd.f32 1e-05, %v2864_v53  ;;  %v5794_v5 = vpop.eup %5793 }
 0x326   :  { %v2837_v45 = vpop.xlane.xlu1 %2836  ;;  %2968 = vrot.lane.b32.xlu0 %v2936_v44, %s5824_s23  ;;  %v2840_v13 = vpop.xlane.xlu0 %2839  ;;  %v7519_v19 = vmul.f32 %v5794_v5, %v7515_v59  ;;  %v7563_v5 = vld [vmem:[%s7952_s2 + $0x38] sm:$0xff] }
 0x327   :  { %5805 = vrsqrt.f32 %v2895_v0  ;;  %v2865_v54 = vmul.f32 0.020408163, %v2837_v45  ;;  %v2866_v26 = vmul.f32 0.020408163, %v2840_v13  ;;  %v5796_v61 = vpop.eup %5795  ;;  %v7568_v45 = vld [vmem:[%s7952_s2 + $0x40] sm:$0xff] }
 0x328   :  { %5807 = vrsqrt.f32 %v2896_v51  ;;  %v2938_v22 = vmul.f32 %v7519_v19, %v7422_v40  ;;  %v2921_v53 = vmul.f32 %v5796_v61, %v7539_v14 }
 0x329   :  { %v5798_v2 = vpop.eup %5797  ;;  %v2898_v4 = vadd.f32 1e-05, %v2866_v26  ;;  %v2897_v57 = vadd.f32 1e-05, %v2865_v54 }
 0x32a   :  { %v5800_v21 = vpop.eup %5799  ;;  %v2843_v12 = vpop.xlane.xlu1 %2842  ;;  %v7534_v18 = vmul.f32 %v5798_v2, %v7524_v55  ;;  %2972 = vrot.lane.b32.xlu1 %v2938_v22, %s5824_s23  ;;  %v2937_v26 = vmul.f32 %v2921_v53, %v7432_v63  ;;  %v7579_v22 = vld [vmem:[%s7952_s2 + $0x28] sm:$0xff] }
 0x32b   :  { %v2846_v15 = vpop.xlane.xlu0 %2845  ;;  %v2867_v35 = vmul.f32 0.020408163, %v2843_v12  ;;  %v7543_v33 = vmul.f32 %v5800_v21, %v7529_v16  ;;  %5809 = vrsqrt.f32 %v2898_v4 }
 0x32c   :  { %v2868_v48 = vmul.f32 0.020408163, %v2846_v15  ;;  %v2939_v40 = vmul.f32 %v7534_v18, %v7430_v9  ;;  %5811 = vrsqrt.f32 %v2897_v57 }
 0x32d   :  { %v2899_v58 = vadd.f32 1e-05, %v2867_v35  ;;  %v2940_v10 = vmul.f32 %v7543_v33, %v7439_v7  ;;  %v5802_v44 = vpop.eup %5801 }
 0x32e   :  { %v2900_v27 = vadd.f32 1e-05, %v2868_v48  ;;  %2974 = vrot.lane.b32.xlu1 %v2939_v40, %s5824_s23  ;;  %v7558_v51 = vmul.f32 %v5802_v44, %v7550_v8  ;;  %v5804_v7 = vpop.eup %5803  ;;  %v2849_v21 = vpop.xlane.xlu1 %2848 }
 0x32f   :  { %v2852_v0 = vpop.xlane.xlu0 %2851  ;;  %5813 = vrsqrt.f32 %v2899_v58  ;;  %2976 = vrot.lane.b32.xlu0 %v2940_v10, %s5824_s23  ;;  %v2925_v15 = vmul.f32 %v5804_v7, %v7579_v22  ;;  %v7604_v58 = vld [vmem:[%s7952_s2 + $0x60] sm:$0xff]  ;;  %v7612_v7 = vld [vmem:[%s7952_s2 + $0x48] sm:$0xff] }
 0x330   :  { %v2870_v9 = vmul.f32 0.020408163, %v2852_v0  ;;  %5815 = vrsqrt.f32 %v2900_v27  ;;  %v2942_v61 = vmul.f32 %v7558_v51, %v7449_v39  ;;  %v7589_v39 = vld [vmem:[%s7952_s2 + $0x50] sm:$0xff] }
 0x331   :  { %v5806_v13 = vpop.eup %5805  ;;  %v2941_v10 = vmul.f32 %v2925_v15, %v7443_v60  ;;  %v7621_v60 = vld [vmem:[%s7952_s2 + $0x70] sm:$0xff] }
 0x332   :  { %v2902_v54 = vadd.f32 1e-05, %v2870_v9  ;;  %v5808_v2 = vpop.eup %5807  ;;  %v7574_v4 = vmul.f32 %v5806_v13, %v7563_v5  ;;  %2970 = vrot.lane.b32.xlu1 %v2937_v26, %s5824_s23  ;;  %v2855_v27 = vpop.xlane.xlu1 %2854 }
 0x333   :  { %2980 = vrot.lane.b32.xlu0 %v2942_v61, %s5824_s23  ;;  %v2928_v57 = vmul.f32 %v5808_v2, %v7568_v45 }
 0x334   :  { %5817 = vrsqrt.f32 %v2902_v54  ;;  %v2943_v63 = vmul.f32 %v7574_v4, %v7454_v34  ;;  %v7599_v34 = vld [vmem:[%s7952_s2 + $0x58] sm:$0xff]  ;;  %v2871_v54 = vmul.f32 0.020408163, %v2855_v27 }
 0x335   :  { %v2944_v12 = vmul.f32 %v2928_v57, %v7459_v37  ;;  %v5810_v35 = vpop.eup %5809 }
 0x336   :  { %2982 = vrot.lane.b32.xlu1 %v2943_v63, %s5824_s23  ;;  %v2930_v48 = vmul.f32 %v5810_v35, %v7589_v39  ;;  %v5812_v40 = vpop.eup %5811  ;;  %v2903_v35 = vadd.f32 1e-05, %v2871_v54 }
 0x337   :  { %2984 = vrot.lane.b32.xlu0 %v2944_v12, %s5824_s23  ;;  %v2929_v61 = vmul.f32 %v5812_v40, %v7612_v7  ;;  %v2869_v12 = vmul.f32 0.020408163, %v2849_v21 }
 0x338   :  { %v2946_v44 = vmul.f32 %v2930_v48, %v7469_v52  ;;  %5819 = vrsqrt.f32 %v2903_v35 }
 0x339   :  { %v5814_v37 = vpop.eup %5813 }
 0x33a   :  { %v5816_v0 = vpop.eup %5815  ;;  %v2931_v9 = vmul.f32 %v5814_v37, %v7599_v34  ;;  %2978 = vrot.lane.b32.xlu1 %v2941_v10, %s5824_s23 }
 0x33b   :  { %2988 = vrot.lane.b32.xlu0 %v2946_v44, %s5824_s23  ;;  %v2932_v13 = vmul.f32 %v5816_v0, %v7604_v58 }
 0x33c   :  { %v2947_v26 = vmul.f32 %v2931_v9, %v7474_v1  ;;  %v2945_v1 = vmul.f32 %v2929_v61, %v7464_v29  ;;  %v7641_v29 = vld [vmem:[%s7952_s2 + $0x78] sm:$0xff] }
 0x33d   :  { %v2948_v52 = vmul.f32 %v2932_v13, %v7479_v38  ;;  %v2901_v38 = vadd.f32 1e-05, %v2869_v12 }
 0x33e   :  { %v5818_v2 = vpop.eup %5817  ;;  %2990 = vrot.lane.b32.xlu1 %v2947_v26, %s5824_s23 }
 0x33f   :  { %2992 = vrot.lane.b32.xlu0 %v2948_v52, %s5824_s23  ;;  %v7628_v63 = vmul.f32 %v5818_v2, %v7621_v60  ;;  %5821 = vrsqrt.f32 %v2901_v38 }
 0x341   :  { %v2950_v37 = vmul.f32 %v7628_v63, %v7489_v23 }
 0x342   :  { %2986 = vrot.lane.b32.xlu1 %v2945_v1, %s5824_s23  ;;  %v5820_v21 = vpop.eup %5819 }
 0x343   :  { %2996 = vrot.lane.b32.xlu0 %v2950_v37, %s5824_s23  ;;  %v2935_v23 = vmul.f32 %v5820_v21, %v7641_v29 }
 0x346   :  { %3039 = vperm.xlu1 %5556, %v2921_v53   ;;  %v5825_v53 = vmov 1  }
 0x347   :  { %3034 = vperm.xlu0 %5555, %v7508_v36   ;;  %v7648_v36 = vld [vmem:[%s7952_s2 + $0x68] sm:$0xff] }
 0x349   :  { %v5822_v40 = vpop.eup %5821 }
 0x34a   :  { %3044 = vperm.xlu1 %5556, %v7519_v19   ;;  %v2951_v19 = vmul.f32 %v2935_v23, %v7494_v17 }
 0x34b   :  { %3054 = vperm.xlu0 %5555, %v7543_v33   ;;  %v2933_v33 = vmul.f32 %v5822_v40, %v7648_v36 }
 0x34e   :  { %3049 = vperm.xlu1 %5556, %v7534_v18   ;;  %v2949_v18 = vmul.f32 %v2933_v33, %v7484_v56 }
 0x34f   :  { %3074 = vperm.xlu0 %5555, %v2928_v57  }
 0x352   :  { %3059 = vperm.xlu1 %5556, %v2925_v15  }
 0x353   :  { %3094 = vperm.xlu0 %5555, %v2932_v13  }
 0x356   :  { %2998 = vrot.lane.b32.xlu1 %v2951_v19, %s5824_s23 }
 0x357   :  { %5558 = vset.pattern.permute.xlu0 %v5825_v53 }
 0x35a   :  { %2994 = vrot.lane.b32.xlu1 %v2949_v18, %s5824_s23 }
 0x35e   :  { %3064 = vperm.xlu1 %5556, %v7558_v51  }
 0x362   :  { %3069 = vperm.xlu1 %5556, %v7574_v4  }
 0x366   :  { %3079 = vperm.xlu1 %5556, %v2929_v61  }
 0x36a   :  { %3084 = vperm.xlu1 %5556, %v2930_v48  }
 0x36e   :  { %3089 = vperm.xlu1 %5556, %v2931_v9  }
 0x372   :  { %5557 = vset.pattern.permute.xlu1 %v5825_v53 }
 0x398   :  { %v2969_v57 = vpop.permute.xlu0 %2968 }
 0x399   :  { %v3016_v17 = vsub.f32 %v7505_v30, %v2969_v57 }
 0x39b   :  { %3130 = vperm.xlu1 %5557, %v3016_v17  }
 0x39c   :  { %v2973_v15 = vpop.permute.xlu1 %2972 }
 0x39d   :  { %v3018_v9 = vsub.f32 %v7515_v59, %v2973_v15 }
 0x3a0   :  { %v2975_v27 = vpop.permute.xlu1 %2974 }
 0x3a1   :  { %v2977_v10 = vpop.permute.xlu0 %2976  ;;  %v3019_v44 = vsub.f32 %v7524_v55, %v2975_v27 }
 0x3a2   :  { %v3020_v51 = vsub.f32 %v7529_v16, %v2977_v10 }
 0x3a3   :  { %3145 = vperm.xlu1 %5557, %v3019_v44  }
 0x3a4   :  { %v2971_v56 = vpop.permute.xlu1 %2970 }
 0x3a5   :  { %v2981_v0 = vpop.permute.xlu0 %2980  ;;  %v3017_v4 = vsub.f32 %v7539_v14, %v2971_v56 }
 0x3a6   :  { %v3022_v14 = vsub.f32 %v7550_v8, %v2981_v0 }
 0x3a7   :  { %3135 = vperm.xlu0 %5558, %v3017_v4   ;;  %3150 = vperm.xlu1 %5557, %v3020_v51  }
 0x3a8   :  { %v2983_v48 = vpop.permute.xlu1 %2982 }
 0x3a9   :  { %v3023_v30 = vsub.f32 %v7563_v5, %v2983_v48  ;;  %v2985_v13 = vpop.permute.xlu0 %2984 }
 0x3aa   :  { %v3024_v55 = vsub.f32 %v7568_v45, %v2985_v13 }
 0x3ab   :  { %3140 = vperm.xlu0 %5558, %v3018_v9   ;;  %3165 = vperm.xlu1 %5557, %v3023_v30  }
 0x3ac   :  { %v2979_v54 = vpop.permute.xlu1 %2978 }
 0x3ad   :  { %v3021_v26 = vsub.f32 %v7579_v22, %v2979_v54  ;;  %v2989_v61 = vpop.permute.xlu0 %2988 }
 0x3ae   :  { %v3026_v45 = vsub.f32 %v7589_v39, %v2989_v61 }
 0x3af   :  { %3155 = vperm.xlu0 %5558, %v3021_v26   ;;  %3170 = vperm.xlu1 %5557, %v3024_v55  }
 0x3b0   :  { %v2991_v16 = vpop.permute.xlu1 %2990 }
 0x3b1   :  { %v3027_v52 = vsub.f32 %v7599_v34, %v2991_v16  ;;  %v2993_v22 = vpop.permute.xlu0 %2992 }
 0x3b2   :  { %v3028_v8 = vsub.f32 %v7604_v58, %v2993_v22  ;;  %v5737_v58 = vld [vmem:[%s7953_s3] sm:$0xff]  }
 0x3b3   :  { %3160 = vperm.xlu0 %5558, %v3022_v14   ;;  %3185 = vperm.xlu1 %5557, %v3027_v52  }
 0x3b4   :  { %v2987_v59 = vpop.permute.xlu1 %2986  ;;  %5360 = vmatprep.mubr.bf16.mxu1 %v5737_v58 }
 0x3b5   :  { %v3025_v5 = vsub.f32 %v7612_v7, %v2987_v59  ;;  %v2997_v38 = vpop.permute.xlu0 %2996 }
 0x3b7   :  { %3175 = vperm.xlu0 %5558, %v3025_v5   ;;  %5559 = vset.pattern.permute.xlu1 %v5823_v3 }
 0x3b8   :  { %3099 = vperm.xlu1 %5559, %v2933_v33  }
 0x3bb   :  { %3180 = vperm.xlu0 %5558, %v3026_v45  }
 0x3bc   :  { %3104 = vperm.xlu1 %5559, %v7628_v63   ;;  %v3030_v63 = vsub.f32 %v7621_v60, %v2997_v38 }
 0x3c0   :  { %3109 = vperm.xlu1 %5559, %v2935_v23  }
 0x3c4   :  { %5560 = vset.pattern.permute.xlu1 %v5825_v53 }
 0x3c5   :  { %v3040_v34 = vpop.permute.xlu1 %3039  ;;  %3190 = vperm.xlu1 %5560, %v3028_v8  }
 0x3c6   :  { %v3035_v19 = vpop.permute.xlu0 %3034  ;;  %v3113_v15 = vmul.f32 %v3040_v34, %v7362_v42 }
 0x3c7   :  { %v3112_v60 = vmul.f32 %v3035_v19, %v7356_v31  ;;  %v5755_v31 = vld [vmem:[%s7954_s4 + $0x1c] sm:$0xff]  }
 0x3c8   :  { %5396 = vmatprep.subr.bf16.mxu0 %v5755_v31 }
 0x3c9   :  { %v3045_v2 = vpop.permute.xlu1 %3044  ;;  %5397 = vmatpush3.bf16.msra.mxu0 %v5755_v31  ;;  %v5743_v31 = vld [vmem:[%s7953_s3 + $0x30] sm:$0xff]  }
 0x3ca   :  { %v3114_v51 = vmul.f32 %v3045_v2, %v7354_v6 }
 0x3cd   :  { %v3050_v12 = vpop.permute.xlu1 %3049 }
 0x3ce   :  { %v3115_v56 = vmul.f32 %v3050_v12, %v7358_v41 }
 0x3d1   :  { %v3060_v7 = vpop.permute.xlu1 %3059 }
 0x3d2   :  { %v3117_v42 = vmul.f32 %v3060_v7, %v7378_v28 }
 0x3d5   :  { %v2999_v35 = vpop.permute.xlu1 %2998 }
 0x3d6   :  { %v3031_v1 = vsub.f32 %v7641_v29, %v2999_v35  ;;  %v3055_v29 = vpop.permute.xlu0 %3054 }
 0x3d7   :  { %v3116_v54 = vmul.f32 %v3055_v29, %v7373_v32 }
 0x3d8   :  { %3205 = vperm.xlu1 %5560, %v3031_v1  }
 0x3d9   :  { %v2995_v37 = vpop.permute.xlu1 %2994 }
 0x3da   :  { %v3029_v39 = vsub.f32 %v7648_v36, %v2995_v37  ;;  %v3075_v18 = vpop.permute.xlu0 %3074 }
 0x3db   :  { %v3120_v34 = vmul.f32 %v3075_v18, %v7388_v46 }
 0x3dc   :  { %3195 = vperm.xlu0 %5558, %v3029_v39  }
 0x3dd   :  { %v3065_v21 = vpop.permute.xlu1 %3064 }
 0x3de   :  { %v7678_v36 = vpop.permute.xlu0 %3094  ;;  %v3118_v61 = vmul.f32 %v3065_v21, %v7370_v20 }
 0x3e0   :  { %3200 = vperm.xlu0 %5558, %v3030_v63  }
 0x3e1   :  { %v3070_v23 = vpop.permute.xlu1 %3069 }
 0x3e2   :  { %v3119_v52 = vmul.f32 %v3070_v23, %v7375_v25 }
 0x3e5   :  { %v3080_v40 = vpop.permute.xlu1 %3079 }
 0x3e6   :  { %v3121_v7 = vmul.f32 %v3080_v40, %v7395_v24 }
 0x3e9   :  { %v3085_v33 = vpop.permute.xlu1 %3084 }
 0x3ea   :  { %v3122_v58 = vmul.f32 %v3085_v33, %v7386_v11  ;;  %v3124_v11 = vmul.f32 %v7678_v36, %v7405_v47  ;;  %v5741_v36 = vld [vmem:[%s7953_s3 + $0x20] sm:$0xff]  }
 0x3ed   :  { %v3090_v53 = vpop.permute.xlu1 %3089 }
 0x3ee   :  { %v3123_v20 = vmul.f32 %v3090_v53, %v7392_v50 }
 0x41a   :  { %v3131_v57 = vpop.permute.xlu1 %3130 }
 0x41b   :  { %v3208_v27 = vadd.f32 %v3131_v57, %v3112_v60 }
 0x41d   :  { %v3224_v4 = vmax.f32 %v3208_v27, 0.0 }
 0x422   :  { %v3146_v17 = vpop.permute.xlu1 %3145 }
 0x423   :  { %v3211_v48 = vadd.f32 %v3146_v17, %v3115_v56 }
 0x425   :  { %v3227_v16 = vmax.f32 %v3211_v48, 0.0 }
 0x426   :  { %v3151_v10 = vpop.permute.xlu1 %3150  ;;  %v3136_v44 = vpop.permute.xlu0 %3135 }
 0x427   :  { %v3209_v0 = vadd.f32 %v3136_v44, %v3113_v15  ;;  %v3212_v41 = vadd.f32 %v3151_v10, %v3116_v54 }
 0x429   :  { %v3225_v9 = vmax.f32 %v3209_v0, 0.0  ;;  %v3228_v45 = vmax.f32 %v3212_v41, 0.0  ;;  %v5746_v41 = vld [vmem:[%s7953_s3 + $0x48] sm:$0xff]  }
 0x42a   :  { %v3166_v30 = vpop.permute.xlu1 %3165  ;;  %v3141_v13 = vpop.permute.xlu0 %3140 }
 0x42b   :  { %v3240_v55 = vpack.c.bf16 %v3225_v9, %v3224_v4  ;;  %v3210_v26 = vadd.f32 %v3141_v13, %v3114_v51  ;;  %v3215_v22 = vadd.f32 %v3166_v30, %v3119_v52  ;;  %v5749_v52 = vld [vmem:[%s7953_s3 + $0x60] sm:$0xff]  }
 0x42d   :  { %v3226_v14 = vmax.f32 %v3210_v26, 0.0  ;;  %5344 = vmatprep.subr.bf16.mxu1 %v3240_v55  ;;  %v3231_v35 = vmax.f32 %v3215_v22, 0.0  ;;  %v5742_v26 = vld [vmem:[%s7953_s3 + $0x28] sm:$0xff]  }
 0x42e   :  { %5345 = vmatpush3.bf16.msra.mxu1 %v3240_v55  ;;  %v3156_v6 = vpop.permute.xlu0 %3155  ;;  %v3171_v5 = vpop.permute.xlu1 %3170  ;;  %v5756_v22 = vld [vmem:[%s7954_s4 + $0x24] sm:$0xff]  }
 0x42f   :  { %v3241_v59 = vpack.c.bf16 %v3227_v16, %v3226_v14  ;;  %v3213_v32 = vadd.f32 %v3156_v6, %v3117_v42  ;;  %v3216_v1 = vadd.f32 %v3171_v5, %v3120_v34  ;;  %v5744_v42 = vld [vmem:[%s7953_s3 + $0x38] sm:$0xff]   ;;  %v5745_v16 = vld [vmem:[%s7953_s3 + $0x40] sm:$0xff]   ;;  %v5747_v14 = vld [vmem:[%s7953_s3 + $0x50] sm:$0xff]   ;;  %5398 = vmatprep.subr.bf16.mxu0 %v5756_v22  ;;  %v7761_v34 = vsel %vm3629_vm2, 65535, %v5823_v3 }
 0x430   :  { %v5748_v6 = vld [vmem:[%s7953_s3 + $0x58] sm:$0xff]   ;;  %5399 = vmatpush3.bf16.msra.mxu0 %v5756_v22 }
 0x431   :  { %v3229_v8 = vmax.f32 %v3213_v32, 0.0  ;;  %5346 = vmatprep.subr.bf16.mxu1 %v3241_v59  ;;  %v3232_v21 = vmax.f32 %v3216_v1, 0.0  ;;  %v5751_v32 = vld [vmem:[%s7953_s3 + $0x70] sm:$0xff]   ;;  %v5752_v5 = vld [vmem:[%s7953_s3 + $0x78] sm:$0xff]  }
 0x432   :  { %5347 = vmatpush3.bf16.msra.mxu1 %v3241_v59  ;;  %v3161_v28 = vpop.permute.xlu0 %3160  ;;  %v3186_v37 = vpop.permute.xlu1 %3185  ;;  %v5750_v59 = vld [vmem:[%s7953_s3 + $0x68] sm:$0xff]  }
 0x433   :  { %v3242_v2 = vpack.c.bf16 %v3229_v8, %v3228_v45  ;;  %v3214_v12 = vadd.f32 %v3161_v28, %v3118_v61  ;;  %v3219_v23 = vadd.f32 %v3186_v37, %v3123_v20  ;;  %v5753_v61 = vld [vmem:[%s7953_s3 + $0x80] sm:$0xff]   ;;  %v5754_v45 = vld [vmem:[%s7953_s3 + $0x88] sm:$0xff]   ;;  %v5758_v28 = vld [vmem:[%s7954_s4 + $0x34] ss:$0 sps:$4 sm:$0x11]  }
 0x434   :  { %v5757_v8 = vld [vmem:[%s7954_s4 + $0x2c] sm:$0xff]  }
 0x435   :  { %v3230_v25 = vmax.f32 %v3214_v12, 0.0  ;;  %5348 = vmatprep.subr.bf16.mxu1 %v3242_v2  ;;  %v3235_v29 = vmax.f32 %v3219_v23, 0.0  ;;  %5400 = vmatprep.subr.bf16.mxu0 %v5757_v8  ;;  %v5759_v12 = vld [vmem:[%s7954_s4] sm:$0xff]   ;;  %v5760_v23 = vld [vmem:[%s7954_s4 + $0x8] sm:$0xff]  }
 0x436   :  { %5349 = vmatpush3.bf16.msra.mxu1 %v3242_v2  ;;  %v3176_v39 = vpop.permute.xlu0 %3175  ;;  %5401 = vmatpush3.bf16.msra.mxu0 %v5757_v8  ;;  %v3633_v2 = vand.u32 %v5758_v28, %v7761_v34 }
 0x437   :  { %v3243_v38 = vpack.c.bf16 %v3231_v35, %v3230_v25  ;;  %v3217_v63 = vadd.f32 %v3176_v39, %v3121_v7  ;;  %v3100_v50 = vpop.permute.xlu1 %3099 }
 0x438   :  { %v3125_v33 = vmul.f32 %v3100_v50, %v7412_v62  ;;  %v5738_v62 = vld [vmem:[%s7953_s3 + $0x8] sm:$0xff]   ;;  %5402 = vmatprep.subr.bf16.mxu0 %v3633_v2 }
 0x439   :  { %v3233_v46 = vmax.f32 %v3217_v63, 0.0  ;;  %5350 = vmatprep.subr.bf16.mxu1 %v3243_v38 }
 0x43a   :  { %5351 = vmatpush3.bf16.msra.mxu1 %v3243_v38  ;;  %v3181_v19 = vpop.permute.xlu0 %3180  ;;  %5403 = vmatpush3.bf16.msra.mxu0 %v3633_v2 }
 0x43b   :  { %v3244_v24 = vpack.c.bf16 %v3233_v46, %v3232_v21  ;;  %v3218_v40 = vadd.f32 %v3181_v19, %v3122_v58  ;;  %v3105_v53 = vpop.permute.xlu1 %3104  ;;  %5408 = vmatprep.subr.bf16.mxu0 %v5759_v12  ;;  %v5761_v19 = vld [vmem:[%s7954_s4 + $0x10] sm:$0xff]  }
 0x43c   :  { %v3126_v0 = vmul.f32 %v3105_v53, %v7403_v43  ;;  %v5739_v43 = vld [vmem:[%s7953_s3 + $0x10] sm:$0xff]  }
 0x43d   :  { %v3234_v18 = vmax.f32 %v3218_v40, 0.0  ;;  %5352 = vmatprep.subr.bf16.mxu1 %v3244_v24 }
 0x43e   :  { %5353 = vmatpush3.bf16.msra.mxu1 %v3244_v24  ;;  %v5762_v24 = vld [vmem:[%s7954_s4 + $0x18] ss:$0 sps:$4 sm:$0x11]  }
 0x43f   :  { %v3245_v57 = vpack.c.bf16 %v3235_v29, %v3234_v18  ;;  %v3110_v17 = vpop.permute.xlu1 %3109  ;;  %v3712_v53 = vand.u32 %v5762_v24, %v7761_v34  ;;  %v5779_v24 = vld [vmem:[%s7954_s4 + $0xa8] sm:$0xff]  }
 0x440   :  { %v3127_v44 = vmul.f32 %v3110_v17, %v7409_v49  ;;  %v5740_v49 = vld [vmem:[%s7953_s3 + $0x18] sm:$0xff]  }
 0x441   :  { %5354 = vmatprep.subr.bf16.mxu1 %v3245_v57 }
 0x442   :  { %5355 = vmatpush3.bf16.msra.mxu1 %v3245_v57 }
 0x444   :  { %v3191_v60 = vpop.permute.xlu1 %3190 }
 0x445   :  { %v3220_v15 = vadd.f32 %v3191_v60, %v3124_v11  ;;  %v5763_v60 = vld [vmem:[%s7954_s4 + $0x38] sm:$0xff]  }
 0x447   :  { %v3236_v51 = vmax.f32 %v3220_v15, 0.0 }
 0x457   :  { %v3206_v27 = vpop.permute.xlu1 %3205 }
 0x458   :  { %v3223_v4 = vadd.f32 %v3206_v27, %v3127_v44  ;;  %v5764_v44 = vld [vmem:[%s7954_s4 + $0x40] sm:$0xff]  }
 0x45a   :  { %v3239_v54 = vmax.f32 %v3223_v4, 0.0 }
 0x45b   :  { %v3196_v10 = vpop.permute.xlu0 %3195 }
 0x45c   :  { %v3221_v56 = vadd.f32 %v3196_v10, %v3125_v33 }
 0x45e   :  { %v3237_v48 = vmax.f32 %v3221_v56, 0.0 }
 0x45f   :  { %v3201_v9 = vpop.permute.xlu0 %3200 }
 0x460   :  { %v3246_v30 = vpack.c.bf16 %v3237_v48, %v3236_v51  ;;  %v3222_v13 = vadd.f32 %v3201_v9, %v3126_v0  ;;  %v5765_v0 = vld [vmem:[%s7954_s4 + $0x48] sm:$0xff]   ;;  %v5766_v51 = vld [vmem:[%s7954_s4 + $0x50] ss:$0 sps:$4 sm:$0x11]  }
 0x462   :  { %v3238_v55 = vmax.f32 %v3222_v13, 0.0  ;;  %5356 = vmatprep.subr.bf16.mxu1 %v3246_v30 }
 0x463   :  { %5357 = vmatpush3.bf16.msra.mxu1 %v3246_v30 }
 0x464   :  { %v3247_v47 = vpack.c.bf16 %v3239_v54, %v3238_v55  ;;  %v3799_v54 = vand.u32 %v5766_v51, %v7761_v34 }
 0x466   :  { %5358 = vmatprep.subr.bf16.mxu1 %v3247_v47 }
 0x467   :  { %5359 = vmatpush3.bf16.msra.mxu1 %v3247_v47  ;;  %v5767_v47 = vld [vmem:[%s7954_s4 + $0x54] sm:$0xff]  }
 0x46a   :  { %5361 = vmatmul.mubr.bf16.vlgmr.msra.gmra.mrb[136].mxu1 %v5738_v62 }
 0x46b   :  { %5364 = vmatprep.mubr.bf16.mxu1 %v5739_v43 }
 0x472   :  { %5365 = vmatmul.mubr.bf16.gmra.mrb[140].mxu1 %v5740_v49 }
 0x473   :  { %5368 = vmatprep.mubr.bf16.mxu1 %v5741_v36 }
 0x47a   :  { %5369 = vmatmul.mubr.bf16.gmra.mrb[144].mxu1 %v5742_v26 }
 0x47b   :  { %5372 = vmatprep.mubr.bf16.mxu1 %v5743_v31  ;;  %v5768_v31 = vld [vmem:[%s7954_s4 + $0x5c] sm:$0xff]  }
 0x482   :  { %5373 = vmatmul.mubr.bf16.gmra.mrb[148].mxu1 %v5744_v42 }
 0x483   :  { %5376 = vmatprep.mubr.bf16.mxu1 %v5745_v16  ;;  %v5769_v16 = vld [vmem:[%s7954_s4 + $0x64] sm:$0xff]  }
 0x48a   :  { %5377 = vmatmul.mubr.bf16.gmra.mrb[152].mxu1 %v5746_v41  ;;  %v5770_v41 = vld [vmem:[%s7954_s4 + $0x6c] ss:$0 sps:$4 sm:$0x11]  }
 0x48b   :  { %5380 = vmatprep.mubr.bf16.mxu1 %v5747_v14 }
 0x492   :  { %5381 = vmatmul.mubr.bf16.gmra.mrb[156].mxu1 %v5748_v6 }
 0x493   :  { %5384 = vmatprep.mubr.bf16.mxu1 %v5749_v52 }
 0x49a   :  { %5385 = vmatmul.mubr.bf16.gmra.mrb[160].mxu1 %v5750_v59 }
 0x49b   :  { %5388 = vmatprep.mubr.bf16.mxu1 %v5751_v32 }
 0x4a2   :  { %5389 = vmatmul.mubr.bf16.gmra.mrb[164].mxu1 %v5752_v5  ;;  %v3890_v5 = vand.u32 %v5770_v41, %v7761_v34 }
 0x4a3   :  { %5392 = vmatprep.mubr.bf16.mxu1 %v5753_v61 }
 0x4aa   :  { %5393 = vmatmul.mubr.bf16.gmra.mrb[168].mxu1 %v5754_v45  ;;  %v5771_v45 = vld [vmem:[%s7954_s4 + $0x70] sm:$0xff]  }
 0x53d   :  { %v5362_v7 = vpop.f32.mrb[136].mxu1 }
 0x53e   :  { %v3426_v35 = vpop.f32.mrb[137].mxu1 }
 0x53f   :  { %v5363_v1 = vpop.f32.mrb[138].mxu1 }
 0x540   :  { %v3570_v25 = vpack.c.bf16 %v5363_v1, %v5362_v7  ;;  %v3429_v37 = vpop.f32.mrb[139].mxu1  ;;  %v5772_v7 = vld [vmem:[%s7954_s4 + $0x78] sm:$0xff]   ;;  %v5773_v1 = vld [vmem:[%s7954_s4 + $0x80] sm:$0xff]  }
 0x541   :  { %v3569_v39 = vpack.c.bf16 %v3429_v37, %v3426_v35 }
 0x545   :  { %v5366_v20 = vpop.f32.mrb[140].mxu1 }
 0x546   :  { %v3442_v38 = vpop.f32.mrb[141].mxu1 }
 0x547   :  { %v5367_v63 = vpop.f32.mrb[142].mxu1 }
 0x548   :  { %v3572_v3 = vpack.c.bf16 %v5367_v63, %v5366_v20  ;;  %v3445_v58 = vpop.f32.mrb[143].mxu1 }
 0x549   :  { %v3571_v21 = vpack.c.bf16 %v3445_v58, %v3442_v38  ;;  %v5775_v58 = vld [vmem:[%s7954_s4 + $0x8c] sm:$0xff]  }
 0x54b   :  { %5404 = vmatprep.mubr.msk.bf16.mxu0 %vm2710_vm1, %v3571_v21  ;;  %v5776_v21 = vld [vmem:[%s7954_s4 + $0x94] sm:$0xff]  }
 0x54c   :  { %5405 = vmatmul.mubr.msk.bf16.vlgmr.msra.gmra.mrb[104].mxu0 %vm2710_vm1, %v3572_v3 }
 0x54d   :  { %5409 = vmatpush3.bf16.msra.mxu0 %v5759_v12  ;;  %5416 = vmatprep.mubr.msk.bf16.mxu0 %vm2710_vm1, %v3569_v39  ;;  %v5370_v46 = vpop.f32.mrb[144].mxu1 }
 0x54e   :  { %5410 = vmatprep.subr.bf16.mxu0 %v5760_v23  ;;  %v3458_v40 = vpop.f32.mrb[145].mxu1 }
 0x54f   :  { %v5371_v29 = vpop.f32.mrb[146].mxu1 }
 0x550   :  { %v3574_v18 = vpack.c.bf16 %v5371_v29, %v5370_v46  ;;  %v3461_v57 = vpop.f32.mrb[147].mxu1  ;;  %v5778_v46 = vld [vmem:[%s7954_s4 + $0xa4] ss:$0 sps:$4 sm:$0x11]   ;;  %v5781_v29 = vld [vmem:[%s7954_s4 + $0xb8] sm:$0xff]  }
 0x551   :  { %5411 = vmatpush3.bf16.msra.mxu0 %v5760_v23  ;;  %v3573_v50 = vpack.c.bf16 %v3461_v57, %v3458_v40  ;;  %v5777_v23 = vld [vmem:[%s7954_s4 + $0x9c] sm:$0xff]   ;;  %v5780_v40 = vld [vmem:[%s7954_s4 + $0xb0] sm:$0xff]  }
 0x552   :  { %5412 = vmatprep.subr.bf16.mxu0 %v5761_v19 }
 0x555   :  { %5413 = vmatpush3.bf16.msra.mxu0 %v5761_v19  ;;  %v7780_v17 = vpop.f32.mrb[148].mxu1  ;;  %v4072_v19 = vand.u32 %v5778_v46, %v7761_v34 }
 0x556   :  { %5414 = vmatprep.subr.bf16.mxu0 %v3712_v53  ;;  %v3474_v11 = vpop.f32.mrb[149].mxu1 }
 0x557   :  { %v5375_v33 = vpop.f32.mrb[150].mxu1 }
 0x558   :  { %v3576_v15 = vpack.c.bf16 %v5375_v33, %v7780_v17  ;;  %v3477_v27 = vpop.f32.mrb[151].mxu1  ;;  %v5785_v17 = vld [vmem:[%s7954_s4 + $0xd4] sm:$0xff]   ;;  %v5787_v33 = vld [vmem:[%s7954_s4 + $0xe0] sm:$0xff]  }
 0x559   :  { %5415 = vmatpush3.bf16.msra.mxu0 %v3712_v53  ;;  %v3575_v10 = vpack.c.bf16 %v3477_v27, %v3474_v11  ;;  %v5784_v53 = vld [vmem:[%s7954_s4 + $0xcc] sm:$0xff]  }
 0x55a   :  { %5420 = vmatprep.subr.bf16.mxu0 %v5763_v60  ;;  %v5789_v27 = vld [vmem:[%s7954_s4 + $0xf0] sm:$0xff]  }
 0x55c   :  { %5417 = vmatmul.mubr.msk.bf16.vlgmr.msra.gmra.mrb[104].mxu0 %vm2710_vm1, %v3570_v25  ;;  %v5774_v25 = vld [vmem:[%s7954_s4 + $0x88] ss:$0 sps:$4 sm:$0x11]  }
 0x55d   :  { %5421 = vmatpush3.bf16.msra.mxu0 %v5763_v60  ;;  %5428 = vmatprep.mubr.msk.bf16.mxu0 %vm2710_vm1, %v3573_v50  ;;  %v7791_v56 = vpop.f32.mrb[152].mxu1  ;;  %v3981_v3 = vand.u32 %v5774_v25, %v7761_v34  ;;  %v5783_v50 = vld [vmem:[%s7954_s4 + $0xc4] sm:$0xff]   ;;  %v5786_v60 = vld [vmem:[%s7954_s4 + $0xdc] ss:$0 sps:$4 sm:$0x11]  }
 0x55e   :  { %5422 = vmatprep.subr.bf16.mxu0 %v5764_v44  ;;  %v3490_v4 = vpop.f32.mrb[153].mxu1  ;;  %v4254_v11 = vand.u32 %v5786_v60, %v7761_v34 }
 0x55f   :  { %v7799_v48 = vpop.f32.mrb[154].mxu1 }
 0x560   :  { %v3578_v9 = vpack.c.bf16 %v7799_v48, %v7791_v56  ;;  %v3493_v30 = vpop.f32.mrb[155].mxu1 }
 0x561   :  { %5423 = vmatpush3.bf16.msra.mxu0 %v5764_v44  ;;  %v3577_v13 = vpack.c.bf16 %v3493_v30, %v3490_v4 }
 0x562   :  { %5424 = vmatprep.subr.bf16.mxu0 %v5765_v0 }
 0x565   :  { %5425 = vmatpush3.bf16.msra.mxu0 %v5765_v0  ;;  %v7804_v55 = vpop.f32.mrb[156].mxu1 }
 0x566   :  { %5426 = vmatprep.subr.bf16.mxu0 %v3799_v54  ;;  %v3506_v62 = vpop.f32.mrb[157].mxu1 }
 0x567   :  { %v7809_v43 = vpop.f32.mrb[158].mxu1 }
 0x568   :  { %v3580_v49 = vpack.c.bf16 %v7809_v43, %v7804_v55  ;;  %v3509_v36 = vpop.f32.mrb[159].mxu1 }
 0x569   :  { %5427 = vmatpush3.bf16.msra.mxu0 %v3799_v54  ;;  %v3579_v26 = vpack.c.bf16 %v3509_v36, %v3506_v62 }
 0x56a   :  { %5432 = vmatprep.subr.bf16.mxu0 %v5767_v47 }
 0x56c   :  { %5429 = vmatmul.mubr.msk.bf16.vlgmr.msra.gmra.mrb[104].mxu0 %vm2710_vm1, %v3574_v18  ;;  %v5782_v18 = vld [vmem:[%s7954_s4 + $0xc0] ss:$0 sps:$4 sm:$0x11]  }
 0x56d   :  { %5433 = vmatpush3.bf16.msra.mxu0 %v5767_v47  ;;  %5440 = vmatprep.mubr.msk.bf16.mxu0 %vm2710_vm1, %v3575_v10  ;;  %v7818_v42 = vpop.f32.mrb[160].mxu1  ;;  %v4163_v57 = vand.u32 %v5782_v18, %v7761_v34  ;;  %v5790_v10 = vld [vmem:[%s7954_s4 + $0xf8] ss:$0 sps:$4 sm:$0x11]  }
 0x56e   :  { %5434 = vmatprep.subr.bf16.mxu0 %v5768_v31  ;;  %v3522_v14 = vpop.f32.mrb[161].mxu1  ;;  %v4345_v44 = vand.u32 %v5790_v10, %v7761_v34 }
 0x56f   :  { %v7826_v6 = vpop.f32.mrb[162].mxu1 }
 0x570   :  { %v3582_v52 = vpack.c.bf16 %v7826_v6, %v7818_v42  ;;  %v3525_v59 = vpop.f32.mrb[163].mxu1 }
 0x571   :  { %5435 = vmatpush3.bf16.msra.mxu0 %v5768_v31  ;;  %v3581_v32 = vpack.c.bf16 %v3525_v59, %v3522_v14 }
 0x572   :  { %5436 = vmatprep.subr.bf16.mxu0 %v5769_v16 }
 0x575   :  { %5437 = vmatpush3.bf16.msra.mxu0 %v5769_v16  ;;  %v7831_v61 = vpop.f32.mrb[164].mxu1 }
 0x576   :  { %5438 = vmatprep.subr.bf16.mxu0 %v3890_v5  ;;  %v3538_v22 = vpop.f32.mrb[165].mxu1 }
 0x577   :  { %v7836_v8 = vpop.f32.mrb[166].mxu1 }
 0x578   :  { %v3584_v28 = vpack.c.bf16 %v7836_v8, %v7831_v61  ;;  %v3541_v2 = vpop.f32.mrb[167].mxu1 }
 0x579   :  { %5439 = vmatpush3.bf16.msra.mxu0 %v3890_v5  ;;  %v3583_v12 = vpack.c.bf16 %v3541_v2, %v3538_v22 }
 0x57a   :  { %5444 = vmatprep.subr.bf16.mxu0 %v5771_v45 }
 0x57c   :  { %5441 = vmatmul.mubr.msk.bf16.vlgmr.msra.gmra.mrb[104].mxu0 %vm2710_vm1, %v3576_v15  ;;  %v5788_v15 = vld [vmem:[%s7954_s4 + $0xe8] sm:$0xff]  }
 0x57d   :  { %5445 = vmatpush3.bf16.msra.mxu0 %v5771_v45  ;;  %5452 = vmatprep.mubr.msk.bf16.mxu0 %vm2710_vm1, %v3577_v13  ;;  %v7845_v35 = vpop.f32.mrb[168].mxu1 }
 0x57e   :  { %5446 = vmatprep.subr.bf16.mxu0 %v5772_v7  ;;  %v3554_v37 = vpop.f32.mrb[169].mxu1 }
 0x57f   :  { %v7853_v39 = vpop.f32.mrb[170].mxu1 }
 0x580   :  { %v3586_v20 = vpack.c.bf16 %v7853_v39, %v7845_v35  ;;  %v3557_v38 = vpop.f32.mrb[171].mxu1 }
 0x581   :  { %5447 = vmatpush3.bf16.msra.mxu0 %v5772_v7  ;;  %v3585_v63 = vpack.c.bf16 %v3557_v38, %v3554_v37 }
 0x582   :  { %5448 = vmatprep.subr.bf16.mxu0 %v5773_v1 }
 0x585   :  { %5449 = vmatpush3.bf16.msra.mxu0 %v5773_v1 }
 0x586   :  { %5450 = vmatprep.subr.bf16.mxu0 %v3981_v3 }
 0x589   :  { %5451 = vmatpush3.bf16.msra.mxu0 %v3981_v3 }
 0x58a   :  { %5456 = vmatprep.subr.bf16.mxu0 %v5775_v58 }
 0x58c   :  { %5453 = vmatmul.mubr.msk.bf16.vlgmr.msra.gmra.mrb[104].mxu0 %vm2710_vm1, %v3578_v9 }
 0x58d   :  { %5457 = vmatpush3.bf16.msra.mxu0 %v5775_v58  ;;  %5464 = vmatprep.mubr.msk.bf16.mxu0 %vm2710_vm1, %v3579_v26 }
 0x58e   :  { %5458 = vmatprep.subr.bf16.mxu0 %v5776_v21 }
 0x591   :  { %5459 = vmatpush3.bf16.msra.mxu0 %v5776_v21 }
 0x592   :  { %5460 = vmatprep.subr.bf16.mxu0 %v5777_v23 }
 0x595   :  { %5461 = vmatpush3.bf16.msra.mxu0 %v5777_v23 }
 0x596   :  { %5462 = vmatprep.subr.bf16.mxu0 %v4072_v19 }
 0x599   :  { %5463 = vmatpush3.bf16.msra.mxu0 %v4072_v19 }
 0x59a   :  { %5468 = vmatprep.subr.bf16.mxu0 %v5779_v24 }
 0x59c   :  { %5465 = vmatmul.mubr.msk.bf16.vlgmr.msra.gmra.mrb[104].mxu0 %vm2710_vm1, %v3580_v49 }
 0x59d   :  { %5469 = vmatpush3.bf16.msra.mxu0 %v5779_v24  ;;  %5476 = vmatprep.mubr.msk.bf16.mxu0 %vm2710_vm1, %v3581_v32 }
 0x59e   :  { %5470 = vmatprep.subr.bf16.mxu0 %v5780_v40 }
 0x5a1   :  { %5471 = vmatpush3.bf16.msra.mxu0 %v5780_v40 }
 0x5a2   :  { %5472 = vmatprep.subr.bf16.mxu0 %v5781_v29 }
 0x5a5   :  { %5473 = vmatpush3.bf16.msra.mxu0 %v5781_v29 }
 0x5a6   :  { %5474 = vmatprep.subr.bf16.mxu0 %v4163_v57 }
 0x5a9   :  { %5475 = vmatpush3.bf16.msra.mxu0 %v4163_v57 }
 0x5aa   :  { %5480 = vmatprep.subr.bf16.mxu0 %v5783_v50 }
 0x5ac   :  { %5477 = vmatmul.mubr.msk.bf16.vlgmr.msra.gmra.mrb[104].mxu0 %vm2710_vm1, %v3582_v52 }
 0x5ad   :  { %5481 = vmatpush3.bf16.msra.mxu0 %v5783_v50  ;;  %5488 = vmatprep.mubr.msk.bf16.mxu0 %vm2710_vm1, %v3583_v12 }
 0x5ae   :  { %5482 = vmatprep.subr.bf16.mxu0 %v5784_v53 }
 0x5b1   :  { %5483 = vmatpush3.bf16.msra.mxu0 %v5784_v53 }
 0x5b2   :  { %5484 = vmatprep.subr.bf16.mxu0 %v5785_v17 }
 0x5b5   :  { %5485 = vmatpush3.bf16.msra.mxu0 %v5785_v17 }
 0x5b6   :  { %5486 = vmatprep.subr.bf16.mxu0 %v4254_v11 }
 0x5b9   :  { %5487 = vmatpush3.bf16.msra.mxu0 %v4254_v11 }
 0x5ba   :  { %5492 = vmatprep.subr.bf16.mxu0 %v5787_v33 }
 0x5bc   :  { %5489 = vmatmul.mubr.msk.bf16.vlgmr.msra.gmra.mrb[104].mxu0 %vm2710_vm1, %v3584_v28 }
 0x5bd   :  { %5493 = vmatpush3.bf16.msra.mxu0 %v5787_v33  ;;  %5500 = vmatprep.mubr.msk.bf16.mxu0 %vm2710_vm1, %v3585_v63 }
 0x5be   :  { %5494 = vmatprep.subr.bf16.mxu0 %v5788_v15 }
 0x5c1   :  { %5495 = vmatpush3.bf16.msra.mxu0 %v5788_v15 }
 0x5c2   :  { %5496 = vmatprep.subr.bf16.mxu0 %v5789_v27 }
 0x5c5   :  { %5497 = vmatpush3.bf16.msra.mxu0 %v5789_v27 }
 0x5c6   :  { %5498 = vmatprep.subr.bf16.mxu0 %v4345_v44 }
 0x5c9   :  { %5499 = vmatpush3.bf16.msra.mxu0 %v4345_v44 }
 0x5cc   :  { %5501 = vmatmul.mubr.msk.bf16.vlgmr.msra.gmra.mrb[104].mxu0 %vm2710_vm1, %v3586_v20 }
 0x69f   :  { %v5502_v56 = vpop.f32.mrb[104].mxu0 }
 0x6a0   :  { %4402 = vst.msk [vmem:[%s7955_s5 + $0x10] sm:$0xff] %vm2710_vm1, %v5502_v56  ;;  %v4381_v0 = vpop.f32.mrb[105].mxu0 }
 0x6a1   :  { %4400 = vst.msk [vmem:[%s7955_s5] sm:$0xff] %vm2710_vm1, %v4381_v0  ;;  %v5503_v34 = vpop.f32.mrb[106].mxu0 }
 0x6a2   :  { %4403 = vst.msk [vmem:[%s7955_s5 + $0x18] sm:$0xff] %vm2710_vm1, %v5503_v34  ;;  %v4384_v51 = vpop.f32.mrb[107].mxu0 }
 0x6a3   :  { %4401 = vst.msk [vmem:[%s7955_s5 + $0x8] sm:$0xff] %vm2710_vm1, %v4384_v51 }

</bundles_post_ra>
